<compile_context>
chip_gen: v6e
topology: v6e:2x2x1
jax: 0.10.0
libtpu: 0.0.40
codegen_flags: <defaults>
</compile_context>

<pallas_src>
import jax
import jax.numpy as jnp
from jax.experimental import pallas as pl
from jax.experimental.pallas import tpu as pltpu

EPS = 1e-12            # F.normalize default eps
SUBLANE = 8            # f32 sublane count: pad batch to this
LABEL_ALIGN = 256      # label padding granularity (matches 256-wide MXU N)
LABEL_TILE_MAX = 512   # largest single label tile per grid step


# ----------------------------- Pallas kernels ------------------------------

def _encode_image_kernel(patch_ref, w_ref, out_ref):
    """Vision stand-in encode + F.normalize (gridless, whole arrays in VMEM).

    patch_ref : [P, B_pad, Dpatch] bf16   image patches (padded batch rows = 0)
    w_ref     : [Dpatch, Dp]       bf16   folded (patch_embed @ visual_projection)
    out_ref   : [B_pad, Dp]        bf16   L2-normalized image embeddings
    """
    p = patch_ref.shape[0]
    # Mean pool over patches (leading axis): cheap VPU adds, no dense pool matmul.
    acc = patch_ref[0].astype(jnp.float32)
    for i in range(1, p):
        acc = acc + patch_ref[i].astype(jnp.float32)
    pooled = acc * (1.0 / p)                                        # [B_pad, Dpatch] f32
    emb = jnp.dot(pooled.astype(jnp.bfloat16), w_ref[...],
                  preferred_element_type=jnp.float32)               # [B_pad, Dp]
    # F.normalize(p=2, dim=-1): x / max(||x||, eps) == x * rsqrt(max(ss, eps^2))
    ss = jnp.sum(emb * emb, axis=-1, keepdims=True)
    emb = emb * jax.lax.rsqrt(jnp.maximum(ss, EPS * EPS))           # pad rows stay 0
    out_ref[...] = emb.astype(jnp.bfloat16)


def _encode_labels_kernel(tok_ref, proj_ref, out_ref):
    """Text stand-in encode + F.normalize (one-time setup, gridless).

    tok_ref  : [S, L_pad, Dm] bf16   label token embeddings (padded rows = 0)
    proj_ref : [Dm, Dp]       bf16   text projection
    out_ref  : [L_pad, Dp]    bf16   L2-normalized label embeddings
    """
    s = tok_ref.shape[0]
    acc = tok_ref[0].astype(jnp.float32)
    for i in range(1, s):
        acc = acc + tok_ref[i].astype(jnp.float32)
    pooled = acc * (1.0 / s)                                        # [L_pad, Dm] f32
    emb = jnp.dot(pooled.astype(jnp.bfloat16), proj_ref[...],
                  preferred_element_type=jnp.float32)               # [L_pad, Dp]
    ss = jnp.sum(emb * emb, axis=-1, keepdims=True)
    emb = emb * jax.lax.rsqrt(jnp.maximum(ss, EPS * EPS))           # pad rows -> exactly 0
    out_ref[...] = emb.astype(jnp.bfloat16)


def _logits_kernel(img_ref, labels_t_ref, out_ref):
    """Cosine-similarity logits, one lane-dense label tile per grid step.

    img_ref      : [B_pad, Dp]     bf16  normalized image embeddings
    labels_t_ref : [Dp, L_TILE]    bf16  pre-transposed normalized label embeds
    out_ref      : [B_pad, L_TILE] f32   logits tile (unmasked stores)
    """
    out_ref[...] = jnp.dot(img_ref[...], labels_t_ref[...],
                           preferred_element_type=jnp.float32)


# ------------------------------ wrappers ------------------------------------

def _vmem_full():
    # Whole-array block resident in VMEM (gridless encode kernels only).
    return pl.BlockSpec(memory_space=pltpu.MemorySpace.VMEM)


def _round_up(x, m):
    return pl.cdiv(x, m) * m


def encode_image(patches, w_vision):
    b_pad = patches.shape[1]
    dp = w_vision.shape[1]
    return pl.pallas_call(
        _encode_image_kernel,
        out_shape=jax.ShapeDtypeStruct((b_pad, dp), jnp.bfloat16),
        in_specs=[_vmem_full(), _vmem_full()],
        out_specs=_vmem_full(),
    )(patches, w_vision)


def encode_labels(tokens, text_projection):
    l_pad = tokens.shape[1]
    dp = text_projection.shape[1]
    return pl.pallas_call(
        _encode_labels_kernel,
        out_shape=jax.ShapeDtypeStruct((l_pad, dp), jnp.bfloat16),
        in_specs=[_vmem_full(), _vmem_full()],
        out_specs=_vmem_full(),
    )(tokens, text_projection)


def label_logits(img_emb, labels_t, l_tile):
    b_pad, dp = img_emb.shape
    l_pad = labels_t.shape[1]
    return pl.pallas_call(
        _logits_kernel,
        out_shape=jax.ShapeDtypeStruct((b_pad, l_pad), jnp.float32),
        grid=(l_pad // l_tile,),
        in_specs=[
            pl.BlockSpec((b_pad, dp), lambda j: (0, 0)),       # tiny, constant block
            pl.BlockSpec((dp, l_tile), lambda j: (0, j)),      # streamed label tiles
        ],
        out_specs=pl.BlockSpec((b_pad, l_tile), lambda j: (0, j)),
        # label tiles are independent -> parallel (megacore-shardable on v7x)
        compiler_params=pltpu.CompilerParams(
            dimension_semantics=("parallel",)),
    )(img_emb, labels_t)


# ------------------------------- glue ---------------------------------------

def images_to_patches(images, patch):
    """[B, C, H, W] (NCHW, as in torch) -> [B, P, C*patch*patch] patches."""
    b, c, h, w = images.shape
    hp, wp = h // patch, w // patch
    x = images.reshape(b, c, hp, patch, wp, patch)
    x = x.transpose(0, 2, 4, 1, 3, 5)                     # [B, Hp, Wp, C, p, p]
    return x.reshape(b, hp * wp, c * patch * patch)       # [B, P, Dpatch]


class CLIPRetrievalKernel:
    """JAX/Pallas analogue of CLIP's retrieval forward pass.

    TODO(synk): the pretrained CLIP vision/text transformers and the HF
    processor/tokenizer are not translatable; linear stand-in encoders
    (patch/token embedding -> mean pool -> projection) are used instead.
    (Real CLIP pools the CLS / EOT hidden state rather than mean-pooling.)
    """

    def __init__(self, key, *, vocab=64, patch=8, channels=3,
                 d_vision=128, d_text=128, d_proj=128):
        kv, kp, kt, kq = jax.random.split(key, 4)
        self.patch = patch
        d_patch = channels * patch * patch
        patch_embed = 0.02 * jax.random.normal(kv, (d_patch, d_vision), jnp.float32)
        visual_projection = 0.02 * jax.random.normal(kp, (d_vision, d_proj), jnp.float32)
        # Fold the linear stand-in trunk and the visual projection into one
        # [Dpatch, Dp] weight (valid only while the trunk is linear).
        self.w_vision = (patch_embed @ visual_projection).astype(jnp.bfloat16)
        self.token_embedding = (0.02 * jax.random.normal(kt, (vocab, d_text))).astype(jnp.bfloat16)
        self.text_projection = (0.02 * jax.random.normal(kq, (d_text, d_proj))).astype(jnp.bfloat16)
        self.num_labels = None
        self._labels_t = None     # [Dp, L_pad] bf16, normalized, pre-transposed
        self._l_tile = None

    def set_encoded_labels(self, label_token_ids):
        """encode_labels_clip(): text encode -> F.normalize(dim=-1)."""
        l, s = label_token_ids.shape
        l_pad = int(_round_up(l, LABEL_ALIGN))
        if l_pad <= LABEL_TILE_MAX:
            l_tile = l_pad                       # single grid step
        elif l_pad % LABEL_TILE_MAX == 0:
            l_tile = LABEL_TILE_MAX
        else:
            l_tile = LABEL_ALIGN
        # TODO(synk): tokenization happens outside; the token-embedding gather
        # stays in XLA (could move in-kernel via PrefetchScalarGridSpec).
        tok = jnp.take(self.token_embedding, label_token_ids.reshape(-1), axis=0)
        tok = tok.reshape(l, s, -1)
        tok = jnp.pad(tok, ((0, l_pad - l), (0, 0), (0, 0)))   # padded rows are exact zeros
        tok = jnp.transpose(tok, (1, 0, 2))                    # [S, L_pad, Dm]
        lab = encode_labels(tok, self.text_projection)         # [L_pad, Dp] bf16, normalized
        # One-time layout transpose so the hot-path matmul needs no per-tile
        # XLU transpose (contract on a plain [Dp, L] RHS).
        self._labels_t = jnp.transpose(lab)                    # [Dp, L_pad]
        self._l_tile = l_tile
        self.num_labels = l
        return lab[:l]

    def forward(self, images):
        """logits = F.normalize(vision_encoder(images).image_embeds) @ labels.T"""
        assert self._labels_t is not None, "call set_encoded_labels first"
        b = images.shape[0]
        patches = images_to_patches(images, self.patch).astype(jnp.bfloat16)  # [B, P, Dpatch]
        b_pad = int(_round_up(b, SUBLANE))
        patches = jnp.pad(patches, ((0, b_pad - b), (0, 0), (0, 0)))
        patches = jnp.transpose(patches, (1, 0, 2))                           # [P, B_pad, Dpatch]
        img = encode_image(patches, self.w_vision)                            # [B_pad, Dp] bf16
        logits = label_logits(img, self._labels_t, self._l_tile)              # [B_pad, L_pad] f32
        return logits[:b, :self.num_labels]

    # ---- pure-JAX reference (same dtype path, no Pallas) for verification ----
    def reference_forward(self, images, label_token_ids):
        f32 = jnp.float32
        patches = images_to_patches(images, self.patch).astype(jnp.bfloat16)   # [B, P, Dpatch]
        pooled = jnp.mean(patches.astype(f32), axis=1)                         # [B, Dpatch]
        emb = pooled.astype(jnp.bfloat16).astype(f32) @ self.w_vision.astype(f32)
        emb = emb * jax.lax.rsqrt(jnp.maximum(jnp.sum(emb * emb, -1, keepdims=True), EPS * EPS))
        img = emb.astype(jnp.bfloat16)

        l, s = label_token_ids.shape
        tok = jnp.take(self.token_embedding, label_token_ids.reshape(-1), axis=0).reshape(l, s, -1)
        pooled_t = jnp.mean(tok.astype(f32), axis=1)                           # [L, Dm]
        lemb = pooled_t.astype(jnp.bfloat16).astype(f32) @ self.text_projection.astype(f32)
        lemb = lemb * jax.lax.rsqrt(jnp.maximum(jnp.sum(lemb * lemb, -1, keepdims=True), EPS * EPS))
        lab = lemb.astype(jnp.bfloat16)
        return img.astype(f32) @ lab.astype(f32).T


if __name__ == "__main__":
    key = jax.random.PRNGKey(0)
    kparam, klabel, kimg = jax.random.split(key, 3)

    BATCH, CHANNELS, HEIGHT, WIDTH = 2, 3, 32, 32
    PATCH = 8                       # -> 16 patches of 3*8*8 = 192 values each
    VOCAB, SEQ = 64, 8
    NUM_LABELS = 1000               # pads to 1024 -> two 512-wide label tiles

    model = CLIPRetrievalKernel(kparam, vocab=VOCAB, patch=PATCH,
                                channels=CHANNELS, d_vision=128, d_text=128,
                                d_proj=128)

    label_token_ids = jax.random.randint(klabel, (NUM_LABELS, SEQ), 0, VOCAB)
    images = jax.random.normal(kimg, (BATCH, CHANNELS, HEIGHT, WIDTH), jnp.float32)

    model.set_encoded_labels(label_token_ids)
    logits = model.forward(images)
    logits = jax.block_until_ready(logits)

    # cosine-similarity logits: shape [B, L], |value| <= 1 (bf16 rounding slack)
    assert logits.shape == (BATCH, NUM_LABELS)
    assert bool(jnp.all(jnp.abs(logits) <= 1.0 + 5e-2))

    ref = model.reference_forward(images, label_token_ids)
    assert bool(jnp.allclose(logits, ref, atol=2e-2, rtol=0.0))

    print("KERNEL_OK")
</pallas_src>

<mosaic_0001>
module attributes {stable_mosaic.version = 11 : i64} {
  func.func @_encode_labels_kernel(%arg0: memref<8x1024x128xbf16, #tpu.memory_space<vmem>>, %arg1: memref<128x128xbf16, #tpu.memory_space<vmem>>, %arg2: memref<1024x128xbf16, #tpu.memory_space<vmem>>) attributes {dimension_semantics = [], scalar_prefetch = 0 : i64, scratch_operands = 0 : i64, tpu.core_type = #tpu.core_type<tc>} {
    %c0 = arith.constant 0 : index
    %c0_0 = arith.constant 0 : index
    %c0_1 = arith.constant 0 : index
    %0 = vector.load %arg0[%c0, %c0_0, %c0_1] : memref<8x1024x128xbf16, #tpu.memory_space<vmem>>, vector<1x1024x128xbf16>
    %1 = vector.shape_cast %0 : vector<1x1024x128xbf16> to vector<1024x128xbf16>
    %2 = arith.extf %1 : vector<1024x128xbf16> to vector<1024x128xf32>
    %c1 = arith.constant 1 : index
    %c0_2 = arith.constant 0 : index
    %c0_3 = arith.constant 0 : index
    %3 = vector.load %arg0[%c1, %c0_2, %c0_3] : memref<8x1024x128xbf16, #tpu.memory_space<vmem>>, vector<1x1024x128xbf16>
    %4 = vector.shape_cast %3 : vector<1x1024x128xbf16> to vector<1024x128xbf16>
    %5 = arith.extf %4 : vector<1024x128xbf16> to vector<1024x128xf32>
    %6 = arith.addf %2, %5 : vector<1024x128xf32>
    %c2 = arith.constant 2 : index
    %c0_4 = arith.constant 0 : index
    %c0_5 = arith.constant 0 : index
    %7 = vector.load %arg0[%c2, %c0_4, %c0_5] : memref<8x1024x128xbf16, #tpu.memory_space<vmem>>, vector<1x1024x128xbf16>
    %8 = vector.shape_cast %7 : vector<1x1024x128xbf16> to vector<1024x128xbf16>
    %9 = arith.extf %8 : vector<1024x128xbf16> to vector<1024x128xf32>
    %10 = arith.addf %6, %9 : vector<1024x128xf32>
    %c3 = arith.constant 3 : index
    %c0_6 = arith.constant 0 : index
    %c0_7 = arith.constant 0 : index
    %11 = vector.load %arg0[%c3, %c0_6, %c0_7] : memref<8x1024x128xbf16, #tpu.memory_space<vmem>>, vector<1x1024x128xbf16>
    %12 = vector.shape_cast %11 : vector<1x1024x128xbf16> to vector<1024x128xbf16>
    %13 = arith.extf %12 : vector<1024x128xbf16> to vector<1024x128xf32>
    %14 = arith.addf %10, %13 : vector<1024x128xf32>
    %c4 = arith.constant 4 : index
    %c0_8 = arith.constant 0 : index
    %c0_9 = arith.constant 0 : index
    %15 = vector.load %arg0[%c4, %c0_8, %c0_9] : memref<8x1024x128xbf16, #tpu.memory_space<vmem>>, vector<1x1024x128xbf16>
    %16 = vector.shape_cast %15 : vector<1x1024x128xbf16> to vector<1024x128xbf16>
    %17 = arith.extf %16 : vector<1024x128xbf16> to vector<1024x128xf32>
    %18 = arith.addf %14, %17 : vector<1024x128xf32>
    %c5 = arith.constant 5 : index
    %c0_10 = arith.constant 0 : index
    %c0_11 = arith.constant 0 : index
    %19 = vector.load %arg0[%c5, %c0_10, %c0_11] : memref<8x1024x128xbf16, #tpu.memory_space<vmem>>, vector<1x1024x128xbf16>
    %20 = vector.shape_cast %19 : vector<1x1024x128xbf16> to vector<1024x128xbf16>
    %21 = arith.extf %20 : vector<1024x128xbf16> to vector<1024x128xf32>
    %22 = arith.addf %18, %21 : vector<1024x128xf32>
    %c6 = arith.constant 6 : index
    %c0_12 = arith.constant 0 : index
    %c0_13 = arith.constant 0 : index
    %23 = vector.load %arg0[%c6, %c0_12, %c0_13] : memref<8x1024x128xbf16, #tpu.memory_space<vmem>>, vector<1x1024x128xbf16>
    %24 = vector.shape_cast %23 : vector<1x1024x128xbf16> to vector<1024x128xbf16>
    %25 = arith.extf %24 : vector<1024x128xbf16> to vector<1024x128xf32>
    %26 = arith.addf %22, %25 : vector<1024x128xf32>
    %c7 = arith.constant 7 : index
    %c0_14 = arith.constant 0 : index
    %c0_15 = arith.constant 0 : index
    %27 = vector.load %arg0[%c7, %c0_14, %c0_15] : memref<8x1024x128xbf16, #tpu.memory_space<vmem>>, vector<1x1024x128xbf16>
    %28 = vector.shape_cast %27 : vector<1x1024x128xbf16> to vector<1024x128xbf16>
    %29 = arith.extf %28 : vector<1024x128xbf16> to vector<1024x128xf32>
    %30 = arith.addf %26, %29 : vector<1024x128xf32>
    %cst = arith.constant 1.250000e-01 : f32
    %31 = vector.broadcast %cst : f32 to vector<1024x128xf32>
    %32 = arith.mulf %30, %31 : vector<1024x128xf32>
    %33 = arith.truncf %32 : vector<1024x128xf32> to vector<1024x128xbf16>
    %c0_16 = arith.constant 0 : index
    %c0_17 = arith.constant 0 : index
    %34 = vector.load %arg1[%c0_16, %c0_17] : memref<128x128xbf16, #tpu.memory_space<vmem>>, vector<128x128xbf16>
    %cst_18 = arith.constant dense<0.000000e+00> : vector<1024x128xf32>
    %35 = tpu.matmul %33, %34, %cst_18 {dimension_numbers = #tpu.dot_dimension_numbers<[1], [0], [0], [1], [0, 0, 1, 1], [], []>} : vector<1024x128xbf16>, vector<128x128xbf16>, vector<1024x128xf32> -> vector<1024x128xf32>
    %36 = arith.mulf %35, %35 : vector<1024x128xf32>
    %cst_19 = arith.constant dense<0.000000e+00> : vector<1024xf32>
    %37 = vector.multi_reduction <add>, %36, %cst_19 [1] : vector<1024x128xf32> to vector<1024xf32>
    %38 = vector.shape_cast %37 : vector<1024xf32> to vector<1024x1xf32>
    %cst_20 = arith.constant 1.000000e-24 : f32
    %39 = vector.broadcast %cst_20 : f32 to vector<1024x1xf32>
    %40 = arith.maximumf %38, %39 : vector<1024x1xf32>
    %41 = math.rsqrt %40 : vector<1024x1xf32>
    %42 = vector.broadcast %41 : vector<1024x1xf32> to vector<1024x128xf32>
    %43 = arith.mulf %35, %42 : vector<1024x128xf32>
    %44 = arith.truncf %43 : vector<1024x128xf32> to vector<1024x128xbf16>
    %c0_21 = arith.constant 0 : index
    %c0_22 = arith.constant 0 : index
    %45 = vector.load %arg2[%c0_21, %c0_22] : memref<1024x128xbf16, #tpu.memory_space<vmem>>, vector<1024x128xbf16>
    tpu.vector_store %arg2[%c0_21, %c0_22], %44 {strides = array<i32>} : memref<1024x128xbf16, #tpu.memory_space<vmem>>, vector<1024x128xbf16>,
    return
  }
}

</mosaic_0001>

<bundles_post_ra>
// kernel: tpu_custom_call.1
= control target key start
LH: loop header
LB: loop body
LE: loop exit
PB: predicated region body
PF: predicated region fallthrough
CT: control target
= control target key end

     0   :  { %7 = vsyncpa [#allocation3], 0  ;;  %s9695_s0 = inlined_call_operand.hbm [shape: bf16[8,1024,128], index: 0, kind: input, shape index: {}]   ;;  %s9696_s1 = inlined_call_operand.hbm [shape: bf16[128,128], index: 1, kind: input, shape index: {}]   ;;  %s9697_s2 = inlined_call_operand.hbm [shape: bf16[1024,128], index: 2, kind: output, shape index: {}]  }
   0x1   :  { %8 = vsyncpa [#allocation6], 0 }
   0x2   :  { %9 = vsyncpa [#allocation4], 0  ;;  %s8985_s9 = smov [#allocation2]  }
   0x3   :  { %s15_s10 = sshll.u32 %s8985_s9, 4  ;;  %s16_s10 = int_to_ptr.vmem [resolvable:$true] %s15_s10 }
   0x4   :  { %s8927_s11 = scalar_lea.vmem %s16_s10, 65536  ;;  %p8932_p1 = scmp.lt.s32.totalorder %s16_s10, %s16_s10 }
   0x5   :  { %p8928_p0 = scmp.ne.s32.totalorder %s16_s10, %s8927_s11  ;;  %p8933_p2 = scmp.lt.s32.totalorder %s8927_s11, %s8927_s11 }
   0x7   :  { %p8934_p3 = por %p8933_p2, %p8932_p1 }
   0x9   :  { %p8935_p4 = pnand %p8934_p3, %p8928_p0 }
   0xb   :  { %8938 = shalt.err (!%p8935_p4)
}
   0xc   :  { %s8986_s12 = smov 64   ;;  %s8987_s13 = smov 4  }
   0xd   :  { %21 = dma.hbm_to_vmem [thread:$0]  %s9695_s0, 65536, %s16_s10, [#allocation3], %s8986_s12, %s8986_s12, %s8987_s13  }
   0xe   :  { %s8988_s16 = smov [#allocation5]  }
   0xf   :  { %s27_s17 = sshll.u32 %s8988_s16, 4  ;;  %s28_s17 = int_to_ptr.vmem [resolvable:$true] %s27_s17 }
  0x10   :  { %s8947_s18 = scalar_lea.vmem %s28_s17, 1024  ;;  %p8952_p6 = scmp.lt.s32.totalorder %s28_s17, %s28_s17 }
  0x11   :  { %p8948_p5 = scmp.ne.s32.totalorder %s28_s17, %s8947_s18  ;;  %p8953_p7 = scmp.lt.s32.totalorder %s8947_s18, %s8947_s18 }
  0x13   :  { %p8954_p8 = por %p8953_p7, %p8952_p6 }
  0x15   :  { %p8955_p9 = pnand %p8954_p8, %p8948_p5 }
  0x17   :  { %8958 = shalt.err (!%p8955_p9)
}
  0x18   :  { %33 = dma.hbm_to_vmem [thread:$0]  %s9696_s1, 1024, %s28_s17, [#allocation6], %s8986_s12, %s8986_s12, %s8987_s13  }
  0x19   :  { %8979 = dma.done.wait [#allocation3], 65536  }
  0x1a   :  { %8980 = vsyncadd [#allocation3], 4294901760 }
  0x1b   :  { %8981 = dma.done.wait [#allocation6], 1024  }
  0x1c   :  { %8982 = vsyncadd [#allocation6], 4294966272  ;;  %v8655_v0 = vld [vmem:[#allocation5 + $0x38] sm:$0xff]   ;;  %v8656_v1 = vld [vmem:[#allocation5 + $0x30] sm:$0xff]   ;;  %s8989_s0 = smov [#allocation7]  }
  0x1d   :  { %8490 = vmatprep.subr.bf16.mxu0 %v8655_v0  ;;  %8634 = vmatprep.subr.bf16.mxu1 %v8655_v0  ;;  %v8657_v2 = vld [vmem:[#allocation5 + $0x28] sm:$0xff]   ;;  %v8658_v3 = vld [vmem:[#allocation5 + $0x20] sm:$0xff]   ;;  %v8659_v26 = vld [vmem:[#allocation5 + $0x18] sm:$0xff]   ;;  %s5206_s1 = sshll.u32 %s8989_s0, 4  ;;  %s5207_s1 = int_to_ptr.vmem [resolvable:$true] %s5206_s1 }
  0x1e   :  { %8491 = vmatpush3.bf16.msra.mxu0 %v8655_v0  ;;  %8642 = vmatpush3.bf16.msra.mxu1 %v8655_v0  ;;  %v5484_v4 = vld [vmem:[#allocation2] sm:$0xff]   ;;  %v8660_v47 = vld [vmem:[#allocation5 + $0x10] sm:$0xff]   ;;  %v7851_v62 = vld [vmem:[#allocation2 + $0x8] sm:$0xff]   ;;  %s8959_s21 = scalar_lea.vmem %s5207_s1, 8192  ;;  %p8964_p11 = scmp.lt.s32.totalorder %s5207_s1, %s5207_s1 }
  0x1f   :  { %8492 = vmatprep.subr.bf16.mxu0 %v8656_v1  ;;  %8635 = vmatprep.subr.bf16.mxu1 %v8656_v1  ;;  %v5740_v5 = vld [vmem:[#allocation2 + $0x200] sm:$0xff]   ;;  %v5485_v7 = vunpack.c.l.bf16 %v5484_v4  ;;  %v5486_v8 = vunpack.c.h.bf16 %v5484_v4  ;;  %v8661_v4 = vld [vmem:[#allocation5 + $0x8] sm:$0xff]   ;;  %p8960_p10 = scmp.ne.s32.totalorder %s5207_s1, %s8959_s21  ;;  %p8965_p12 = scmp.lt.s32.totalorder %s8959_s21, %s8959_s21 }
  0x20   :  { %v5996_v6 = vld [vmem:[#allocation2 + $0x400] sm:$0xff]   ;;  %v5741_v9 = vunpack.c.l.bf16 %v5740_v5  ;;  %v5742_v10 = vunpack.c.h.bf16 %v5740_v5 }
  0x21   :  { %v6252_v11 = vld [vmem:[#allocation2 + $0x600] sm:$0xff]   ;;  %v5997_v14 = vunpack.c.l.bf16 %v5996_v6  ;;  %v5998_v15 = vunpack.c.h.bf16 %v5996_v6  ;;  %p8966_p13 = por %p8965_p12, %p8964_p11 }
  0x22   :  { %8493 = vmatpush3.bf16.msra.mxu0 %v8656_v1  ;;  %8643 = vmatpush3.bf16.msra.mxu1 %v8656_v1  ;;  %v6508_v12 = vld [vmem:[#allocation2 + $0x800] sm:$0xff]   ;;  %v6253_v16 = vunpack.c.l.bf16 %v6252_v11  ;;  %v6254_v17 = vunpack.c.h.bf16 %v6252_v11  ;;  %v554_v20 = vadd.f32 %v5741_v9, %v5485_v7  ;;  %v555_v21 = vadd.f32 %v5742_v10, %v5486_v8  ;;  %v7977_v9 = vld [vmem:[#allocation2 + $0x408] sm:$0xff]  }
  0x23   :  { %8494 = vmatprep.subr.bf16.mxu0 %v8657_v2  ;;  %8636 = vmatprep.subr.bf16.mxu1 %v8657_v2  ;;  %v6764_v13 = vld [vmem:[#allocation2 + $0xa00] sm:$0xff]   ;;  %v6509_v22 = vunpack.c.l.bf16 %v6508_v12  ;;  %v6510_v23 = vunpack.c.h.bf16 %v6508_v12  ;;  %v5489_v12 = vunpack.c.l.bf16 %v7851_v62  ;;  %p8967_p0 = pnand %p8966_p13, %p8960_p10 }
  0x24   :  { %v9017_v18 = vld [vmem:[#allocation2 + $0xc00] sm:$0xff]   ;;  %v6765_v27 = vunpack.c.l.bf16 %v6764_v13  ;;  %v6766_v28 = vunpack.c.h.bf16 %v6764_v13  ;;  %v939_v32 = vadd.f32 %v5997_v14, %v554_v20  ;;  %v940_v33 = vadd.f32 %v5998_v15, %v555_v21  ;;  %v8040_v14 = vld [vmem:[#allocation2 + $0x608] sm:$0xff]  }
  0x25   :  { %v9019_v19 = vld [vmem:[#allocation2 + $0xe00] sm:$0xff]   ;;  %v7021_v29 = vunpack.c.l.bf16 %v9017_v18  ;;  %v7022_v30 = vunpack.c.h.bf16 %v9017_v18  ;;  %v5490_v13 = vunpack.c.h.bf16 %v7851_v62  ;;  %v6001_v21 = vunpack.c.l.bf16 %v7977_v9 }
  0x26   :  { %8495 = vmatpush3.bf16.msra.mxu0 %v8657_v2  ;;  %8644 = vmatpush3.bf16.msra.mxu1 %v8657_v2  ;;  %v7882_v24 = vld [vmem:[#allocation2 + $0x100] sm:$0xff]   ;;  %v7277_v34 = vunpack.c.l.bf16 %v9019_v19  ;;  %v7278_v35 = vunpack.c.h.bf16 %v9019_v19  ;;  %v1324_v42 = vadd.f32 %v6253_v16, %v939_v32  ;;  %v1325_v43 = vadd.f32 %v6254_v17, %v940_v33 }
  0x27   :  { %v7945_v25 = vld [vmem:[#allocation2 + $0x300] sm:$0xff]   ;;  %8496 = vmatprep.subr.bf16.mxu0 %v8658_v3  ;;  %8637 = vmatprep.subr.bf16.mxu1 %v8658_v3  ;;  %v5613_v37 = vunpack.c.l.bf16 %v7882_v24  ;;  %v5614_v38 = vunpack.c.h.bf16 %v7882_v24  ;;  %v6258_v33 = vunpack.c.h.bf16 %v8040_v14 }
  0x28   :  { %v8008_v31 = vld [vmem:[#allocation2 + $0x500] sm:$0xff]   ;;  %v5869_v39 = vunpack.c.l.bf16 %v7945_v25  ;;  %v5870_v40 = vunpack.c.h.bf16 %v7945_v25  ;;  %v1709_v53 = vadd.f32 %v6509_v22, %v1324_v42  ;;  %v1710_v54 = vadd.f32 %v6510_v23, %v1325_v43  ;;  %v8103_v23 = vld [vmem:[#allocation2 + $0x808] sm:$0xff]  }
  0x29   :  { %v8071_v36 = vld [vmem:[#allocation2 + $0x700] sm:$0xff]   ;;  %v6125_v44 = vunpack.c.l.bf16 %v8008_v31  ;;  %v6126_v45 = vunpack.c.h.bf16 %v8008_v31  ;;  %v6002_v22 = vunpack.c.h.bf16 %v7977_v9  ;;  %v6514_v42 = vunpack.c.h.bf16 %v8103_v23 }
  0x2a   :  { %v8134_v41 = vld [vmem:[#allocation2 + $0x900] sm:$0xff]   ;;  %8497 = vmatpush3.bf16.msra.mxu0 %v8658_v3  ;;  %8645 = vmatpush3.bf16.msra.mxu1 %v8658_v3  ;;  %v618_v48 = vadd.f32 %v5869_v39, %v5613_v37  ;;  %v619_v49 = vadd.f32 %v5870_v40, %v5614_v38  ;;  %v6381_v50 = vunpack.c.l.bf16 %v8071_v36  ;;  %v6382_v51 = vunpack.c.h.bf16 %v8071_v36  ;;  %v7914_v3 = vld [vmem:[#allocation2 + $0x208] sm:$0xff]  }
  0x2b   :  { %v8197_v46 = vld [vmem:[#allocation2 + $0xb00] sm:$0xff]   ;;  %8498 = vmatprep.subr.bf16.mxu0 %v8659_v26  ;;  %8638 = vmatprep.subr.bf16.mxu1 %v8659_v26  ;;  %v6637_v55 = vunpack.c.l.bf16 %v8134_v41  ;;  %v6638_v56 = vunpack.c.h.bf16 %v8134_v41  ;;  %v2094_v63 = vadd.f32 %v6765_v27, %v1709_v53  ;;  %v2095_v0 = vadd.f32 %v6766_v28, %v1710_v54  ;;  %v8292_v39 = vld [vmem:[#allocation2 + $0xe08] sm:$0xff]  }
  0x2c   :  { %v8260_v52 = vld [vmem:[#allocation2 + $0xd00] sm:$0xff]   ;;  %v1003_v58 = vadd.f32 %v6125_v44, %v618_v48  ;;  %v1004_v59 = vadd.f32 %v6126_v45, %v619_v49  ;;  %v6893_v60 = vunpack.c.l.bf16 %v8197_v46  ;;  %v6894_v61 = vunpack.c.h.bf16 %v8197_v46  ;;  %v7883_v48 = vld [vmem:[#allocation2 + $0x108] sm:$0xff]  }
  0x2d   :  { %v9025_v57 = vld [vmem:[#allocation2 + $0xf00] sm:$0xff]   ;;  %v7149_v1 = vunpack.c.l.bf16 %v8260_v52  ;;  %v7150_v2 = vunpack.c.h.bf16 %v8260_v52  ;;  %v2479_v10 = vadd.f32 %v7021_v29, %v2094_v63  ;;  %v2480_v11 = vadd.f32 %v7022_v30, %v2095_v0  ;;  %v8166_v29 = vld [vmem:[#allocation2 + $0xa08] sm:$0xff]  }
  0x2e   :  { %8499 = vmatpush3.bf16.msra.mxu0 %v8659_v26  ;;  %8646 = vmatpush3.bf16.msra.mxu1 %v8659_v26  ;;  %v1388_v5 = vadd.f32 %v6381_v50, %v1003_v58  ;;  %v1389_v6 = vadd.f32 %v6382_v51, %v1004_v59  ;;  %v7405_v7 = vunpack.c.l.bf16 %v9025_v57  ;;  %v7406_v8 = vunpack.c.h.bf16 %v9025_v57  ;;  %v8662_v24 = vld [vmem:[#allocation5] sm:$0xff]   ;;  %v7946_v49 = vld [vmem:[#allocation2 + $0x308] sm:$0xff]  }
  0x2f   :  { %8500 = vmatprep.subr.bf16.mxu0 %v8660_v47  ;;  %8639 = vmatprep.subr.bf16.mxu1 %v8660_v47  ;;  %v5745_v17 = vunpack.c.l.bf16 %v7914_v3  ;;  %v5746_v18 = vunpack.c.h.bf16 %v7914_v3  ;;  %v2864_v19 = vadd.f32 %v7277_v34, %v2479_v10  ;;  %v2865_v20 = vadd.f32 %v7278_v35, %v2480_v11  ;;  %v8229_v35 = vld [vmem:[#allocation2 + $0xc08] sm:$0xff]  }
  0x30   :  { %v1773_v15 = vadd.f32 %v6637_v55, %v1388_v5  ;;  %v1774_v16 = vadd.f32 %v6638_v56, %v1389_v6  ;;  %v6257_v28 = vunpack.c.l.bf16 %v8040_v14  ;;  %v6513_v34 = vunpack.c.l.bf16 %v8103_v23  ;;  %v8009_v54 = vld [vmem:[#allocation2 + $0x508] sm:$0xff]  }
  0x31   :  { %v556_v27 = vadd.f32 %v5745_v17, %v5489_v12  ;;  %v2992_v30 = vmul.f32 0.125, %v2864_v19  ;;  %v2993_v31 = vmul.f32 0.125, %v2865_v20  ;;  %v557_v32 = vadd.f32 %v5746_v18, %v5490_v13  ;;  %v8072_v59 = vld [vmem:[#allocation2 + $0x708] sm:$0xff]   ;;  %v7852_v20 = vld [vmem:[#allocation2 + $0x10] sm:$0xff]  }
  0x32   :  { %8501 = vmatpush3.bf16.msra.mxu0 %v8660_v47  ;;  %8647 = vmatpush3.bf16.msra.mxu1 %v8660_v47  ;;  %v2158_v25 = vadd.f32 %v6893_v60, %v1773_v15  ;;  %v2159_v26 = vadd.f32 %v6894_v61, %v1774_v16  ;;  %v6769_v43 = vunpack.c.l.bf16 %v8166_v29  ;;  %v6770_v47 = vunpack.c.h.bf16 %v8166_v29  ;;  %v8135_v0 = vld [vmem:[#allocation2 + $0x908] sm:$0xff]  }
  0x33   :  { %8502 = vmatprep.subr.bf16.mxu0 %v8661_v4  ;;  %8640 = vmatprep.subr.bf16.mxu1 %v8661_v4  ;;  %v941_v38 = vadd.f32 %v6001_v21, %v556_v27  ;;  %v3120_v40 = vpack.c.bf16 %v2993_v31, %v2992_v30  ;;  %v942_v41 = vadd.f32 %v6002_v22, %v557_v32  ;;  %v7025_v51 = vunpack.c.l.bf16 %v8229_v35  ;;  %v8198_v5 = vld [vmem:[#allocation2 + $0xb08] sm:$0xff]   ;;  %v7978_v30 = vld [vmem:[#allocation2 + $0x410] sm:$0xff]  }
  0x34   :  { %v2543_v36 = vadd.f32 %v7149_v1, %v2158_v25  ;;  %v2544_v37 = vadd.f32 %v7150_v2, %v2159_v26  ;;  %v7026_v52 = vunpack.c.h.bf16 %v8229_v35  ;;  %v7281_v53 = vunpack.c.l.bf16 %v8292_v39  ;;  %v8261_v10 = vld [vmem:[#allocation2 + $0xd08] sm:$0xff]   ;;  %v7915_v25 = vld [vmem:[#allocation2 + $0x210] sm:$0xff]  }
  0x35   :  { %v1326_v46 = vadd.f32 %v6257_v28, %v941_v38  ;;  %8506 = vmatprep.mubr.bf16.mxu0 %v3120_v40  ;;  %v1327_v50 = vadd.f32 %v6258_v33, %v942_v41  ;;  %v7282_v58 = vunpack.c.h.bf16 %v8292_v39  ;;  %v5617_v61 = vunpack.c.l.bf16 %v7883_v48  ;;  %v8324_v15 = vld [vmem:[#allocation2 + $0xf08] sm:$0xff]   ;;  %v8104_v40 = vld [vmem:[#allocation2 + $0x810] sm:$0xff]  }
  0x36   :  { %8503 = vmatpush3.bf16.msra.mxu0 %v8661_v4  ;;  %8648 = vmatpush3.bf16.msra.mxu1 %v8661_v4  ;;  %v2928_v44 = vadd.f32 %v7405_v7, %v2543_v36  ;;  %v2929_v45 = vadd.f32 %v7406_v8, %v2544_v37  ;;  %v5618_v62 = vunpack.c.h.bf16 %v7883_v48  ;;  %v5873_v63 = vunpack.c.l.bf16 %v7946_v49  ;;  %v8041_v37 = vld [vmem:[#allocation2 + $0x610] sm:$0xff]  }
  0x37   :  { %8504 = vmatprep.subr.bf16.mxu0 %v8662_v24  ;;  %8641 = vmatprep.subr.bf16.mxu1 %v8662_v24  ;;  %v1711_v57 = vadd.f32 %v6513_v34, %v1326_v46  ;;  %v1712_v60 = vadd.f32 %v6514_v42, %v1327_v50  ;;  %v5874_v3 = vunpack.c.h.bf16 %v7946_v49  ;;  %v6129_v4 = vunpack.c.l.bf16 %v8009_v54  ;;  %v8230_v50 = vld [vmem:[#allocation2 + $0xc10] sm:$0xff]  }
  0x38   :  { %v3056_v55 = vmul.f32 0.125, %v2928_v44  ;;  %v3057_v56 = vmul.f32 0.125, %v2929_v45  ;;  %v620_v7 = vadd.f32 %v5873_v63, %v5617_v61  ;;  %v6130_v8 = vunpack.c.h.bf16 %v8009_v54  ;;  %v8167_v45 = vld [vmem:[#allocation2 + $0xa10] sm:$0xff]  }
  0x39   :  { %v2096_v2 = vadd.f32 %v6769_v43, %v1711_v57  ;;  %v2097_v6 = vadd.f32 %v6770_v47, %v1712_v60  ;;  %v6385_v9 = vunpack.c.l.bf16 %v8072_v59  ;;  %v621_v12 = vadd.f32 %v5874_v3, %v5618_v62  ;;  %v7853_v60 = vld [vmem:[#allocation2 + $0x18] sm:$0xff]  }
  0x3a   :  { %8505 = vmatpush3.bf16.msra.mxu0 %v8662_v24  ;;  %8649 = vmatpush3.bf16.msra.mxu1 %v8662_v24  ;;  %v3152_v1 = vpack.c.bf16 %v3057_v56, %v3056_v55  ;;  %v6386_v13 = vunpack.c.h.bf16 %v8072_v59  ;;  %v6641_v14 = vunpack.c.l.bf16 %v8135_v0  ;;  %v1005_v17 = vadd.f32 %v6129_v4, %v620_v7  ;;  %v8293_v55 = vld [vmem:[#allocation2 + $0xe10] sm:$0xff]  }
  0x3b   :  { %v2481_v11 = vadd.f32 %v7025_v51, %v2096_v2  ;;  %v2482_v16 = vadd.f32 %v7026_v52, %v2097_v6  ;;  %v6642_v18 = vunpack.c.h.bf16 %v8135_v0  ;;  %v6897_v19 = vunpack.c.l.bf16 %v8198_v5  ;;  %v7979_v6 = vld [vmem:[#allocation2 + $0x418] sm:$0xff]  }
  0x3c   :  { %8570 = vmatprep.mubr.bf16.mxu1 %v3152_v1  ;;  %v1006_v22 = vadd.f32 %v6130_v8, %v621_v12  ;;  %v6898_v23 = vunpack.c.h.bf16 %v8198_v5  ;;  %v7153_v24 = vunpack.c.l.bf16 %v8261_v10  ;;  %v1390_v27 = vadd.f32 %v6385_v9, %v1005_v17  ;;  %v7916_v1 = vld [vmem:[#allocation2 + $0x218] sm:$0xff]  }
  0x3d   :  { %v2866_v21 = vadd.f32 %v7281_v53, %v2481_v11  ;;  %v2867_v26 = vadd.f32 %v7282_v58, %v2482_v16  ;;  %v7154_v28 = vunpack.c.h.bf16 %v8261_v10  ;;  %v7409_v29 = vunpack.c.l.bf16 %v8324_v15  ;;  %v8042_v11 = vld [vmem:[#allocation2 + $0x618] sm:$0xff]  }
  0x3e   :  { %v1391_v32 = vadd.f32 %v6386_v13, %v1006_v22  ;;  %v7410_v33 = vunpack.c.h.bf16 %v8324_v15  ;;  %v5493_v36 = vunpack.c.l.bf16 %v7852_v20  ;;  %v1775_v34 = vadd.f32 %v6641_v14, %v1390_v27 }
  0x3f   :  { %v2994_v31 = vmul.f32 0.125, %v2866_v21  ;;  %v2995_v38 = vmul.f32 0.125, %v2867_v26  ;;  %v5494_v35 = vunpack.c.h.bf16 %v7852_v20  ;;  %v5749_v39 = vunpack.c.l.bf16 %v7915_v25  ;;  %v8105_v20 = vld [vmem:[#allocation2 + $0x818] sm:$0xff]  }
  0x40   :  { %v1776_v41 = vadd.f32 %v6642_v18, %v1391_v32  ;;  %v5750_v42 = vunpack.c.h.bf16 %v7915_v25  ;;  %v6005_v43 = vunpack.c.l.bf16 %v7978_v30  ;;  %v6006_v44 = vunpack.c.h.bf16 %v7978_v30  ;;  %v8168_v25 = vld [vmem:[#allocation2 + $0xa18] sm:$0xff]  }
  0x41   :  { %v3121_v46 = vpack.c.bf16 %v2995_v38, %v2994_v31  ;;  %v2160_v47 = vadd.f32 %v6897_v19, %v1775_v34  ;;  %v558_v48 = vadd.f32 %v5749_v39, %v5493_v36  ;;  %v6261_v49 = vunpack.c.l.bf16 %v8041_v37  ;;  %v8231_v30 = vld [vmem:[#allocation2 + $0xc18] sm:$0xff]  }
  0x42   :  { %v2161_v51 = vadd.f32 %v6898_v23, %v1776_v41  ;;  %v559_v52 = vadd.f32 %v5750_v42, %v5494_v35  ;;  %v6262_v53 = vunpack.c.h.bf16 %v8041_v37  ;;  %v6517_v54 = vunpack.c.l.bf16 %v8104_v40  ;;  %v8294_v37 = vld [vmem:[#allocation2 + $0xe18] sm:$0xff]  }
  0x43   :  { %8507 = vmatmul.mubr.bf16.vlgmr.msra.gmra.mxu0 %v3121_v46  ;;  %v2545_v56 = vadd.f32 %v7153_v24, %v2160_v47  ;;  %v943_v57 = vadd.f32 %v6005_v43, %v558_v48  ;;  %v6518_v58 = vunpack.c.h.bf16 %v8104_v40  ;;  %v6773_v59 = vunpack.c.l.bf16 %v8167_v45  ;;  %v7884_v40 = vld [vmem:[#allocation2 + $0x110] sm:$0xff]  }
  0x44   :  { %v2546_v61 = vadd.f32 %v7154_v28, %v2161_v51  ;;  %v944_v62 = vadd.f32 %v6006_v44, %v559_v52  ;;  %v6774_v63 = vunpack.c.h.bf16 %v8167_v45  ;;  %v7029_v0 = vunpack.c.l.bf16 %v8230_v50  ;;  %v7947_v45 = vld [vmem:[#allocation2 + $0x310] sm:$0xff]  }
  0x45   :  { %v2930_v2 = vadd.f32 %v7409_v29, %v2545_v56  ;;  %v1328_v3 = vadd.f32 %v6261_v49, %v943_v57  ;;  %v7030_v4 = vunpack.c.h.bf16 %v8230_v50  ;;  %v7285_v5 = vunpack.c.l.bf16 %v8293_v55  ;;  %v8010_v50 = vld [vmem:[#allocation2 + $0x510] sm:$0xff]  }
  0x46   :  { %v2931_v7 = vadd.f32 %v7410_v33, %v2546_v61  ;;  %v1329_v8 = vadd.f32 %v6262_v53, %v944_v62  ;;  %v7286_v9 = vunpack.c.h.bf16 %v8293_v55  ;;  %v5497_v10 = vunpack.c.l.bf16 %v7853_v60  ;;  %v8073_v51 = vld [vmem:[#allocation2 + $0x710] sm:$0xff]  }
  0x47   :  { %v3058_v12 = vmul.f32 0.125, %v2930_v2  ;;  %v1713_v13 = vadd.f32 %v6517_v54, %v1328_v3  ;;  %v5498_v14 = vunpack.c.h.bf16 %v7853_v60  ;;  %v5753_v15 = vunpack.c.l.bf16 %v7916_v1  ;;  %v8136_v60 = vld [vmem:[#allocation2 + $0x910] sm:$0xff]  }
  0x48   :  { %v3059_v16 = vmul.f32 0.125, %v2931_v7  ;;  %v1714_v17 = vadd.f32 %v6518_v58, %v1329_v8  ;;  %v5754_v18 = vunpack.c.h.bf16 %v7916_v1  ;;  %v6009_v19 = vunpack.c.l.bf16 %v7979_v6  ;;  %v8199_v1 = vld [vmem:[#allocation2 + $0xb10] sm:$0xff]  }
  0x49   :  { %v2098_v21 = vadd.f32 %v6773_v59, %v1713_v13  ;;  %v560_v22 = vadd.f32 %v5753_v15, %v5497_v10  ;;  %v6010_v23 = vunpack.c.h.bf16 %v7979_v6  ;;  %v6265_v24 = vunpack.c.l.bf16 %v8042_v11  ;;  %v8262_v6 = vld [vmem:[#allocation2 + $0xd10] sm:$0xff]  }
  0x4a   :  { %v3153_v26 = vpack.c.bf16 %v3059_v16, %v3058_v12  ;;  %v2099_v27 = vadd.f32 %v6774_v63, %v1714_v17  ;;  %v561_v28 = vadd.f32 %v5754_v18, %v5498_v14  ;;  %v6266_v29 = vunpack.c.h.bf16 %v8042_v11  ;;  %v8325_v11 = vld [vmem:[#allocation2 + $0xf10] sm:$0xff]   ;;  %v7885_v16 = vld [vmem:[#allocation2 + $0x118] sm:$0xff]  }
  0x4b   :  { %v2483_v31 = vadd.f32 %v7029_v0, %v2098_v21  ;;  %v945_v32 = vadd.f32 %v6009_v19, %v560_v22  ;;  %v6521_v33 = vunpack.c.l.bf16 %v8105_v20  ;;  %v6522_v36 = vunpack.c.h.bf16 %v8105_v20  ;;  %v7948_v21 = vld [vmem:[#allocation2 + $0x318] sm:$0xff]  }
  0x4c   :  { %8571 = vmatmul.mubr.bf16.vlgmr.msra.gmra.mxu1 %v3153_v26  ;;  %v2484_v38 = vadd.f32 %v7030_v4, %v2099_v27  ;;  %v946_v34 = vadd.f32 %v6010_v23, %v561_v28  ;;  %v6777_v35 = vunpack.c.l.bf16 %v8168_v25  ;;  %v6778_v39 = vunpack.c.h.bf16 %v8168_v25  ;;  %v8011_v26 = vld [vmem:[#allocation2 + $0x518] sm:$0xff]  }
  0x4d   :  { %v2868_v41 = vadd.f32 %v7285_v5, %v2483_v31  ;;  %v1330_v42 = vadd.f32 %v6265_v24, %v945_v32  ;;  %v7033_v43 = vunpack.c.l.bf16 %v8231_v30  ;;  %v7034_v44 = vunpack.c.h.bf16 %v8231_v30  ;;  %v8074_v27 = vld [vmem:[#allocation2 + $0x718] sm:$0xff]  }
  0x4e   :  { %v2869_v46 = vadd.f32 %v7286_v9, %v2484_v38  ;;  %v1331_v47 = vadd.f32 %v6266_v29, %v946_v34  ;;  %v7289_v48 = vunpack.c.l.bf16 %v8294_v37  ;;  %v7290_v49 = vunpack.c.h.bf16 %v8294_v37  ;;  %v8137_v38 = vld [vmem:[#allocation2 + $0x918] sm:$0xff]  }
  0x4f   :  { %v2996_v52 = vmul.f32 0.125, %v2868_v41  ;;  %v1715_v53 = vadd.f32 %v6521_v33, %v1330_v42  ;;  %v5621_v54 = vunpack.c.l.bf16 %v7884_v40  ;;  %v5622_v55 = vunpack.c.h.bf16 %v7884_v40  ;;  %v8200_v41 = vld [vmem:[#allocation2 + $0xb18] sm:$0xff]  }
  0x50   :  { %v2997_v56 = vmul.f32 0.125, %v2869_v46  ;;  %v1716_v57 = vadd.f32 %v6522_v36, %v1331_v47  ;;  %v5877_v58 = vunpack.c.l.bf16 %v7947_v45  ;;  %v5878_v59 = vunpack.c.h.bf16 %v7947_v45  ;;  %v8263_v46 = vld [vmem:[#allocation2 + $0xd18] sm:$0xff]  }
  0x51   :  { %v2100_v61 = vadd.f32 %v6777_v35, %v1715_v53  ;;  %v6133_v62 = vunpack.c.l.bf16 %v8010_v50  ;;  %v6134_v63 = vunpack.c.h.bf16 %v8010_v50  ;;  %v6389_v0 = vunpack.c.l.bf16 %v8073_v51 }
  0x52   :  { %v3122_v2 = vpack.c.bf16 %v2997_v56, %v2996_v52  ;;  %v2101_v3 = vadd.f32 %v6778_v39, %v1716_v57  ;;  %v622_v4 = vadd.f32 %v5877_v58, %v5621_v54  ;;  %v623_v5 = vadd.f32 %v5878_v59, %v5622_v55  ;;  %v7854_v56 = vld [vmem:[#allocation2 + $0x20] sm:$0xff]  }
  0x53   :  { %v2485_v7 = vadd.f32 %v7033_v43, %v2100_v61  ;;  %v6390_v8 = vunpack.c.h.bf16 %v8073_v51  ;;  %v6645_v9 = vunpack.c.l.bf16 %v8136_v60  ;;  %v6646_v10 = vunpack.c.h.bf16 %v8136_v60  ;;  %v8326_v51 = vld [vmem:[#allocation2 + $0xf18] sm:$0xff]   ;;  %v7917_v61 = vld [vmem:[#allocation2 + $0x220] sm:$0xff]  }
  0x54   :  { %8510 = vmatprep.mubr.bf16.mxu0 %v3122_v2  ;;  %v2486_v12 = vadd.f32 %v7034_v44, %v2101_v3  ;;  %v1007_v13 = vadd.f32 %v6133_v62, %v622_v4  ;;  %v1008_v14 = vadd.f32 %v6134_v63, %v623_v5  ;;  %v6901_v15 = vunpack.c.l.bf16 %v8199_v1  ;;  %v7980_v2 = vld [vmem:[#allocation2 + $0x420] sm:$0xff]  }
  0x55   :  { %v2870_v17 = vadd.f32 %v7289_v48, %v2485_v7  ;;  %v6902_v18 = vunpack.c.h.bf16 %v8199_v1  ;;  %v7157_v19 = vunpack.c.l.bf16 %v8262_v6  ;;  %v7158_v20 = vunpack.c.h.bf16 %v8262_v6  ;;  %v8043_v7 = vld [vmem:[#allocation2 + $0x620] sm:$0xff]  }
  0x56   :  { %v2871_v22 = vadd.f32 %v7290_v49, %v2486_v12  ;;  %v1392_v23 = vadd.f32 %v6389_v0, %v1007_v13  ;;  %v1393_v24 = vadd.f32 %v6390_v8, %v1008_v14  ;;  %v7413_v25 = vunpack.c.l.bf16 %v8325_v11  ;;  %v8106_v12 = vld [vmem:[#allocation2 + $0x820] sm:$0xff]  }
  0x57   :  { %v2998_v28 = vmul.f32 0.125, %v2870_v17  ;;  %v7414_v29 = vunpack.c.h.bf16 %v8325_v11  ;;  %v5625_v30 = vunpack.c.l.bf16 %v7885_v16  ;;  %v5626_v31 = vunpack.c.h.bf16 %v7885_v16  ;;  %v8169_v17 = vld [vmem:[#allocation2 + $0xa20] sm:$0xff]  }
  0x58   :  { %v2999_v32 = vmul.f32 0.125, %v2871_v22  ;;  %v1777_v33 = vadd.f32 %v6645_v9, %v1392_v23  ;;  %v1778_v36 = vadd.f32 %v6646_v10, %v1393_v24  ;;  %v5881_v37 = vunpack.c.l.bf16 %v7948_v21  ;;  %v8232_v22 = vld [vmem:[#allocation2 + $0xc20] sm:$0xff]  }
  0x59   :  { %v5882_v34 = vunpack.c.h.bf16 %v7948_v21  ;;  %v6137_v35 = vunpack.c.l.bf16 %v8011_v26  ;;  %v6138_v39 = vunpack.c.h.bf16 %v8011_v26  ;;  %v6393_v40 = vunpack.c.l.bf16 %v8074_v27 }
  0x5a   :  { %v3123_v42 = vpack.c.bf16 %v2999_v32, %v2998_v28  ;;  %v2162_v43 = vadd.f32 %v6901_v15, %v1777_v33  ;;  %v2163_v44 = vadd.f32 %v6902_v18, %v1778_v36  ;;  %v624_v45 = vadd.f32 %v5881_v37, %v5625_v30  ;;  %v7855_v32 = vld [vmem:[#allocation2 + $0x28] sm:$0xff]  }
  0x5b   :  { %v625_v47 = vadd.f32 %v5882_v34, %v5626_v31  ;;  %v6394_v48 = vunpack.c.h.bf16 %v8074_v27  ;;  %v6649_v49 = vunpack.c.l.bf16 %v8137_v38  ;;  %v6650_v50 = vunpack.c.h.bf16 %v8137_v38  ;;  %v8295_v27 = vld [vmem:[#allocation2 + $0xe20] sm:$0xff]   ;;  %v7918_v34 = vld [vmem:[#allocation2 + $0x228] sm:$0xff]  }
  0x5c   :  { %8511 = vmatmul.mubr.bf16.gmra.mxu0 %v3123_v42  ;;  %v2547_v52 = vadd.f32 %v7157_v19, %v2162_v43  ;;  %v2548_v53 = vadd.f32 %v7158_v20, %v2163_v44  ;;  %v1009_v54 = vadd.f32 %v6137_v35, %v624_v45  ;;  %v6905_v55 = vunpack.c.l.bf16 %v8200_v41  ;;  %v7981_v42 = vld [vmem:[#allocation2 + $0x428] sm:$0xff]  }
  0x5d   :  { %v1010_v57 = vadd.f32 %v6138_v39, %v625_v47  ;;  %v6906_v58 = vunpack.c.h.bf16 %v8200_v41  ;;  %v7161_v59 = vunpack.c.l.bf16 %v8263_v46  ;;  %v7162_v60 = vunpack.c.h.bf16 %v8263_v46  ;;  %v8044_v47 = vld [vmem:[#allocation2 + $0x628] sm:$0xff]  }
  0x5e   :  { %v2932_v62 = vadd.f32 %v7413_v25, %v2547_v52  ;;  %v2933_v63 = vadd.f32 %v7414_v29, %v2548_v53  ;;  %v1394_v0 = vadd.f32 %v6393_v40, %v1009_v54  ;;  %v7417_v1 = vunpack.c.l.bf16 %v8326_v51 }
  0x5f   :  { %v1395_v3 = vadd.f32 %v6394_v48, %v1010_v57  ;;  %v7418_v4 = vunpack.c.h.bf16 %v8326_v51  ;;  %v5501_v5 = vunpack.c.l.bf16 %v7854_v56  ;;  %v5502_v6 = vunpack.c.h.bf16 %v7854_v56  ;;  %v8107_v56 = vld [vmem:[#allocation2 + $0x828] sm:$0xff]  }
  0x60   :  { %v3060_v8 = vmul.f32 0.125, %v2932_v62  ;;  %v3061_v9 = vmul.f32 0.125, %v2933_v63  ;;  %v1779_v10 = vadd.f32 %v6649_v49, %v1394_v0  ;;  %v5757_v11 = vunpack.c.l.bf16 %v7917_v61 }
  0x61   :  { %v1780_v13 = vadd.f32 %v6650_v50, %v1395_v3  ;;  %v5758_v14 = vunpack.c.h.bf16 %v7917_v61  ;;  %v6013_v15 = vunpack.c.l.bf16 %v7980_v2  ;;  %v6014_v16 = vunpack.c.h.bf16 %v7980_v2  ;;  %v8170_v61 = vld [vmem:[#allocation2 + $0xa28] sm:$0xff]  }
  0x62   :  { %v3154_v18 = vpack.c.bf16 %v3061_v9, %v3060_v8  ;;  %v2164_v19 = vadd.f32 %v6905_v55, %v1779_v10  ;;  %v562_v20 = vadd.f32 %v5757_v11, %v5501_v5  ;;  %v6269_v21 = vunpack.c.l.bf16 %v8043_v7  ;;  %v8233_v2 = vld [vmem:[#allocation2 + $0xc28] sm:$0xff]  }
  0x63   :  { %v2165_v23 = vadd.f32 %v6906_v58, %v1780_v13  ;;  %v563_v24 = vadd.f32 %v5758_v14, %v5502_v6  ;;  %v6270_v25 = vunpack.c.h.bf16 %v8043_v7  ;;  %v6525_v26 = vunpack.c.l.bf16 %v8106_v12  ;;  %v8296_v7 = vld [vmem:[#allocation2 + $0xe28] sm:$0xff]  }
  0x64   :  { %8574 = vmatprep.mubr.bf16.mxu1 %v3154_v18  ;;  %v2549_v28 = vadd.f32 %v7161_v59, %v2164_v19  ;;  %v947_v29 = vadd.f32 %v6013_v15, %v562_v20  ;;  %v6526_v30 = vunpack.c.h.bf16 %v8106_v12  ;;  %v6781_v31 = vunpack.c.l.bf16 %v8169_v17  ;;  %v7886_v12 = vld [vmem:[#allocation2 + $0x120] sm:$0xff]  }
  0x65   :  { %v2550_v33 = vadd.f32 %v7162_v60, %v2165_v23  ;;  %v948_v36 = vadd.f32 %v6014_v16, %v563_v24  ;;  %v6782_v37 = vunpack.c.h.bf16 %v8169_v17  ;;  %v7037_v38 = vunpack.c.l.bf16 %v8232_v22  ;;  %v7949_v17 = vld [vmem:[#allocation2 + $0x320] sm:$0xff]  }
  0x66   :  { %v2934_v35 = vadd.f32 %v7417_v1, %v2549_v28  ;;  %v1332_v39 = vadd.f32 %v6269_v21, %v947_v29  ;;  %v7038_v40 = vunpack.c.h.bf16 %v8232_v22  ;;  %v7293_v41 = vunpack.c.l.bf16 %v8295_v27  ;;  %v8012_v22 = vld [vmem:[#allocation2 + $0x520] sm:$0xff]  }
  0x67   :  { %v2935_v43 = vadd.f32 %v7418_v4, %v2550_v33  ;;  %v1333_v44 = vadd.f32 %v6270_v25, %v948_v36  ;;  %v7294_v45 = vunpack.c.h.bf16 %v8295_v27  ;;  %v5505_v46 = vunpack.c.l.bf16 %v7855_v32  ;;  %v8075_v23 = vld [vmem:[#allocation2 + $0x720] sm:$0xff]  }
  0x68   :  { %v3062_v48 = vmul.f32 0.125, %v2934_v35  ;;  %v1717_v49 = vadd.f32 %v6525_v26, %v1332_v39  ;;  %v5506_v50 = vunpack.c.h.bf16 %v7855_v32  ;;  %v5761_v51 = vunpack.c.l.bf16 %v7918_v34  ;;  %v8138_v32 = vld [vmem:[#allocation2 + $0x920] sm:$0xff]  }
  0x69   :  { %v3063_v52 = vmul.f32 0.125, %v2935_v43  ;;  %v1718_v53 = vadd.f32 %v6526_v30, %v1333_v44  ;;  %v5762_v54 = vunpack.c.h.bf16 %v7918_v34  ;;  %v6017_v55 = vunpack.c.l.bf16 %v7981_v42  ;;  %v8201_v34 = vld [vmem:[#allocation2 + $0xb20] sm:$0xff]  }
  0x6a   :  { %v2102_v57 = vadd.f32 %v6781_v31, %v1717_v49  ;;  %v564_v58 = vadd.f32 %v5761_v51, %v5505_v46  ;;  %v6018_v59 = vunpack.c.h.bf16 %v7981_v42  ;;  %v6273_v60 = vunpack.c.l.bf16 %v8044_v47  ;;  %v8264_v42 = vld [vmem:[#allocation2 + $0xd20] sm:$0xff]  }
  0x6b   :  { %v3155_v62 = vpack.c.bf16 %v3063_v52, %v3062_v48  ;;  %v2103_v63 = vadd.f32 %v6782_v37, %v1718_v53  ;;  %v565_v0 = vadd.f32 %v5762_v54, %v5506_v50  ;;  %v6274_v1 = vunpack.c.h.bf16 %v8044_v47  ;;  %v8327_v47 = vld [vmem:[#allocation2 + $0xf20] sm:$0xff]   ;;  %v7887_v52 = vld [vmem:[#allocation2 + $0x128] sm:$0xff]  }
  0x6c   :  { %v2487_v3 = vadd.f32 %v7037_v38, %v2102_v57  ;;  %v949_v4 = vadd.f32 %v6017_v55, %v564_v58  ;;  %v6529_v5 = vunpack.c.l.bf16 %v8107_v56  ;;  %v6530_v6 = vunpack.c.h.bf16 %v8107_v56  ;;  %v7950_v57 = vld [vmem:[#allocation2 + $0x328] sm:$0xff]  }
  0x6d   :  { %8575 = vmatmul.mubr.bf16.gmra.mxu1 %v3155_v62  ;;  %v2488_v8 = vadd.f32 %v7038_v40, %v2103_v63  ;;  %v950_v9 = vadd.f32 %v6018_v59, %v565_v0  ;;  %v6785_v10 = vunpack.c.l.bf16 %v8170_v61  ;;  %v6786_v11 = vunpack.c.h.bf16 %v8170_v61  ;;  %v8013_v62 = vld [vmem:[#allocation2 + $0x528] sm:$0xff]  }
  0x6e   :  { %v2872_v13 = vadd.f32 %v7293_v41, %v2487_v3  ;;  %v1334_v14 = vadd.f32 %v6273_v60, %v949_v4  ;;  %v7041_v15 = vunpack.c.l.bf16 %v8233_v2  ;;  %v7042_v16 = vunpack.c.h.bf16 %v8233_v2  ;;  %v8076_v63 = vld [vmem:[#allocation2 + $0x728] sm:$0xff]  }
  0x6f   :  { %v2873_v18 = vadd.f32 %v7294_v45, %v2488_v8  ;;  %v1335_v19 = vadd.f32 %v6274_v1, %v950_v9  ;;  %v7297_v20 = vunpack.c.l.bf16 %v8296_v7  ;;  %v7298_v21 = vunpack.c.h.bf16 %v8296_v7  ;;  %v8139_v8 = vld [vmem:[#allocation2 + $0x928] sm:$0xff]  }
  0x70   :  { %v3000_v24 = vmul.f32 0.125, %v2872_v13  ;;  %v1719_v25 = vadd.f32 %v6529_v5, %v1334_v14  ;;  %v5629_v26 = vunpack.c.l.bf16 %v7886_v12  ;;  %v5630_v27 = vunpack.c.h.bf16 %v7886_v12  ;;  %v8202_v13 = vld [vmem:[#allocation2 + $0xb28] sm:$0xff]  }
  0x71   :  { %v3001_v28 = vmul.f32 0.125, %v2873_v18  ;;  %v1720_v29 = vadd.f32 %v6530_v6, %v1335_v19  ;;  %v5885_v30 = vunpack.c.l.bf16 %v7949_v17  ;;  %v5886_v31 = vunpack.c.h.bf16 %v7949_v17  ;;  %v8265_v18 = vld [vmem:[#allocation2 + $0xd28] sm:$0xff]  }
  0x72   :  { %v2104_v33 = vadd.f32 %v6785_v10, %v1719_v25  ;;  %v6141_v36 = vunpack.c.l.bf16 %v8012_v22  ;;  %v6142_v37 = vunpack.c.h.bf16 %v8012_v22  ;;  %v6397_v38 = vunpack.c.l.bf16 %v8075_v23 }
  0x73   :  { %v3124_v35 = vpack.c.bf16 %v3001_v28, %v3000_v24  ;;  %v2105_v39 = vadd.f32 %v6786_v11, %v1720_v29  ;;  %v626_v40 = vadd.f32 %v5885_v30, %v5629_v26  ;;  %v627_v41 = vadd.f32 %v5886_v31, %v5630_v27  ;;  %v7856_v28 = vld [vmem:[#allocation2 + $0x30] sm:$0xff]  }
  0x74   :  { %v2489_v43 = vadd.f32 %v7041_v15, %v2104_v33  ;;  %v6398_v44 = vunpack.c.h.bf16 %v8075_v23  ;;  %v6653_v45 = vunpack.c.l.bf16 %v8138_v32  ;;  %v6654_v46 = vunpack.c.h.bf16 %v8138_v32  ;;  %v8328_v23 = vld [vmem:[#allocation2 + $0xf28] sm:$0xff]   ;;  %v7919_v33 = vld [vmem:[#allocation2 + $0x230] sm:$0xff]  }
  0x75   :  { %8514 = vmatprep.mubr.bf16.mxu0 %v3124_v35  ;;  %v2490_v48 = vadd.f32 %v7042_v16, %v2105_v39  ;;  %v1011_v49 = vadd.f32 %v6141_v36, %v626_v40  ;;  %v1012_v50 = vadd.f32 %v6142_v37, %v627_v41  ;;  %v6909_v51 = vunpack.c.l.bf16 %v8201_v34  ;;  %v7982_v35 = vld [vmem:[#allocation2 + $0x430] sm:$0xff]  }
  0x76   :  { %v2874_v53 = vadd.f32 %v7297_v20, %v2489_v43  ;;  %v6910_v54 = vunpack.c.h.bf16 %v8201_v34  ;;  %v7165_v55 = vunpack.c.l.bf16 %v8264_v42  ;;  %v7166_v56 = vunpack.c.h.bf16 %v8264_v42  ;;  %v8045_v43 = vld [vmem:[#allocation2 + $0x630] sm:$0xff]  }
  0x77   :  { %v2875_v58 = vadd.f32 %v7298_v21, %v2490_v48  ;;  %v1396_v59 = vadd.f32 %v6397_v38, %v1011_v49  ;;  %v1397_v60 = vadd.f32 %v6398_v44, %v1012_v50  ;;  %v7421_v61 = vunpack.c.l.bf16 %v8327_v47  ;;  %v8108_v48 = vld [vmem:[#allocation2 + $0x830] sm:$0xff]  }
  0x78   :  { %v3002_v0 = vmul.f32 0.125, %v2874_v53  ;;  %v7422_v1 = vunpack.c.h.bf16 %v8327_v47  ;;  %v5633_v2 = vunpack.c.l.bf16 %v7887_v52  ;;  %v5634_v3 = vunpack.c.h.bf16 %v7887_v52  ;;  %v8171_v53 = vld [vmem:[#allocation2 + $0xa30] sm:$0xff]  }
  0x79   :  { %v3003_v4 = vmul.f32 0.125, %v2875_v58  ;;  %v1781_v5 = vadd.f32 %v6653_v45, %v1396_v59  ;;  %v1782_v6 = vadd.f32 %v6654_v46, %v1397_v60  ;;  %v5889_v7 = vunpack.c.l.bf16 %v7950_v57  ;;  %v8234_v58 = vld [vmem:[#allocation2 + $0xc30] sm:$0xff]  }
  0x7a   :  { %v5890_v9 = vunpack.c.h.bf16 %v7950_v57  ;;  %v6145_v10 = vunpack.c.l.bf16 %v8013_v62  ;;  %v6146_v11 = vunpack.c.h.bf16 %v8013_v62  ;;  %v6401_v12 = vunpack.c.l.bf16 %v8076_v63 }
  0x7b   :  { %v3125_v14 = vpack.c.bf16 %v3003_v4, %v3002_v0  ;;  %v2166_v15 = vadd.f32 %v6909_v51, %v1781_v5  ;;  %v2167_v16 = vadd.f32 %v6910_v54, %v1782_v6  ;;  %v628_v17 = vadd.f32 %v5889_v7, %v5633_v2  ;;  %v7857_v4 = vld [vmem:[#allocation2 + $0x38] sm:$0xff]  }
  0x7c   :  { %v629_v19 = vadd.f32 %v5890_v9, %v5634_v3  ;;  %v6402_v20 = vunpack.c.h.bf16 %v8076_v63  ;;  %v6657_v21 = vunpack.c.l.bf16 %v8139_v8  ;;  %v6658_v22 = vunpack.c.h.bf16 %v8139_v8  ;;  %v8297_v63 = vld [vmem:[#allocation2 + $0xe30] sm:$0xff]   ;;  %v7920_v9 = vld [vmem:[#allocation2 + $0x238] sm:$0xff]  }
  0x7d   :  { %8515 = vmatmul.mubr.bf16.gmra.mxu0 %v3125_v14  ;;  %v2551_v24 = vadd.f32 %v7165_v55, %v2166_v15  ;;  %v2552_v25 = vadd.f32 %v7166_v56, %v2167_v16  ;;  %v1013_v26 = vadd.f32 %v6145_v10, %v628_v17  ;;  %v6913_v27 = vunpack.c.l.bf16 %v8202_v13  ;;  %v7983_v14 = vld [vmem:[#allocation2 + $0x438] sm:$0xff]  }
  0x7e   :  { %v1014_v29 = vadd.f32 %v6146_v11, %v629_v19  ;;  %v6914_v30 = vunpack.c.h.bf16 %v8202_v13  ;;  %v7169_v31 = vunpack.c.l.bf16 %v8265_v18  ;;  %v7170_v32 = vunpack.c.h.bf16 %v8265_v18  ;;  %v8046_v19 = vld [vmem:[#allocation2 + $0x638] sm:$0xff]  }
  0x7f   :  { %v2936_v36 = vadd.f32 %v7421_v61, %v2551_v24  ;;  %v2937_v37 = vadd.f32 %v7422_v1, %v2552_v25  ;;  %v1398_v38 = vadd.f32 %v6401_v12, %v1013_v26  ;;  %v7425_v34 = vunpack.c.l.bf16 %v8328_v23 }
  0x80   :  { %v1399_v39 = vadd.f32 %v6402_v20, %v1014_v29  ;;  %v7426_v40 = vunpack.c.h.bf16 %v8328_v23  ;;  %v5509_v41 = vunpack.c.l.bf16 %v7856_v28  ;;  %v5510_v42 = vunpack.c.h.bf16 %v7856_v28  ;;  %v8109_v28 = vld [vmem:[#allocation2 + $0x838] sm:$0xff]  }
  0x81   :  { %v3064_v44 = vmul.f32 0.125, %v2936_v36  ;;  %v3065_v45 = vmul.f32 0.125, %v2937_v37  ;;  %v1783_v46 = vadd.f32 %v6657_v21, %v1398_v38  ;;  %v5765_v47 = vunpack.c.l.bf16 %v7919_v33 }
  0x82   :  { %v1784_v49 = vadd.f32 %v6658_v22, %v1399_v39  ;;  %v5766_v50 = vunpack.c.h.bf16 %v7919_v33  ;;  %v6021_v51 = vunpack.c.l.bf16 %v7982_v35  ;;  %v6022_v52 = vunpack.c.h.bf16 %v7982_v35  ;;  %v8172_v33 = vld [vmem:[#allocation2 + $0xa38] sm:$0xff]  }
  0x83   :  { %v3156_v54 = vpack.c.bf16 %v3065_v45, %v3064_v44  ;;  %v2168_v55 = vadd.f32 %v6913_v27, %v1783_v46  ;;  %v566_v56 = vadd.f32 %v5765_v47, %v5509_v41  ;;  %v6277_v57 = vunpack.c.l.bf16 %v8045_v43  ;;  %v8235_v35 = vld [vmem:[#allocation2 + $0xc38] sm:$0xff]  }
  0x84   :  { %v2169_v59 = vadd.f32 %v6914_v30, %v1784_v49  ;;  %v567_v60 = vadd.f32 %v5766_v50, %v5510_v42  ;;  %v6278_v61 = vunpack.c.h.bf16 %v8045_v43  ;;  %v6533_v62 = vunpack.c.l.bf16 %v8108_v48  ;;  %v8298_v43 = vld [vmem:[#allocation2 + $0xe38] sm:$0xff]  }
  0x85   :  { %8578 = vmatprep.mubr.bf16.mxu1 %v3156_v54  ;;  %v2553_v0 = vadd.f32 %v7169_v31, %v2168_v55  ;;  %v951_v1 = vadd.f32 %v6021_v51, %v566_v56  ;;  %v6534_v2 = vunpack.c.h.bf16 %v8108_v48  ;;  %v6789_v3 = vunpack.c.l.bf16 %v8171_v53  ;;  %v7888_v48 = vld [vmem:[#allocation2 + $0x130] sm:$0xff]  }
  0x86   :  { %v2554_v5 = vadd.f32 %v7170_v32, %v2169_v59  ;;  %v952_v6 = vadd.f32 %v6022_v52, %v567_v60  ;;  %v6790_v7 = vunpack.c.h.bf16 %v8171_v53  ;;  %v7045_v8 = vunpack.c.l.bf16 %v8234_v58  ;;  %v7951_v53 = vld [vmem:[#allocation2 + $0x330] sm:$0xff]  }
  0x87   :  { %v2938_v10 = vadd.f32 %v7425_v34, %v2553_v0  ;;  %v1336_v11 = vadd.f32 %v6277_v57, %v951_v1  ;;  %v7046_v12 = vunpack.c.h.bf16 %v8234_v58  ;;  %v7301_v13 = vunpack.c.l.bf16 %v8297_v63  ;;  %v8014_v58 = vld [vmem:[#allocation2 + $0x530] sm:$0xff]  }
  0x88   :  { %v2939_v15 = vadd.f32 %v7426_v40, %v2554_v5  ;;  %v1337_v16 = vadd.f32 %v6278_v61, %v952_v6  ;;  %v7302_v17 = vunpack.c.h.bf16 %v8297_v63  ;;  %v5513_v18 = vunpack.c.l.bf16 %v7857_v4  ;;  %v8077_v59 = vld [vmem:[#allocation2 + $0x730] sm:$0xff]  }
  0x89   :  { %v3066_v20 = vmul.f32 0.125, %v2938_v10  ;;  %v1721_v21 = vadd.f32 %v6533_v62, %v1336_v11  ;;  %v5514_v22 = vunpack.c.h.bf16 %v7857_v4  ;;  %v5769_v23 = vunpack.c.l.bf16 %v7920_v9  ;;  %v8140_v4 = vld [vmem:[#allocation2 + $0x930] sm:$0xff]  }
  0x8a   :  { %v3067_v24 = vmul.f32 0.125, %v2939_v15  ;;  %v1722_v25 = vadd.f32 %v6534_v2, %v1337_v16  ;;  %v5770_v26 = vunpack.c.h.bf16 %v7920_v9  ;;  %v6025_v27 = vunpack.c.l.bf16 %v7983_v14  ;;  %v8203_v9 = vld [vmem:[#allocation2 + $0xb30] sm:$0xff]  }
  0x8b   :  { %v2106_v29 = vadd.f32 %v6789_v3, %v1721_v21  ;;  %v568_v30 = vadd.f32 %v5769_v23, %v5513_v18  ;;  %v6026_v31 = vunpack.c.h.bf16 %v7983_v14  ;;  %v6281_v32 = vunpack.c.l.bf16 %v8046_v19  ;;  %v8266_v14 = vld [vmem:[#allocation2 + $0xd30] sm:$0xff]  }
  0x8c   :  { %v3157_v36 = vpack.c.bf16 %v3067_v24, %v3066_v20  ;;  %v2107_v37 = vadd.f32 %v6790_v7, %v1722_v25  ;;  %v569_v38 = vadd.f32 %v5770_v26, %v5514_v22  ;;  %v6282_v34 = vunpack.c.h.bf16 %v8046_v19  ;;  %v8329_v19 = vld [vmem:[#allocation2 + $0xf30] sm:$0xff]   ;;  %v7889_v24 = vld [vmem:[#allocation2 + $0x138] sm:$0xff]  }
  0x8d   :  { %v2491_v39 = vadd.f32 %v7045_v8, %v2106_v29  ;;  %v953_v40 = vadd.f32 %v6025_v27, %v568_v30  ;;  %v6537_v41 = vunpack.c.l.bf16 %v8109_v28  ;;  %v6538_v42 = vunpack.c.h.bf16 %v8109_v28  ;;  %v7952_v29 = vld [vmem:[#allocation2 + $0x338] sm:$0xff]  }
  0x8e   :  { %8579 = vmatmul.mubr.bf16.gmra.mxu1 %v3157_v36  ;;  %v2492_v44 = vadd.f32 %v7046_v12, %v2107_v37  ;;  %v954_v45 = vadd.f32 %v6026_v31, %v569_v38  ;;  %v6793_v46 = vunpack.c.l.bf16 %v8172_v33  ;;  %v6794_v47 = vunpack.c.h.bf16 %v8172_v33  ;;  %v8015_v36 = vld [vmem:[#allocation2 + $0x538] sm:$0xff]  }
  0x8f   :  { %v2876_v49 = vadd.f32 %v7301_v13, %v2491_v39  ;;  %v1338_v50 = vadd.f32 %v6281_v32, %v953_v40  ;;  %v7049_v51 = vunpack.c.l.bf16 %v8235_v35  ;;  %v7050_v52 = vunpack.c.h.bf16 %v8235_v35  ;;  %v8078_v37 = vld [vmem:[#allocation2 + $0x738] sm:$0xff]  }
  0x90   :  { %v2877_v54 = vadd.f32 %v7302_v17, %v2492_v44  ;;  %v1339_v55 = vadd.f32 %v6282_v34, %v954_v45  ;;  %v7305_v56 = vunpack.c.l.bf16 %v8298_v43  ;;  %v7306_v57 = vunpack.c.h.bf16 %v8298_v43  ;;  %v8141_v44 = vld [vmem:[#allocation2 + $0x938] sm:$0xff]  }
  0x91   :  { %v3004_v60 = vmul.f32 0.125, %v2876_v49  ;;  %v1723_v61 = vadd.f32 %v6537_v41, %v1338_v50  ;;  %v5637_v62 = vunpack.c.l.bf16 %v7888_v48  ;;  %v5638_v63 = vunpack.c.h.bf16 %v7888_v48  ;;  %v8204_v49 = vld [vmem:[#allocation2 + $0xb38] sm:$0xff]  }
  0x92   :  { %v3005_v0 = vmul.f32 0.125, %v2877_v54  ;;  %v1724_v1 = vadd.f32 %v6538_v42, %v1339_v55  ;;  %v5893_v2 = vunpack.c.l.bf16 %v7951_v53  ;;  %v5894_v3 = vunpack.c.h.bf16 %v7951_v53  ;;  %v8267_v54 = vld [vmem:[#allocation2 + $0xd38] sm:$0xff]  }
  0x93   :  { %v2108_v5 = vadd.f32 %v6793_v46, %v1723_v61  ;;  %v6149_v6 = vunpack.c.l.bf16 %v8014_v58  ;;  %v6150_v7 = vunpack.c.h.bf16 %v8014_v58  ;;  %v6405_v8 = vunpack.c.l.bf16 %v8077_v59 }
  0x94   :  { %v3126_v10 = vpack.c.bf16 %v3005_v0, %v3004_v60  ;;  %v2109_v11 = vadd.f32 %v6794_v47, %v1724_v1  ;;  %v630_v12 = vadd.f32 %v5893_v2, %v5637_v62  ;;  %v631_v13 = vadd.f32 %v5894_v3, %v5638_v63  ;;  %v7858_v0 = vld [vmem:[#allocation2 + $0x40] sm:$0xff]  }
  0x95   :  { %v2493_v15 = vadd.f32 %v7049_v51, %v2108_v5  ;;  %v6406_v16 = vunpack.c.h.bf16 %v8077_v59  ;;  %v6661_v17 = vunpack.c.l.bf16 %v8140_v4  ;;  %v6662_v18 = vunpack.c.h.bf16 %v8140_v4  ;;  %v8330_v59 = vld [vmem:[#allocation2 + $0xf38] sm:$0xff]   ;;  %v7921_v5 = vld [vmem:[#allocation2 + $0x240] sm:$0xff]  }
  0x96   :  { %8518 = vmatprep.mubr.bf16.mxu0 %v3126_v10  ;;  %v2494_v20 = vadd.f32 %v7050_v52, %v2109_v11  ;;  %v1015_v21 = vadd.f32 %v6149_v6, %v630_v12  ;;  %v1016_v22 = vadd.f32 %v6150_v7, %v631_v13  ;;  %v6917_v23 = vunpack.c.l.bf16 %v8203_v9  ;;  %v7984_v10 = vld [vmem:[#allocation2 + $0x440] sm:$0xff]  }
  0x97   :  { %v2878_v25 = vadd.f32 %v7305_v56, %v2493_v15  ;;  %v6918_v26 = vunpack.c.h.bf16 %v8203_v9  ;;  %v7173_v27 = vunpack.c.l.bf16 %v8266_v14  ;;  %v7174_v28 = vunpack.c.h.bf16 %v8266_v14  ;;  %v8047_v15 = vld [vmem:[#allocation2 + $0x640] sm:$0xff]  }
  0x98   :  { %v2879_v30 = vadd.f32 %v7306_v57, %v2494_v20  ;;  %v1400_v31 = vadd.f32 %v6405_v8, %v1015_v21  ;;  %v1401_v32 = vadd.f32 %v6406_v16, %v1016_v22  ;;  %v7429_v33 = vunpack.c.l.bf16 %v8329_v19  ;;  %v8110_v20 = vld [vmem:[#allocation2 + $0x840] sm:$0xff]  }
  0x99   :  { %v3006_v38 = vmul.f32 0.125, %v2878_v25  ;;  %v7430_v34 = vunpack.c.h.bf16 %v8329_v19  ;;  %v5641_v35 = vunpack.c.l.bf16 %v7889_v24  ;;  %v5642_v39 = vunpack.c.h.bf16 %v7889_v24  ;;  %v8173_v25 = vld [vmem:[#allocation2 + $0xa40] sm:$0xff]  }
  0x9a   :  { %v3007_v40 = vmul.f32 0.125, %v2879_v30  ;;  %v1785_v41 = vadd.f32 %v6661_v17, %v1400_v31  ;;  %v1786_v42 = vadd.f32 %v6662_v18, %v1401_v32  ;;  %v5897_v43 = vunpack.c.l.bf16 %v7952_v29  ;;  %v8236_v30 = vld [vmem:[#allocation2 + $0xc40] sm:$0xff]  }
  0x9b   :  { %v5898_v45 = vunpack.c.h.bf16 %v7952_v29  ;;  %v6153_v46 = vunpack.c.l.bf16 %v8015_v36  ;;  %v6154_v47 = vunpack.c.h.bf16 %v8015_v36  ;;  %v6409_v48 = vunpack.c.l.bf16 %v8078_v37 }
  0x9c   :  { %v3127_v50 = vpack.c.bf16 %v3007_v40, %v3006_v38  ;;  %v2170_v51 = vadd.f32 %v6917_v23, %v1785_v41  ;;  %v2171_v52 = vadd.f32 %v6918_v26, %v1786_v42  ;;  %v632_v53 = vadd.f32 %v5897_v43, %v5641_v35  ;;  %v7859_v40 = vld [vmem:[#allocation2 + $0x48] sm:$0xff]  }
  0x9d   :  { %v633_v55 = vadd.f32 %v5898_v45, %v5642_v39  ;;  %v6410_v56 = vunpack.c.h.bf16 %v8078_v37  ;;  %v6665_v57 = vunpack.c.l.bf16 %v8141_v44  ;;  %v6666_v58 = vunpack.c.h.bf16 %v8141_v44  ;;  %v8299_v37 = vld [vmem:[#allocation2 + $0xe40] sm:$0xff]   ;;  %v7922_v45 = vld [vmem:[#allocation2 + $0x248] sm:$0xff]  }
  0x9e   :  { %8519 = vmatmul.mubr.bf16.gmra.mxu0 %v3127_v50  ;;  %v2555_v60 = vadd.f32 %v7173_v27, %v2170_v51  ;;  %v2556_v61 = vadd.f32 %v7174_v28, %v2171_v52  ;;  %v1017_v62 = vadd.f32 %v6153_v46, %v632_v53  ;;  %v6921_v63 = vunpack.c.l.bf16 %v8204_v49  ;;  %v7985_v50 = vld [vmem:[#allocation2 + $0x448] sm:$0xff]  }
  0x9f   :  { %v1018_v1 = vadd.f32 %v6154_v47, %v633_v55  ;;  %v6922_v2 = vunpack.c.h.bf16 %v8204_v49  ;;  %v7177_v3 = vunpack.c.l.bf16 %v8267_v54  ;;  %v7178_v4 = vunpack.c.h.bf16 %v8267_v54  ;;  %v8048_v55 = vld [vmem:[#allocation2 + $0x648] sm:$0xff]  }
  0xa0   :  { %v2940_v6 = vadd.f32 %v7429_v33, %v2555_v60  ;;  %v2941_v7 = vadd.f32 %v7430_v34, %v2556_v61  ;;  %v1402_v8 = vadd.f32 %v6409_v48, %v1017_v62  ;;  %v7433_v9 = vunpack.c.l.bf16 %v8330_v59 }
  0xa1   :  { %v1403_v11 = vadd.f32 %v6410_v56, %v1018_v1  ;;  %v7434_v12 = vunpack.c.h.bf16 %v8330_v59  ;;  %v5517_v13 = vunpack.c.l.bf16 %v7858_v0  ;;  %v5518_v14 = vunpack.c.h.bf16 %v7858_v0  ;;  %v8111_v0 = vld [vmem:[#allocation2 + $0x848] sm:$0xff]  }
  0xa2   :  { %v3068_v16 = vmul.f32 0.125, %v2940_v6  ;;  %v3069_v17 = vmul.f32 0.125, %v2941_v7  ;;  %v1787_v18 = vadd.f32 %v6665_v57, %v1402_v8  ;;  %v5773_v19 = vunpack.c.l.bf16 %v7921_v5 }
  0xa3   :  { %v1788_v21 = vadd.f32 %v6666_v58, %v1403_v11  ;;  %v5774_v22 = vunpack.c.h.bf16 %v7921_v5  ;;  %v6029_v23 = vunpack.c.l.bf16 %v7984_v10  ;;  %v6030_v24 = vunpack.c.h.bf16 %v7984_v10  ;;  %v8174_v5 = vld [vmem:[#allocation2 + $0xa48] sm:$0xff]  }
  0xa4   :  { %v3158_v26 = vpack.c.bf16 %v3069_v17, %v3068_v16  ;;  %v2172_v27 = vadd.f32 %v6921_v63, %v1787_v18  ;;  %v570_v28 = vadd.f32 %v5773_v19, %v5517_v13  ;;  %v6285_v29 = vunpack.c.l.bf16 %v8047_v15  ;;  %v8237_v10 = vld [vmem:[#allocation2 + $0xc48] sm:$0xff]  }
  0xa5   :  { %v2173_v31 = vadd.f32 %v6922_v2, %v1788_v21  ;;  %v571_v32 = vadd.f32 %v5774_v22, %v5518_v14  ;;  %v6286_v33 = vunpack.c.h.bf16 %v8047_v15  ;;  %v6541_v36 = vunpack.c.l.bf16 %v8110_v20  ;;  %v8300_v15 = vld [vmem:[#allocation2 + $0xe48] sm:$0xff]  }
  0xa6   :  { %8582 = vmatprep.mubr.bf16.mxu1 %v3158_v26  ;;  %v2557_v38 = vadd.f32 %v7177_v3, %v2172_v27  ;;  %v955_v34 = vadd.f32 %v6029_v23, %v570_v28  ;;  %v6542_v35 = vunpack.c.h.bf16 %v8110_v20  ;;  %v6797_v39 = vunpack.c.l.bf16 %v8173_v25  ;;  %v7890_v20 = vld [vmem:[#allocation2 + $0x140] sm:$0xff]  }
  0xa7   :  { %v2558_v41 = vadd.f32 %v7178_v4, %v2173_v31  ;;  %v956_v42 = vadd.f32 %v6030_v24, %v571_v32  ;;  %v6798_v43 = vunpack.c.h.bf16 %v8173_v25  ;;  %v7053_v44 = vunpack.c.l.bf16 %v8236_v30  ;;  %v7953_v25 = vld [vmem:[#allocation2 + $0x340] sm:$0xff]  }
  0xa8   :  { %v2942_v46 = vadd.f32 %v7433_v9, %v2557_v38  ;;  %v1340_v47 = vadd.f32 %v6285_v29, %v955_v34  ;;  %v7054_v48 = vunpack.c.h.bf16 %v8236_v30  ;;  %v7309_v49 = vunpack.c.l.bf16 %v8299_v37  ;;  %v8016_v30 = vld [vmem:[#allocation2 + $0x540] sm:$0xff]  }
  0xa9   :  { %v2943_v51 = vadd.f32 %v7434_v12, %v2558_v41  ;;  %v1341_v52 = vadd.f32 %v6286_v33, %v956_v42  ;;  %v7310_v53 = vunpack.c.h.bf16 %v8299_v37  ;;  %v5521_v54 = vunpack.c.l.bf16 %v7859_v40  ;;  %v8079_v31 = vld [vmem:[#allocation2 + $0x740] sm:$0xff]  }
  0xaa   :  { %v3070_v56 = vmul.f32 0.125, %v2942_v46  ;;  %v1725_v57 = vadd.f32 %v6541_v36, %v1340_v47  ;;  %v5522_v58 = vunpack.c.h.bf16 %v7859_v40  ;;  %v5777_v59 = vunpack.c.l.bf16 %v7922_v45  ;;  %v8142_v40 = vld [vmem:[#allocation2 + $0x940] sm:$0xff]  }
  0xab   :  { %v3071_v60 = vmul.f32 0.125, %v2943_v51  ;;  %v1726_v61 = vadd.f32 %v6542_v35, %v1341_v52  ;;  %v5778_v62 = vunpack.c.h.bf16 %v7922_v45  ;;  %v6033_v63 = vunpack.c.l.bf16 %v7985_v50  ;;  %v8205_v45 = vld [vmem:[#allocation2 + $0xb40] sm:$0xff]  }
  0xac   :  { %v2110_v1 = vadd.f32 %v6797_v39, %v1725_v57  ;;  %v572_v2 = vadd.f32 %v5777_v59, %v5521_v54  ;;  %v6034_v3 = vunpack.c.h.bf16 %v7985_v50  ;;  %v6289_v4 = vunpack.c.l.bf16 %v8048_v55  ;;  %v8268_v50 = vld [vmem:[#allocation2 + $0xd40] sm:$0xff]  }
  0xad   :  { %v3159_v6 = vpack.c.bf16 %v3071_v60, %v3070_v56  ;;  %v2111_v7 = vadd.f32 %v6798_v43, %v1726_v61  ;;  %v573_v8 = vadd.f32 %v5778_v62, %v5522_v58  ;;  %v6290_v9 = vunpack.c.h.bf16 %v8048_v55  ;;  %v8331_v55 = vld [vmem:[#allocation2 + $0xf40] sm:$0xff]   ;;  %v7891_v60 = vld [vmem:[#allocation2 + $0x148] sm:$0xff]  }
  0xae   :  { %v2495_v11 = vadd.f32 %v7053_v44, %v2110_v1  ;;  %v957_v12 = vadd.f32 %v6033_v63, %v572_v2  ;;  %v6545_v13 = vunpack.c.l.bf16 %v8111_v0  ;;  %v6546_v14 = vunpack.c.h.bf16 %v8111_v0  ;;  %v7954_v1 = vld [vmem:[#allocation2 + $0x348] sm:$0xff]  }
  0xaf   :  { %8583 = vmatmul.mubr.bf16.gmra.mxu1 %v3159_v6  ;;  %v2496_v16 = vadd.f32 %v7054_v48, %v2111_v7  ;;  %v958_v17 = vadd.f32 %v6034_v3, %v573_v8  ;;  %v6801_v18 = vunpack.c.l.bf16 %v8174_v5  ;;  %v6802_v19 = vunpack.c.h.bf16 %v8174_v5  ;;  %v8017_v6 = vld [vmem:[#allocation2 + $0x548] sm:$0xff]  }
  0xb0   :  { %v2880_v21 = vadd.f32 %v7309_v49, %v2495_v11  ;;  %v1342_v22 = vadd.f32 %v6289_v4, %v957_v12  ;;  %v7057_v23 = vunpack.c.l.bf16 %v8237_v10  ;;  %v7058_v24 = vunpack.c.h.bf16 %v8237_v10  ;;  %v8080_v7 = vld [vmem:[#allocation2 + $0x748] sm:$0xff]  }
  0xb1   :  { %v2881_v26 = vadd.f32 %v7310_v53, %v2496_v16  ;;  %v1343_v27 = vadd.f32 %v6290_v9, %v958_v17  ;;  %v7313_v28 = vunpack.c.l.bf16 %v8300_v15  ;;  %v7314_v29 = vunpack.c.h.bf16 %v8300_v15  ;;  %v8143_v16 = vld [vmem:[#allocation2 + $0x948] sm:$0xff]  }
  0xb2   :  { %v3008_v32 = vmul.f32 0.125, %v2880_v21  ;;  %v1727_v33 = vadd.f32 %v6545_v13, %v1342_v22  ;;  %v5645_v36 = vunpack.c.l.bf16 %v7890_v20  ;;  %v5646_v37 = vunpack.c.h.bf16 %v7890_v20  ;;  %v8206_v21 = vld [vmem:[#allocation2 + $0xb48] sm:$0xff]  }
  0xb3   :  { %v3009_v38 = vmul.f32 0.125, %v2881_v26  ;;  %v1728_v34 = vadd.f32 %v6546_v14, %v1343_v27  ;;  %v5901_v35 = vunpack.c.l.bf16 %v7953_v25  ;;  %v5902_v39 = vunpack.c.h.bf16 %v7953_v25  ;;  %v8269_v26 = vld [vmem:[#allocation2 + $0xd48] sm:$0xff]  }
  0xb4   :  { %v2112_v41 = vadd.f32 %v6801_v18, %v1727_v33  ;;  %v6157_v42 = vunpack.c.l.bf16 %v8016_v30  ;;  %v6158_v43 = vunpack.c.h.bf16 %v8016_v30  ;;  %v6413_v44 = vunpack.c.l.bf16 %v8079_v31 }
  0xb5   :  { %v3128_v46 = vpack.c.bf16 %v3009_v38, %v3008_v32  ;;  %v2113_v47 = vadd.f32 %v6802_v19, %v1728_v34  ;;  %v634_v48 = vadd.f32 %v5901_v35, %v5645_v36  ;;  %v635_v49 = vadd.f32 %v5902_v39, %v5646_v37  ;;  %v7860_v38 = vld [vmem:[#allocation2 + $0x50] sm:$0xff]  }
  0xb6   :  { %v2497_v51 = vadd.f32 %v7057_v23, %v2112_v41  ;;  %v6414_v52 = vunpack.c.h.bf16 %v8079_v31  ;;  %v6669_v53 = vunpack.c.l.bf16 %v8142_v40  ;;  %v6670_v54 = vunpack.c.h.bf16 %v8142_v40  ;;  %v8332_v31 = vld [vmem:[#allocation2 + $0xf48] sm:$0xff]   ;;  %v7923_v41 = vld [vmem:[#allocation2 + $0x250] sm:$0xff]  }
  0xb7   :  { %8522 = vmatprep.mubr.bf16.mxu0 %v3128_v46  ;;  %v2498_v56 = vadd.f32 %v7058_v24, %v2113_v47  ;;  %v1019_v57 = vadd.f32 %v6157_v42, %v634_v48  ;;  %v1020_v58 = vadd.f32 %v6158_v43, %v635_v49  ;;  %v6925_v59 = vunpack.c.l.bf16 %v8205_v45  ;;  %v7986_v46 = vld [vmem:[#allocation2 + $0x450] sm:$0xff]  }
  0xb8   :  { %v2882_v61 = vadd.f32 %v7313_v28, %v2497_v51  ;;  %v6926_v62 = vunpack.c.h.bf16 %v8205_v45  ;;  %v7181_v63 = vunpack.c.l.bf16 %v8268_v50  ;;  %v7182_v0 = vunpack.c.h.bf16 %v8268_v50  ;;  %v8049_v51 = vld [vmem:[#allocation2 + $0x650] sm:$0xff]  }
  0xb9   :  { %v2883_v2 = vadd.f32 %v7314_v29, %v2498_v56  ;;  %v1404_v3 = vadd.f32 %v6413_v44, %v1019_v57  ;;  %v1405_v4 = vadd.f32 %v6414_v52, %v1020_v58  ;;  %v7437_v5 = vunpack.c.l.bf16 %v8331_v55  ;;  %v8112_v56 = vld [vmem:[#allocation2 + $0x850] sm:$0xff]  }
  0xba   :  { %v3010_v8 = vmul.f32 0.125, %v2882_v61  ;;  %v7438_v9 = vunpack.c.h.bf16 %v8331_v55  ;;  %v5649_v10 = vunpack.c.l.bf16 %v7891_v60  ;;  %v5650_v11 = vunpack.c.h.bf16 %v7891_v60  ;;  %v8175_v61 = vld [vmem:[#allocation2 + $0xa50] sm:$0xff]  }
  0xbb   :  { %v3011_v12 = vmul.f32 0.125, %v2883_v2  ;;  %v1789_v13 = vadd.f32 %v6669_v53, %v1404_v3  ;;  %v1790_v14 = vadd.f32 %v6670_v54, %v1405_v4  ;;  %v5905_v15 = vunpack.c.l.bf16 %v7954_v1  ;;  %v8238_v2 = vld [vmem:[#allocation2 + $0xc50] sm:$0xff]  }
  0xbc   :  { %v5906_v17 = vunpack.c.h.bf16 %v7954_v1  ;;  %v6161_v18 = vunpack.c.l.bf16 %v8017_v6  ;;  %v6162_v19 = vunpack.c.h.bf16 %v8017_v6  ;;  %v6417_v20 = vunpack.c.l.bf16 %v8080_v7 }
  0xbd   :  { %v3129_v22 = vpack.c.bf16 %v3011_v12, %v3010_v8  ;;  %v2174_v23 = vadd.f32 %v6925_v59, %v1789_v13  ;;  %v2175_v24 = vadd.f32 %v6926_v62, %v1790_v14  ;;  %v636_v25 = vadd.f32 %v5905_v15, %v5649_v10  ;;  %v7861_v12 = vld [vmem:[#allocation2 + $0x58] sm:$0xff]  }
  0xbe   :  { %v637_v27 = vadd.f32 %v5906_v17, %v5650_v11  ;;  %v6418_v28 = vunpack.c.h.bf16 %v8080_v7  ;;  %v6673_v29 = vunpack.c.l.bf16 %v8143_v16  ;;  %v6674_v30 = vunpack.c.h.bf16 %v8143_v16  ;;  %v8301_v7 = vld [vmem:[#allocation2 + $0xe50] sm:$0xff]   ;;  %v7924_v17 = vld [vmem:[#allocation2 + $0x258] sm:$0xff]  }
  0xbf   :  { %8523 = vmatmul.mubr.bf16.gmra.mxu0 %v3129_v22  ;;  %v2559_v32 = vadd.f32 %v7181_v63, %v2174_v23  ;;  %v2560_v33 = vadd.f32 %v7182_v0, %v2175_v24  ;;  %v1021_v36 = vadd.f32 %v6161_v18, %v636_v25  ;;  %v6929_v37 = vunpack.c.l.bf16 %v8206_v21  ;;  %v7987_v22 = vld [vmem:[#allocation2 + $0x458] sm:$0xff]  }
  0xc0   :  { %v1022_v34 = vadd.f32 %v6162_v19, %v637_v27  ;;  %v6930_v35 = vunpack.c.h.bf16 %v8206_v21  ;;  %v7185_v39 = vunpack.c.l.bf16 %v8269_v26  ;;  %v7186_v40 = vunpack.c.h.bf16 %v8269_v26  ;;  %v8050_v27 = vld [vmem:[#allocation2 + $0x658] sm:$0xff]  }
  0xc1   :  { %v2944_v42 = vadd.f32 %v7437_v5, %v2559_v32  ;;  %v2945_v43 = vadd.f32 %v7438_v9, %v2560_v33  ;;  %v1406_v44 = vadd.f32 %v6417_v20, %v1021_v36  ;;  %v7441_v45 = vunpack.c.l.bf16 %v8332_v31 }
  0xc2   :  { %v1407_v47 = vadd.f32 %v6418_v28, %v1022_v34  ;;  %v7442_v48 = vunpack.c.h.bf16 %v8332_v31  ;;  %v5525_v49 = vunpack.c.l.bf16 %v7860_v38  ;;  %v5526_v50 = vunpack.c.h.bf16 %v7860_v38  ;;  %v8113_v38 = vld [vmem:[#allocation2 + $0x858] sm:$0xff]  }
  0xc3   :  { %v3072_v52 = vmul.f32 0.125, %v2944_v42  ;;  %v3073_v53 = vmul.f32 0.125, %v2945_v43  ;;  %v1791_v54 = vadd.f32 %v6673_v29, %v1406_v44  ;;  %v5781_v55 = vunpack.c.l.bf16 %v7923_v41 }
  0xc4   :  { %v1792_v57 = vadd.f32 %v6674_v30, %v1407_v47  ;;  %v5782_v58 = vunpack.c.h.bf16 %v7923_v41  ;;  %v6037_v59 = vunpack.c.l.bf16 %v7986_v46  ;;  %v6038_v60 = vunpack.c.h.bf16 %v7986_v46  ;;  %v8176_v41 = vld [vmem:[#allocation2 + $0xa58] sm:$0xff]  }
  0xc5   :  { %v3160_v62 = vpack.c.bf16 %v3073_v53, %v3072_v52  ;;  %v2176_v63 = vadd.f32 %v6929_v37, %v1791_v54  ;;  %v574_v0 = vadd.f32 %v5781_v55, %v5525_v49  ;;  %v6293_v1 = vunpack.c.l.bf16 %v8049_v51  ;;  %v8239_v46 = vld [vmem:[#allocation2 + $0xc58] sm:$0xff]  }
  0xc6   :  { %v2177_v3 = vadd.f32 %v6930_v35, %v1792_v57  ;;  %v575_v4 = vadd.f32 %v5782_v58, %v5526_v50  ;;  %v6294_v5 = vunpack.c.h.bf16 %v8049_v51  ;;  %v6549_v6 = vunpack.c.l.bf16 %v8112_v56  ;;  %v8302_v51 = vld [vmem:[#allocation2 + $0xe58] sm:$0xff]  }
  0xc7   :  { %8586 = vmatprep.mubr.bf16.mxu1 %v3160_v62  ;;  %v2561_v8 = vadd.f32 %v7185_v39, %v2176_v63  ;;  %v959_v9 = vadd.f32 %v6037_v59, %v574_v0  ;;  %v6550_v10 = vunpack.c.h.bf16 %v8112_v56  ;;  %v6805_v11 = vunpack.c.l.bf16 %v8175_v61  ;;  %v7892_v56 = vld [vmem:[#allocation2 + $0x150] sm:$0xff]  }
  0xc8   :  { %v2562_v13 = vadd.f32 %v7186_v40, %v2177_v3  ;;  %v960_v14 = vadd.f32 %v6038_v60, %v575_v4  ;;  %v6806_v15 = vunpack.c.h.bf16 %v8175_v61  ;;  %v7061_v16 = vunpack.c.l.bf16 %v8238_v2  ;;  %v7955_v61 = vld [vmem:[#allocation2 + $0x350] sm:$0xff]  }
  0xc9   :  { %v2946_v18 = vadd.f32 %v7441_v45, %v2561_v8  ;;  %v1344_v19 = vadd.f32 %v6293_v1, %v959_v9  ;;  %v7062_v20 = vunpack.c.h.bf16 %v8238_v2  ;;  %v7317_v21 = vunpack.c.l.bf16 %v8301_v7  ;;  %v8018_v2 = vld [vmem:[#allocation2 + $0x550] sm:$0xff]  }
  0xca   :  { %v2947_v23 = vadd.f32 %v7442_v48, %v2562_v13  ;;  %v1345_v24 = vadd.f32 %v6294_v5, %v960_v14  ;;  %v7318_v25 = vunpack.c.h.bf16 %v8301_v7  ;;  %v5529_v26 = vunpack.c.l.bf16 %v7861_v12  ;;  %v8081_v3 = vld [vmem:[#allocation2 + $0x750] sm:$0xff]  }
  0xcb   :  { %v3074_v28 = vmul.f32 0.125, %v2946_v18  ;;  %v1729_v29 = vadd.f32 %v6549_v6, %v1344_v19  ;;  %v5530_v30 = vunpack.c.h.bf16 %v7861_v12  ;;  %v5785_v31 = vunpack.c.l.bf16 %v7924_v17  ;;  %v8144_v12 = vld [vmem:[#allocation2 + $0x950] sm:$0xff]  }
  0xcc   :  { %v3075_v32 = vmul.f32 0.125, %v2947_v23  ;;  %v1730_v33 = vadd.f32 %v6550_v10, %v1345_v24  ;;  %v5786_v36 = vunpack.c.h.bf16 %v7924_v17  ;;  %v6041_v37 = vunpack.c.l.bf16 %v7987_v22  ;;  %v8207_v17 = vld [vmem:[#allocation2 + $0xb50] sm:$0xff]  }
  0xcd   :  { %v2114_v34 = vadd.f32 %v6805_v11, %v1729_v29  ;;  %v576_v35 = vadd.f32 %v5785_v31, %v5529_v26  ;;  %v6042_v39 = vunpack.c.h.bf16 %v7987_v22  ;;  %v6297_v40 = vunpack.c.l.bf16 %v8050_v27  ;;  %v8270_v22 = vld [vmem:[#allocation2 + $0xd50] sm:$0xff]  }
  0xce   :  { %v3161_v42 = vpack.c.bf16 %v3075_v32, %v3074_v28  ;;  %v2115_v43 = vadd.f32 %v6806_v15, %v1730_v33  ;;  %v577_v44 = vadd.f32 %v5786_v36, %v5530_v30  ;;  %v6298_v45 = vunpack.c.h.bf16 %v8050_v27  ;;  %v8333_v27 = vld [vmem:[#allocation2 + $0xf50] sm:$0xff]   ;;  %v7893_v32 = vld [vmem:[#allocation2 + $0x158] sm:$0xff]  }
  0xcf   :  { %v2499_v47 = vadd.f32 %v7061_v16, %v2114_v34  ;;  %v961_v48 = vadd.f32 %v6041_v37, %v576_v35  ;;  %v6553_v49 = vunpack.c.l.bf16 %v8113_v38  ;;  %v6554_v50 = vunpack.c.h.bf16 %v8113_v38  ;;  %v7956_v34 = vld [vmem:[#allocation2 + $0x358] sm:$0xff]  }
  0xd0   :  { %8587 = vmatmul.mubr.bf16.gmra.mxu1 %v3161_v42  ;;  %v2500_v52 = vadd.f32 %v7062_v20, %v2115_v43  ;;  %v962_v53 = vadd.f32 %v6042_v39, %v577_v44  ;;  %v6809_v54 = vunpack.c.l.bf16 %v8176_v41  ;;  %v6810_v55 = vunpack.c.h.bf16 %v8176_v41  ;;  %v8019_v42 = vld [vmem:[#allocation2 + $0x558] sm:$0xff]  }
  0xd1   :  { %v2884_v57 = vadd.f32 %v7317_v21, %v2499_v47  ;;  %v1346_v58 = vadd.f32 %v6297_v40, %v961_v48  ;;  %v7065_v59 = vunpack.c.l.bf16 %v8239_v46  ;;  %v7066_v60 = vunpack.c.h.bf16 %v8239_v46  ;;  %v8082_v43 = vld [vmem:[#allocation2 + $0x758] sm:$0xff]  }
  0xd2   :  { %v2885_v62 = vadd.f32 %v7318_v25, %v2500_v52  ;;  %v1347_v63 = vadd.f32 %v6298_v45, %v962_v53  ;;  %v7321_v0 = vunpack.c.l.bf16 %v8302_v51  ;;  %v7322_v1 = vunpack.c.h.bf16 %v8302_v51  ;;  %v8145_v52 = vld [vmem:[#allocation2 + $0x958] sm:$0xff]  }
  0xd3   :  { %v3012_v4 = vmul.f32 0.125, %v2884_v57  ;;  %v1731_v5 = vadd.f32 %v6553_v49, %v1346_v58  ;;  %v5653_v6 = vunpack.c.l.bf16 %v7892_v56  ;;  %v5654_v7 = vunpack.c.h.bf16 %v7892_v56  ;;  %v8208_v57 = vld [vmem:[#allocation2 + $0xb58] sm:$0xff]  }
  0xd4   :  { %v3013_v8 = vmul.f32 0.125, %v2885_v62  ;;  %v1732_v9 = vadd.f32 %v6554_v50, %v1347_v63  ;;  %v5909_v10 = vunpack.c.l.bf16 %v7955_v61  ;;  %v5910_v11 = vunpack.c.h.bf16 %v7955_v61  ;;  %v8271_v62 = vld [vmem:[#allocation2 + $0xd58] sm:$0xff]  }
  0xd5   :  { %v2116_v13 = vadd.f32 %v6809_v54, %v1731_v5  ;;  %v6165_v14 = vunpack.c.l.bf16 %v8018_v2  ;;  %v6166_v15 = vunpack.c.h.bf16 %v8018_v2  ;;  %v6421_v16 = vunpack.c.l.bf16 %v8081_v3 }
  0xd6   :  { %v3130_v18 = vpack.c.bf16 %v3013_v8, %v3012_v4  ;;  %v2117_v19 = vadd.f32 %v6810_v55, %v1732_v9  ;;  %v638_v20 = vadd.f32 %v5909_v10, %v5653_v6  ;;  %v639_v21 = vadd.f32 %v5910_v11, %v5654_v7  ;;  %v7862_v8 = vld [vmem:[#allocation2 + $0x60] sm:$0xff]  }
  0xd7   :  { %v2501_v23 = vadd.f32 %v7065_v59, %v2116_v13  ;;  %v6422_v24 = vunpack.c.h.bf16 %v8081_v3  ;;  %v6677_v25 = vunpack.c.l.bf16 %v8144_v12  ;;  %v6678_v26 = vunpack.c.h.bf16 %v8144_v12  ;;  %v8334_v3 = vld [vmem:[#allocation2 + $0xf58] sm:$0xff]   ;;  %v7925_v13 = vld [vmem:[#allocation2 + $0x260] sm:$0xff]  }
  0xd8   :  { %8526 = vmatprep.mubr.bf16.mxu0 %v3130_v18  ;;  %v2502_v28 = vadd.f32 %v7066_v60, %v2117_v19  ;;  %v1023_v29 = vadd.f32 %v6165_v14, %v638_v20  ;;  %v1024_v30 = vadd.f32 %v6166_v15, %v639_v21  ;;  %v6933_v31 = vunpack.c.l.bf16 %v8207_v17  ;;  %v7988_v18 = vld [vmem:[#allocation2 + $0x460] sm:$0xff]  }
  0xd9   :  { %v2886_v33 = vadd.f32 %v7321_v0, %v2501_v23  ;;  %v6934_v36 = vunpack.c.h.bf16 %v8207_v17  ;;  %v7189_v37 = vunpack.c.l.bf16 %v8270_v22  ;;  %v7190_v38 = vunpack.c.h.bf16 %v8270_v22  ;;  %v8051_v23 = vld [vmem:[#allocation2 + $0x660] sm:$0xff]  }
  0xda   :  { %v2887_v35 = vadd.f32 %v7322_v1, %v2502_v28  ;;  %v1408_v39 = vadd.f32 %v6421_v16, %v1023_v29  ;;  %v1409_v40 = vadd.f32 %v6422_v24, %v1024_v30  ;;  %v7445_v41 = vunpack.c.l.bf16 %v8333_v27  ;;  %v8114_v28 = vld [vmem:[#allocation2 + $0x860] sm:$0xff]  }
  0xdb   :  { %v3014_v44 = vmul.f32 0.125, %v2886_v33  ;;  %v7446_v45 = vunpack.c.h.bf16 %v8333_v27  ;;  %v5657_v46 = vunpack.c.l.bf16 %v7893_v32  ;;  %v5658_v47 = vunpack.c.h.bf16 %v7893_v32  ;;  %v8177_v33 = vld [vmem:[#allocation2 + $0xa60] sm:$0xff]  }
  0xdc   :  { %v3015_v48 = vmul.f32 0.125, %v2887_v35  ;;  %v1793_v49 = vadd.f32 %v6677_v25, %v1408_v39  ;;  %v1794_v50 = vadd.f32 %v6678_v26, %v1409_v40  ;;  %v5913_v51 = vunpack.c.l.bf16 %v7956_v34  ;;  %v8240_v35 = vld [vmem:[#allocation2 + $0xc60] sm:$0xff]  }
  0xdd   :  { %v5914_v53 = vunpack.c.h.bf16 %v7956_v34  ;;  %v6169_v54 = vunpack.c.l.bf16 %v8019_v42  ;;  %v6170_v55 = vunpack.c.h.bf16 %v8019_v42  ;;  %v6425_v56 = vunpack.c.l.bf16 %v8082_v43 }
  0xde   :  { %v3131_v58 = vpack.c.bf16 %v3015_v48, %v3014_v44  ;;  %v2178_v59 = vadd.f32 %v6933_v31, %v1793_v49  ;;  %v2179_v60 = vadd.f32 %v6934_v36, %v1794_v50  ;;  %v640_v61 = vadd.f32 %v5913_v51, %v5657_v46  ;;  %v7863_v48 = vld [vmem:[#allocation2 + $0x68] sm:$0xff]  }
  0xdf   :  { %v641_v63 = vadd.f32 %v5914_v53, %v5658_v47  ;;  %v6426_v0 = vunpack.c.h.bf16 %v8082_v43  ;;  %v6681_v1 = vunpack.c.l.bf16 %v8145_v52  ;;  %v6682_v2 = vunpack.c.h.bf16 %v8145_v52  ;;  %v8303_v43 = vld [vmem:[#allocation2 + $0xe60] sm:$0xff]   ;;  %v7926_v53 = vld [vmem:[#allocation2 + $0x268] sm:$0xff]  }
  0xe0   :  { %8527 = vmatmul.mubr.bf16.gmra.mxu0 %v3131_v58  ;;  %v2563_v4 = vadd.f32 %v7189_v37, %v2178_v59  ;;  %v2564_v5 = vadd.f32 %v7190_v38, %v2179_v60  ;;  %v1025_v6 = vadd.f32 %v6169_v54, %v640_v61  ;;  %v6937_v7 = vunpack.c.l.bf16 %v8208_v57  ;;  %v7989_v58 = vld [vmem:[#allocation2 + $0x468] sm:$0xff]  }
  0xe1   :  { %v1026_v9 = vadd.f32 %v6170_v55, %v641_v63  ;;  %v6938_v10 = vunpack.c.h.bf16 %v8208_v57  ;;  %v7193_v11 = vunpack.c.l.bf16 %v8271_v62  ;;  %v7194_v12 = vunpack.c.h.bf16 %v8271_v62  ;;  %v8052_v63 = vld [vmem:[#allocation2 + $0x668] sm:$0xff]  }
  0xe2   :  { %v2948_v14 = vadd.f32 %v7445_v41, %v2563_v4  ;;  %v2949_v15 = vadd.f32 %v7446_v45, %v2564_v5  ;;  %v1410_v16 = vadd.f32 %v6425_v56, %v1025_v6  ;;  %v7449_v17 = vunpack.c.l.bf16 %v8334_v3 }
  0xe3   :  { %v1411_v19 = vadd.f32 %v6426_v0, %v1026_v9  ;;  %v7450_v20 = vunpack.c.h.bf16 %v8334_v3  ;;  %v5533_v21 = vunpack.c.l.bf16 %v7862_v8  ;;  %v5534_v22 = vunpack.c.h.bf16 %v7862_v8  ;;  %v8115_v8 = vld [vmem:[#allocation2 + $0x868] sm:$0xff]  }
  0xe4   :  { %v3076_v24 = vmul.f32 0.125, %v2948_v14  ;;  %v3077_v25 = vmul.f32 0.125, %v2949_v15  ;;  %v1795_v26 = vadd.f32 %v6681_v1, %v1410_v16  ;;  %v5789_v27 = vunpack.c.l.bf16 %v7925_v13 }
  0xe5   :  { %v1796_v29 = vadd.f32 %v6682_v2, %v1411_v19  ;;  %v5790_v30 = vunpack.c.h.bf16 %v7925_v13  ;;  %v6045_v31 = vunpack.c.l.bf16 %v7988_v18  ;;  %v6046_v32 = vunpack.c.h.bf16 %v7988_v18  ;;  %v8178_v13 = vld [vmem:[#allocation2 + $0xa68] sm:$0xff]  }
  0xe6   :  { %v3162_v36 = vpack.c.bf16 %v3077_v25, %v3076_v24  ;;  %v2180_v37 = vadd.f32 %v6937_v7, %v1795_v26  ;;  %v578_v38 = vadd.f32 %v5789_v27, %v5533_v21  ;;  %v6301_v34 = vunpack.c.l.bf16 %v8051_v23  ;;  %v8241_v18 = vld [vmem:[#allocation2 + $0xc68] sm:$0xff]  }
  0xe7   :  { %v2181_v39 = vadd.f32 %v6938_v10, %v1796_v29  ;;  %v579_v40 = vadd.f32 %v5790_v30, %v5534_v22  ;;  %v6302_v41 = vunpack.c.h.bf16 %v8051_v23  ;;  %v6557_v42 = vunpack.c.l.bf16 %v8114_v28  ;;  %v8304_v23 = vld [vmem:[#allocation2 + $0xe68] sm:$0xff]  }
  0xe8   :  { %8590 = vmatprep.mubr.bf16.mxu1 %v3162_v36  ;;  %v2565_v44 = vadd.f32 %v7193_v11, %v2180_v37  ;;  %v963_v45 = vadd.f32 %v6045_v31, %v578_v38  ;;  %v6558_v46 = vunpack.c.h.bf16 %v8114_v28  ;;  %v6813_v47 = vunpack.c.l.bf16 %v8177_v33  ;;  %v7894_v28 = vld [vmem:[#allocation2 + $0x160] sm:$0xff]  }
  0xe9   :  { %v2566_v49 = vadd.f32 %v7194_v12, %v2181_v39  ;;  %v964_v50 = vadd.f32 %v6046_v32, %v579_v40  ;;  %v6814_v51 = vunpack.c.h.bf16 %v8177_v33  ;;  %v7069_v52 = vunpack.c.l.bf16 %v8240_v35  ;;  %v7957_v33 = vld [vmem:[#allocation2 + $0x360] sm:$0xff]  }
  0xea   :  { %v2950_v54 = vadd.f32 %v7449_v17, %v2565_v44  ;;  %v1348_v55 = vadd.f32 %v6301_v34, %v963_v45  ;;  %v7070_v56 = vunpack.c.h.bf16 %v8240_v35  ;;  %v7325_v57 = vunpack.c.l.bf16 %v8303_v43  ;;  %v8020_v35 = vld [vmem:[#allocation2 + $0x560] sm:$0xff]  }
  0xeb   :  { %v2951_v59 = vadd.f32 %v7450_v20, %v2566_v49  ;;  %v1349_v60 = vadd.f32 %v6302_v41, %v964_v50  ;;  %v7326_v61 = vunpack.c.h.bf16 %v8303_v43  ;;  %v5537_v62 = vunpack.c.l.bf16 %v7863_v48  ;;  %v8083_v39 = vld [vmem:[#allocation2 + $0x760] sm:$0xff]  }
  0xec   :  { %v3078_v0 = vmul.f32 0.125, %v2950_v54  ;;  %v1733_v1 = vadd.f32 %v6557_v42, %v1348_v55  ;;  %v5538_v2 = vunpack.c.h.bf16 %v7863_v48  ;;  %v5793_v3 = vunpack.c.l.bf16 %v7926_v53  ;;  %v8146_v48 = vld [vmem:[#allocation2 + $0x960] sm:$0xff]  }
  0xed   :  { %v3079_v4 = vmul.f32 0.125, %v2951_v59  ;;  %v1734_v5 = vadd.f32 %v6558_v46, %v1349_v60  ;;  %v5794_v6 = vunpack.c.h.bf16 %v7926_v53  ;;  %v6049_v7 = vunpack.c.l.bf16 %v7989_v58  ;;  %v8209_v53 = vld [vmem:[#allocation2 + $0xb60] sm:$0xff]  }
  0xee   :  { %v2118_v9 = vadd.f32 %v6813_v47, %v1733_v1  ;;  %v580_v10 = vadd.f32 %v5793_v3, %v5537_v62  ;;  %v6050_v11 = vunpack.c.h.bf16 %v7989_v58  ;;  %v6305_v12 = vunpack.c.l.bf16 %v8052_v63  ;;  %v8272_v58 = vld [vmem:[#allocation2 + $0xd60] sm:$0xff]  }
  0xef   :  { %v3163_v14 = vpack.c.bf16 %v3079_v4, %v3078_v0  ;;  %v2119_v15 = vadd.f32 %v6814_v51, %v1734_v5  ;;  %v581_v16 = vadd.f32 %v5794_v6, %v5538_v2  ;;  %v6306_v17 = vunpack.c.h.bf16 %v8052_v63  ;;  %v8335_v63 = vld [vmem:[#allocation2 + $0xf60] sm:$0xff]   ;;  %v7895_v4 = vld [vmem:[#allocation2 + $0x168] sm:$0xff]  }
  0xf0   :  { %v2503_v19 = vadd.f32 %v7069_v52, %v2118_v9  ;;  %v965_v20 = vadd.f32 %v6049_v7, %v580_v10  ;;  %v6561_v21 = vunpack.c.l.bf16 %v8115_v8  ;;  %v6562_v22 = vunpack.c.h.bf16 %v8115_v8  ;;  %v7958_v9 = vld [vmem:[#allocation2 + $0x368] sm:$0xff]  }
  0xf1   :  { %8591 = vmatmul.mubr.bf16.gmra.mxu1 %v3163_v14  ;;  %v2504_v24 = vadd.f32 %v7070_v56, %v2119_v15  ;;  %v966_v25 = vadd.f32 %v6050_v11, %v581_v16  ;;  %v6817_v26 = vunpack.c.l.bf16 %v8178_v13  ;;  %v6818_v27 = vunpack.c.h.bf16 %v8178_v13  ;;  %v8021_v14 = vld [vmem:[#allocation2 + $0x568] sm:$0xff]  }
  0xf2   :  { %v2888_v29 = vadd.f32 %v7325_v57, %v2503_v19  ;;  %v1350_v30 = vadd.f32 %v6305_v12, %v965_v20  ;;  %v7073_v31 = vunpack.c.l.bf16 %v8241_v18  ;;  %v7074_v32 = vunpack.c.h.bf16 %v8241_v18  ;;  %v8084_v15 = vld [vmem:[#allocation2 + $0x768] sm:$0xff]  }
  0xf3   :  { %v2889_v36 = vadd.f32 %v7326_v61, %v2504_v24  ;;  %v1351_v37 = vadd.f32 %v6306_v17, %v966_v25  ;;  %v7329_v38 = vunpack.c.l.bf16 %v8304_v23  ;;  %v7330_v34 = vunpack.c.h.bf16 %v8304_v23  ;;  %v8147_v24 = vld [vmem:[#allocation2 + $0x968] sm:$0xff]  }
  0xf4   :  { %v3016_v40 = vmul.f32 0.125, %v2888_v29  ;;  %v1735_v41 = vadd.f32 %v6561_v21, %v1350_v30  ;;  %v5661_v42 = vunpack.c.l.bf16 %v7894_v28  ;;  %v5662_v43 = vunpack.c.h.bf16 %v7894_v28  ;;  %v8210_v29 = vld [vmem:[#allocation2 + $0xb68] sm:$0xff]  }
  0xf5   :  { %v3017_v44 = vmul.f32 0.125, %v2889_v36  ;;  %v1736_v45 = vadd.f32 %v6562_v22, %v1351_v37  ;;  %v5917_v46 = vunpack.c.l.bf16 %v7957_v33  ;;  %v5918_v47 = vunpack.c.h.bf16 %v7957_v33  ;;  %v8273_v36 = vld [vmem:[#allocation2 + $0xd68] sm:$0xff]  }
  0xf6   :  { %v2120_v49 = vadd.f32 %v6817_v26, %v1735_v41  ;;  %v6173_v50 = vunpack.c.l.bf16 %v8020_v35  ;;  %v6174_v51 = vunpack.c.h.bf16 %v8020_v35  ;;  %v6429_v52 = vunpack.c.l.bf16 %v8083_v39 }
  0xf7   :  { %v3132_v54 = vpack.c.bf16 %v3017_v44, %v3016_v40  ;;  %v2121_v55 = vadd.f32 %v6818_v27, %v1736_v45  ;;  %v642_v56 = vadd.f32 %v5917_v46, %v5661_v42  ;;  %v643_v57 = vadd.f32 %v5918_v47, %v5662_v43  ;;  %v7864_v44 = vld [vmem:[#allocation2 + $0x70] sm:$0xff]  }
  0xf8   :  { %v2505_v59 = vadd.f32 %v7073_v31, %v2120_v49  ;;  %v6430_v60 = vunpack.c.h.bf16 %v8083_v39  ;;  %v6685_v61 = vunpack.c.l.bf16 %v8146_v48  ;;  %v6686_v62 = vunpack.c.h.bf16 %v8146_v48  ;;  %v8336_v39 = vld [vmem:[#allocation2 + $0xf68] sm:$0xff]   ;;  %v7927_v49 = vld [vmem:[#allocation2 + $0x270] sm:$0xff]  }
  0xf9   :  { %8530 = vmatprep.mubr.bf16.mxu0 %v3132_v54  ;;  %v2506_v0 = vadd.f32 %v7074_v32, %v2121_v55  ;;  %v1027_v1 = vadd.f32 %v6173_v50, %v642_v56  ;;  %v1028_v2 = vadd.f32 %v6174_v51, %v643_v57  ;;  %v6941_v3 = vunpack.c.l.bf16 %v8209_v53  ;;  %v7990_v54 = vld [vmem:[#allocation2 + $0x470] sm:$0xff]  }
  0xfa   :  { %v2890_v5 = vadd.f32 %v7329_v38, %v2505_v59  ;;  %v6942_v6 = vunpack.c.h.bf16 %v8209_v53  ;;  %v7197_v7 = vunpack.c.l.bf16 %v8272_v58  ;;  %v7198_v8 = vunpack.c.h.bf16 %v8272_v58  ;;  %v8053_v59 = vld [vmem:[#allocation2 + $0x670] sm:$0xff]  }
  0xfb   :  { %v2891_v10 = vadd.f32 %v7330_v34, %v2506_v0  ;;  %v1412_v11 = vadd.f32 %v6429_v52, %v1027_v1  ;;  %v1413_v12 = vadd.f32 %v6430_v60, %v1028_v2  ;;  %v7453_v13 = vunpack.c.l.bf16 %v8335_v63  ;;  %v8116_v0 = vld [vmem:[#allocation2 + $0x870] sm:$0xff]  }
  0xfc   :  { %v3018_v16 = vmul.f32 0.125, %v2890_v5  ;;  %v7454_v17 = vunpack.c.h.bf16 %v8335_v63  ;;  %v5665_v18 = vunpack.c.l.bf16 %v7895_v4  ;;  %v5666_v19 = vunpack.c.h.bf16 %v7895_v4  ;;  %v8179_v5 = vld [vmem:[#allocation2 + $0xa70] sm:$0xff]  }
  0xfd   :  { %v3019_v20 = vmul.f32 0.125, %v2891_v10  ;;  %v1797_v21 = vadd.f32 %v6685_v61, %v1412_v11  ;;  %v1798_v22 = vadd.f32 %v6686_v62, %v1413_v12  ;;  %v5921_v23 = vunpack.c.l.bf16 %v7958_v9  ;;  %v8242_v10 = vld [vmem:[#allocation2 + $0xc70] sm:$0xff]  }
  0xfe   :  { %v5922_v25 = vunpack.c.h.bf16 %v7958_v9  ;;  %v6177_v26 = vunpack.c.l.bf16 %v8021_v14  ;;  %v6178_v27 = vunpack.c.h.bf16 %v8021_v14  ;;  %v6433_v28 = vunpack.c.l.bf16 %v8084_v15 }
  0xff   :  { %v3133_v30 = vpack.c.bf16 %v3019_v20, %v3018_v16  ;;  %v2182_v31 = vadd.f32 %v6941_v3, %v1797_v21  ;;  %v2183_v32 = vadd.f32 %v6942_v6, %v1798_v22  ;;  %v644_v33 = vadd.f32 %v5921_v23, %v5665_v18  ;;  %v7865_v20 = vld [vmem:[#allocation2 + $0x78] sm:$0xff]  }
 0x100   :  { %v645_v37 = vadd.f32 %v5922_v25, %v5666_v19  ;;  %v6434_v38 = vunpack.c.h.bf16 %v8084_v15  ;;  %v6689_v34 = vunpack.c.l.bf16 %v8147_v24  ;;  %v6690_v35 = vunpack.c.h.bf16 %v8147_v24  ;;  %v8305_v15 = vld [vmem:[#allocation2 + $0xe70] sm:$0xff]   ;;  %v7928_v25 = vld [vmem:[#allocation2 + $0x278] sm:$0xff]  }
 0x101   :  { %8531 = vmatmul.mubr.bf16.gmra.mxu0 %v3133_v30  ;;  %v2567_v40 = vadd.f32 %v7197_v7, %v2182_v31  ;;  %v2568_v41 = vadd.f32 %v7198_v8, %v2183_v32  ;;  %v1029_v42 = vadd.f32 %v6177_v26, %v644_v33  ;;  %v6945_v43 = vunpack.c.l.bf16 %v8210_v29  ;;  %v7991_v30 = vld [vmem:[#allocation2 + $0x478] sm:$0xff]  }
 0x102   :  { %v1030_v45 = vadd.f32 %v6178_v27, %v645_v37  ;;  %v6946_v46 = vunpack.c.h.bf16 %v8210_v29  ;;  %v7201_v47 = vunpack.c.l.bf16 %v8273_v36  ;;  %v7202_v48 = vunpack.c.h.bf16 %v8273_v36  ;;  %v8054_v37 = vld [vmem:[#allocation2 + $0x678] sm:$0xff]  }
 0x103   :  { %v2952_v50 = vadd.f32 %v7453_v13, %v2567_v40  ;;  %v2953_v51 = vadd.f32 %v7454_v17, %v2568_v41  ;;  %v1414_v52 = vadd.f32 %v6433_v28, %v1029_v42  ;;  %v7457_v53 = vunpack.c.l.bf16 %v8336_v39 }
 0x104   :  { %v1415_v55 = vadd.f32 %v6434_v38, %v1030_v45  ;;  %v7458_v56 = vunpack.c.h.bf16 %v8336_v39  ;;  %v5541_v57 = vunpack.c.l.bf16 %v7864_v44  ;;  %v5542_v58 = vunpack.c.h.bf16 %v7864_v44  ;;  %v8117_v44 = vld [vmem:[#allocation2 + $0x878] sm:$0xff]  }
 0x105   :  { %v3080_v60 = vmul.f32 0.125, %v2952_v50  ;;  %v3081_v61 = vmul.f32 0.125, %v2953_v51  ;;  %v1799_v62 = vadd.f32 %v6689_v34, %v1414_v52  ;;  %v5797_v63 = vunpack.c.l.bf16 %v7927_v49 }
 0x106   :  { %v1800_v1 = vadd.f32 %v6690_v35, %v1415_v55  ;;  %v5798_v2 = vunpack.c.h.bf16 %v7927_v49  ;;  %v6053_v3 = vunpack.c.l.bf16 %v7990_v54  ;;  %v6054_v4 = vunpack.c.h.bf16 %v7990_v54  ;;  %v8180_v49 = vld [vmem:[#allocation2 + $0xa78] sm:$0xff]  }
 0x107   :  { %v3164_v6 = vpack.c.bf16 %v3081_v61, %v3080_v60  ;;  %v2184_v7 = vadd.f32 %v6945_v43, %v1799_v62  ;;  %v582_v8 = vadd.f32 %v5797_v63, %v5541_v57  ;;  %v6309_v9 = vunpack.c.l.bf16 %v8053_v59  ;;  %v8243_v54 = vld [vmem:[#allocation2 + $0xc78] sm:$0xff]  }
 0x108   :  { %v2185_v11 = vadd.f32 %v6946_v46, %v1800_v1  ;;  %v583_v12 = vadd.f32 %v5798_v2, %v5542_v58  ;;  %v6310_v13 = vunpack.c.h.bf16 %v8053_v59  ;;  %v6565_v14 = vunpack.c.l.bf16 %v8116_v0  ;;  %v8306_v59 = vld [vmem:[#allocation2 + $0xe78] sm:$0xff]  }
 0x109   :  { %8594 = vmatprep.mubr.bf16.mxu1 %v3164_v6  ;;  %v2569_v16 = vadd.f32 %v7201_v47, %v2184_v7  ;;  %v967_v17 = vadd.f32 %v6053_v3, %v582_v8  ;;  %v6566_v18 = vunpack.c.h.bf16 %v8116_v0  ;;  %v6821_v19 = vunpack.c.l.bf16 %v8179_v5  ;;  %v7896_v0 = vld [vmem:[#allocation2 + $0x170] sm:$0xff]  }
 0x10a   :  { %v2570_v21 = vadd.f32 %v7202_v48, %v2185_v11  ;;  %v968_v22 = vadd.f32 %v6054_v4, %v583_v12  ;;  %v6822_v23 = vunpack.c.h.bf16 %v8179_v5  ;;  %v7077_v24 = vunpack.c.l.bf16 %v8242_v10  ;;  %v7959_v5 = vld [vmem:[#allocation2 + $0x370] sm:$0xff]  }
 0x10b   :  { %v2954_v26 = vadd.f32 %v7457_v53, %v2569_v16  ;;  %v1352_v27 = vadd.f32 %v6309_v9, %v967_v17  ;;  %v7078_v28 = vunpack.c.h.bf16 %v8242_v10  ;;  %v7333_v29 = vunpack.c.l.bf16 %v8305_v15  ;;  %v8022_v10 = vld [vmem:[#allocation2 + $0x570] sm:$0xff]  }
 0x10c   :  { %v2955_v31 = vadd.f32 %v7458_v56, %v2570_v21  ;;  %v1353_v32 = vadd.f32 %v6310_v13, %v968_v22  ;;  %v7334_v33 = vunpack.c.h.bf16 %v8305_v15  ;;  %v5545_v36 = vunpack.c.l.bf16 %v7865_v20  ;;  %v8085_v11 = vld [vmem:[#allocation2 + $0x770] sm:$0xff]  }
 0x10d   :  { %v3082_v38 = vmul.f32 0.125, %v2954_v26  ;;  %v1737_v34 = vadd.f32 %v6565_v14, %v1352_v27  ;;  %v5546_v35 = vunpack.c.h.bf16 %v7865_v20  ;;  %v5801_v39 = vunpack.c.l.bf16 %v7928_v25  ;;  %v8148_v20 = vld [vmem:[#allocation2 + $0x970] sm:$0xff]  }
 0x10e   :  { %v3083_v40 = vmul.f32 0.125, %v2955_v31  ;;  %v1738_v41 = vadd.f32 %v6566_v18, %v1353_v32  ;;  %v5802_v42 = vunpack.c.h.bf16 %v7928_v25  ;;  %v6057_v43 = vunpack.c.l.bf16 %v7991_v30  ;;  %v8211_v25 = vld [vmem:[#allocation2 + $0xb70] sm:$0xff]  }
 0x10f   :  { %v2122_v45 = vadd.f32 %v6821_v19, %v1737_v34  ;;  %v584_v46 = vadd.f32 %v5801_v39, %v5545_v36  ;;  %v6058_v47 = vunpack.c.h.bf16 %v7991_v30  ;;  %v6313_v48 = vunpack.c.l.bf16 %v8054_v37  ;;  %v8274_v30 = vld [vmem:[#allocation2 + $0xd70] sm:$0xff]  }
 0x110   :  { %v3165_v50 = vpack.c.bf16 %v3083_v40, %v3082_v38  ;;  %v2123_v51 = vadd.f32 %v6822_v23, %v1738_v41  ;;  %v585_v52 = vadd.f32 %v5802_v42, %v5546_v35  ;;  %v6314_v53 = vunpack.c.h.bf16 %v8054_v37  ;;  %v8337_v37 = vld [vmem:[#allocation2 + $0xf70] sm:$0xff]   ;;  %v7897_v40 = vld [vmem:[#allocation2 + $0x178] sm:$0xff]  }
 0x111   :  { %v2507_v55 = vadd.f32 %v7077_v24, %v2122_v45  ;;  %v969_v56 = vadd.f32 %v6057_v43, %v584_v46  ;;  %v6569_v57 = vunpack.c.l.bf16 %v8117_v44  ;;  %v6570_v58 = vunpack.c.h.bf16 %v8117_v44  ;;  %v7960_v45 = vld [vmem:[#allocation2 + $0x378] sm:$0xff]  }
 0x112   :  { %8595 = vmatmul.mubr.bf16.gmra.mxu1 %v3165_v50  ;;  %v2508_v60 = vadd.f32 %v7078_v28, %v2123_v51  ;;  %v970_v61 = vadd.f32 %v6058_v47, %v585_v52  ;;  %v6825_v62 = vunpack.c.l.bf16 %v8180_v49  ;;  %v6826_v63 = vunpack.c.h.bf16 %v8180_v49  ;;  %v8023_v50 = vld [vmem:[#allocation2 + $0x578] sm:$0xff]  }
 0x113   :  { %v2892_v1 = vadd.f32 %v7333_v29, %v2507_v55  ;;  %v1354_v2 = vadd.f32 %v6313_v48, %v969_v56  ;;  %v7081_v3 = vunpack.c.l.bf16 %v8243_v54  ;;  %v7082_v4 = vunpack.c.h.bf16 %v8243_v54  ;;  %v8086_v51 = vld [vmem:[#allocation2 + $0x778] sm:$0xff]  }
 0x114   :  { %v2893_v6 = vadd.f32 %v7334_v33, %v2508_v60  ;;  %v1355_v7 = vadd.f32 %v6314_v53, %v970_v61  ;;  %v7337_v8 = vunpack.c.l.bf16 %v8306_v59  ;;  %v7338_v9 = vunpack.c.h.bf16 %v8306_v59  ;;  %v8149_v60 = vld [vmem:[#allocation2 + $0x978] sm:$0xff]  }
 0x115   :  { %v3020_v12 = vmul.f32 0.125, %v2892_v1  ;;  %v1739_v13 = vadd.f32 %v6569_v57, %v1354_v2  ;;  %v5669_v14 = vunpack.c.l.bf16 %v7896_v0  ;;  %v5670_v15 = vunpack.c.h.bf16 %v7896_v0  ;;  %v8212_v1 = vld [vmem:[#allocation2 + $0xb78] sm:$0xff]  }
 0x116   :  { %v3021_v16 = vmul.f32 0.125, %v2893_v6  ;;  %v1740_v17 = vadd.f32 %v6570_v58, %v1355_v7  ;;  %v5925_v18 = vunpack.c.l.bf16 %v7959_v5  ;;  %v5926_v19 = vunpack.c.h.bf16 %v7959_v5  ;;  %v8275_v6 = vld [vmem:[#allocation2 + $0xd78] sm:$0xff]  }
 0x117   :  { %v2124_v21 = vadd.f32 %v6825_v62, %v1739_v13  ;;  %v6181_v22 = vunpack.c.l.bf16 %v8022_v10  ;;  %v6182_v23 = vunpack.c.h.bf16 %v8022_v10  ;;  %v6437_v24 = vunpack.c.l.bf16 %v8085_v11 }
 0x118   :  { %v3134_v26 = vpack.c.bf16 %v3021_v16, %v3020_v12  ;;  %v2125_v27 = vadd.f32 %v6826_v63, %v1740_v17  ;;  %v646_v28 = vadd.f32 %v5925_v18, %v5669_v14  ;;  %v647_v29 = vadd.f32 %v5926_v19, %v5670_v15  ;;  %v7866_v16 = vld [vmem:[#allocation2 + $0x80] sm:$0xff]  }
 0x119   :  { %v2509_v31 = vadd.f32 %v7081_v3, %v2124_v21  ;;  %v6438_v32 = vunpack.c.h.bf16 %v8085_v11  ;;  %v6693_v33 = vunpack.c.l.bf16 %v8148_v20  ;;  %v6694_v36 = vunpack.c.h.bf16 %v8148_v20  ;;  %v8338_v11 = vld [vmem:[#allocation2 + $0xf78] sm:$0xff]   ;;  %v7929_v21 = vld [vmem:[#allocation2 + $0x280] sm:$0xff]  }
 0x11a   :  { %8534 = vmatprep.mubr.bf16.mxu0 %v3134_v26  ;;  %v2510_v38 = vadd.f32 %v7082_v4, %v2125_v27  ;;  %v1031_v34 = vadd.f32 %v6181_v22, %v646_v28  ;;  %v1032_v35 = vadd.f32 %v6182_v23, %v647_v29  ;;  %v6949_v39 = vunpack.c.l.bf16 %v8211_v25  ;;  %v7992_v26 = vld [vmem:[#allocation2 + $0x480] sm:$0xff]  }
 0x11b   :  { %v2894_v41 = vadd.f32 %v7337_v8, %v2509_v31  ;;  %v6950_v42 = vunpack.c.h.bf16 %v8211_v25  ;;  %v7205_v43 = vunpack.c.l.bf16 %v8274_v30  ;;  %v7206_v44 = vunpack.c.h.bf16 %v8274_v30  ;;  %v8055_v31 = vld [vmem:[#allocation2 + $0x680] sm:$0xff]  }
 0x11c   :  { %v2895_v46 = vadd.f32 %v7338_v9, %v2510_v38  ;;  %v1416_v47 = vadd.f32 %v6437_v24, %v1031_v34  ;;  %v1417_v48 = vadd.f32 %v6438_v32, %v1032_v35  ;;  %v7461_v49 = vunpack.c.l.bf16 %v8337_v37  ;;  %v8118_v38 = vld [vmem:[#allocation2 + $0x880] sm:$0xff]  }
 0x11d   :  { %v3022_v52 = vmul.f32 0.125, %v2894_v41  ;;  %v7462_v53 = vunpack.c.h.bf16 %v8337_v37  ;;  %v5673_v54 = vunpack.c.l.bf16 %v7897_v40  ;;  %v5674_v55 = vunpack.c.h.bf16 %v7897_v40  ;;  %v8181_v41 = vld [vmem:[#allocation2 + $0xa80] sm:$0xff]  }
 0x11e   :  { %v3023_v56 = vmul.f32 0.125, %v2895_v46  ;;  %v1801_v57 = vadd.f32 %v6693_v33, %v1416_v47  ;;  %v1802_v58 = vadd.f32 %v6694_v36, %v1417_v48  ;;  %v5929_v59 = vunpack.c.l.bf16 %v7960_v45  ;;  %v8244_v46 = vld [vmem:[#allocation2 + $0xc80] sm:$0xff]  }
 0x11f   :  { %v5930_v61 = vunpack.c.h.bf16 %v7960_v45  ;;  %v6185_v62 = vunpack.c.l.bf16 %v8023_v50  ;;  %v6186_v63 = vunpack.c.h.bf16 %v8023_v50  ;;  %v6441_v0 = vunpack.c.l.bf16 %v8086_v51 }
 0x120   :  { %v3135_v2 = vpack.c.bf16 %v3023_v56, %v3022_v52  ;;  %v2186_v3 = vadd.f32 %v6949_v39, %v1801_v57  ;;  %v2187_v4 = vadd.f32 %v6950_v42, %v1802_v58  ;;  %v648_v5 = vadd.f32 %v5929_v59, %v5673_v54  ;;  %v7867_v56 = vld [vmem:[#allocation2 + $0x88] sm:$0xff]  }
 0x121   :  { %v649_v7 = vadd.f32 %v5930_v61, %v5674_v55  ;;  %v6442_v8 = vunpack.c.h.bf16 %v8086_v51  ;;  %v6697_v9 = vunpack.c.l.bf16 %v8149_v60  ;;  %v6698_v10 = vunpack.c.h.bf16 %v8149_v60  ;;  %v8307_v51 = vld [vmem:[#allocation2 + $0xe80] sm:$0xff]   ;;  %v7930_v61 = vld [vmem:[#allocation2 + $0x288] sm:$0xff]  }
 0x122   :  { %8535 = vmatmul.mubr.bf16.gmra.mxu0 %v3135_v2  ;;  %v2571_v12 = vadd.f32 %v7205_v43, %v2186_v3  ;;  %v2572_v13 = vadd.f32 %v7206_v44, %v2187_v4  ;;  %v1033_v14 = vadd.f32 %v6185_v62, %v648_v5  ;;  %v6953_v15 = vunpack.c.l.bf16 %v8212_v1  ;;  %v7993_v2 = vld [vmem:[#allocation2 + $0x488] sm:$0xff]  }
 0x123   :  { %v1034_v17 = vadd.f32 %v6186_v63, %v649_v7  ;;  %v6954_v18 = vunpack.c.h.bf16 %v8212_v1  ;;  %v7209_v19 = vunpack.c.l.bf16 %v8275_v6  ;;  %v7210_v20 = vunpack.c.h.bf16 %v8275_v6  ;;  %v8056_v7 = vld [vmem:[#allocation2 + $0x688] sm:$0xff]  }
 0x124   :  { %v2956_v22 = vadd.f32 %v7461_v49, %v2571_v12  ;;  %v2957_v23 = vadd.f32 %v7462_v53, %v2572_v13  ;;  %v1418_v24 = vadd.f32 %v6441_v0, %v1033_v14  ;;  %v7465_v25 = vunpack.c.l.bf16 %v8338_v11 }
 0x125   :  { %v1419_v27 = vadd.f32 %v6442_v8, %v1034_v17  ;;  %v7466_v28 = vunpack.c.h.bf16 %v8338_v11  ;;  %v5549_v29 = vunpack.c.l.bf16 %v7866_v16  ;;  %v5550_v30 = vunpack.c.h.bf16 %v7866_v16  ;;  %v8119_v16 = vld [vmem:[#allocation2 + $0x888] sm:$0xff]  }
 0x126   :  { %v3084_v32 = vmul.f32 0.125, %v2956_v22  ;;  %v3085_v33 = vmul.f32 0.125, %v2957_v23  ;;  %v1803_v36 = vadd.f32 %v6697_v9, %v1418_v24  ;;  %v5805_v37 = vunpack.c.l.bf16 %v7929_v21 }
 0x127   :  { %v1804_v34 = vadd.f32 %v6698_v10, %v1419_v27  ;;  %v5806_v35 = vunpack.c.h.bf16 %v7929_v21  ;;  %v6061_v39 = vunpack.c.l.bf16 %v7992_v26  ;;  %v6062_v40 = vunpack.c.h.bf16 %v7992_v26  ;;  %v8182_v21 = vld [vmem:[#allocation2 + $0xa88] sm:$0xff]  }
 0x128   :  { %v3166_v42 = vpack.c.bf16 %v3085_v33, %v3084_v32  ;;  %v2188_v43 = vadd.f32 %v6953_v15, %v1803_v36  ;;  %v586_v44 = vadd.f32 %v5805_v37, %v5549_v29  ;;  %v6317_v45 = vunpack.c.l.bf16 %v8055_v31  ;;  %v8245_v26 = vld [vmem:[#allocation2 + $0xc88] sm:$0xff]  }
 0x129   :  { %v2189_v47 = vadd.f32 %v6954_v18, %v1804_v34  ;;  %v587_v48 = vadd.f32 %v5806_v35, %v5550_v30  ;;  %v6318_v49 = vunpack.c.h.bf16 %v8055_v31  ;;  %v6573_v50 = vunpack.c.l.bf16 %v8118_v38  ;;  %v8308_v31 = vld [vmem:[#allocation2 + $0xe88] sm:$0xff]  }
 0x12a   :  { %8598 = vmatprep.mubr.bf16.mxu1 %v3166_v42  ;;  %v2573_v52 = vadd.f32 %v7209_v19, %v2188_v43  ;;  %v971_v53 = vadd.f32 %v6061_v39, %v586_v44  ;;  %v6574_v54 = vunpack.c.h.bf16 %v8118_v38  ;;  %v6829_v55 = vunpack.c.l.bf16 %v8181_v41  ;;  %v7898_v38 = vld [vmem:[#allocation2 + $0x180] sm:$0xff]  }
 0x12b   :  { %v2574_v57 = vadd.f32 %v7210_v20, %v2189_v47  ;;  %v972_v58 = vadd.f32 %v6062_v40, %v587_v48  ;;  %v6830_v59 = vunpack.c.h.bf16 %v8181_v41  ;;  %v7085_v60 = vunpack.c.l.bf16 %v8244_v46  ;;  %v7961_v41 = vld [vmem:[#allocation2 + $0x380] sm:$0xff]  }
 0x12c   :  { %v2958_v62 = vadd.f32 %v7465_v25, %v2573_v52  ;;  %v1356_v63 = vadd.f32 %v6317_v45, %v971_v53  ;;  %v7086_v0 = vunpack.c.h.bf16 %v8244_v46  ;;  %v7341_v1 = vunpack.c.l.bf16 %v8307_v51  ;;  %v8024_v46 = vld [vmem:[#allocation2 + $0x580] sm:$0xff]  }
 0x12d   :  { %v2959_v3 = vadd.f32 %v7466_v28, %v2574_v57  ;;  %v1357_v4 = vadd.f32 %v6318_v49, %v972_v58  ;;  %v7342_v5 = vunpack.c.h.bf16 %v8307_v51  ;;  %v5553_v6 = vunpack.c.l.bf16 %v7867_v56  ;;  %v8087_v47 = vld [vmem:[#allocation2 + $0x780] sm:$0xff]  }
 0x12e   :  { %v3086_v8 = vmul.f32 0.125, %v2958_v62  ;;  %v1741_v9 = vadd.f32 %v6573_v50, %v1356_v63  ;;  %v5554_v10 = vunpack.c.h.bf16 %v7867_v56  ;;  %v5809_v11 = vunpack.c.l.bf16 %v7930_v61  ;;  %v8150_v56 = vld [vmem:[#allocation2 + $0x980] sm:$0xff]  }
 0x12f   :  { %v3087_v12 = vmul.f32 0.125, %v2959_v3  ;;  %v1742_v13 = vadd.f32 %v6574_v54, %v1357_v4  ;;  %v5810_v14 = vunpack.c.h.bf16 %v7930_v61  ;;  %v6065_v15 = vunpack.c.l.bf16 %v7993_v2  ;;  %v8213_v61 = vld [vmem:[#allocation2 + $0xb80] sm:$0xff]  }
 0x130   :  { %v2126_v17 = vadd.f32 %v6829_v55, %v1741_v9  ;;  %v588_v18 = vadd.f32 %v5809_v11, %v5553_v6  ;;  %v6066_v19 = vunpack.c.h.bf16 %v7993_v2  ;;  %v6321_v20 = vunpack.c.l.bf16 %v8056_v7  ;;  %v8276_v2 = vld [vmem:[#allocation2 + $0xd80] sm:$0xff]  }
 0x131   :  { %v3167_v22 = vpack.c.bf16 %v3087_v12, %v3086_v8  ;;  %v2127_v23 = vadd.f32 %v6830_v59, %v1742_v13  ;;  %v589_v24 = vadd.f32 %v5810_v14, %v5554_v10  ;;  %v6322_v25 = vunpack.c.h.bf16 %v8056_v7  ;;  %v8339_v7 = vld [vmem:[#allocation2 + $0xf80] sm:$0xff]   ;;  %v7899_v12 = vld [vmem:[#allocation2 + $0x188] sm:$0xff]  }
 0x132   :  { %v2511_v27 = vadd.f32 %v7085_v60, %v2126_v17  ;;  %v973_v28 = vadd.f32 %v6065_v15, %v588_v18  ;;  %v6577_v29 = vunpack.c.l.bf16 %v8119_v16  ;;  %v6578_v30 = vunpack.c.h.bf16 %v8119_v16  ;;  %v7962_v17 = vld [vmem:[#allocation2 + $0x388] sm:$0xff]  }
 0x133   :  { %8599 = vmatmul.mubr.bf16.gmra.mxu1 %v3167_v22  ;;  %v2512_v32 = vadd.f32 %v7086_v0, %v2127_v23  ;;  %v974_v33 = vadd.f32 %v6066_v19, %v589_v24  ;;  %v6833_v36 = vunpack.c.l.bf16 %v8182_v21  ;;  %v6834_v37 = vunpack.c.h.bf16 %v8182_v21  ;;  %v8025_v22 = vld [vmem:[#allocation2 + $0x588] sm:$0xff]  }
 0x134   :  { %v2896_v34 = vadd.f32 %v7341_v1, %v2511_v27  ;;  %v1358_v35 = vadd.f32 %v6321_v20, %v973_v28  ;;  %v7089_v39 = vunpack.c.l.bf16 %v8245_v26  ;;  %v7090_v40 = vunpack.c.h.bf16 %v8245_v26  ;;  %v8088_v23 = vld [vmem:[#allocation2 + $0x788] sm:$0xff]  }
 0x135   :  { %v2897_v42 = vadd.f32 %v7342_v5, %v2512_v32  ;;  %v1359_v43 = vadd.f32 %v6322_v25, %v974_v33  ;;  %v7345_v44 = vunpack.c.l.bf16 %v8308_v31  ;;  %v7346_v45 = vunpack.c.h.bf16 %v8308_v31  ;;  %v8151_v32 = vld [vmem:[#allocation2 + $0x988] sm:$0xff]  }
 0x136   :  { %v3024_v48 = vmul.f32 0.125, %v2896_v34  ;;  %v1743_v49 = vadd.f32 %v6577_v29, %v1358_v35  ;;  %v5677_v50 = vunpack.c.l.bf16 %v7898_v38  ;;  %v5678_v51 = vunpack.c.h.bf16 %v7898_v38  ;;  %v8214_v34 = vld [vmem:[#allocation2 + $0xb88] sm:$0xff]  }
 0x137   :  { %v3025_v52 = vmul.f32 0.125, %v2897_v42  ;;  %v1744_v53 = vadd.f32 %v6578_v30, %v1359_v43  ;;  %v5933_v54 = vunpack.c.l.bf16 %v7961_v41  ;;  %v5934_v55 = vunpack.c.h.bf16 %v7961_v41  ;;  %v8277_v42 = vld [vmem:[#allocation2 + $0xd88] sm:$0xff]  }
 0x138   :  { %v2128_v57 = vadd.f32 %v6833_v36, %v1743_v49  ;;  %v6189_v58 = vunpack.c.l.bf16 %v8024_v46  ;;  %v6190_v59 = vunpack.c.h.bf16 %v8024_v46  ;;  %v6445_v60 = vunpack.c.l.bf16 %v8087_v47 }
 0x139   :  { %v3136_v62 = vpack.c.bf16 %v3025_v52, %v3024_v48  ;;  %v2129_v63 = vadd.f32 %v6834_v37, %v1744_v53  ;;  %v650_v0 = vadd.f32 %v5933_v54, %v5677_v50  ;;  %v651_v1 = vadd.f32 %v5934_v55, %v5678_v51  ;;  %v7868_v52 = vld [vmem:[#allocation2 + $0x90] sm:$0xff]  }
 0x13a   :  { %v2513_v3 = vadd.f32 %v7089_v39, %v2128_v57  ;;  %v6446_v4 = vunpack.c.h.bf16 %v8087_v47  ;;  %v6701_v5 = vunpack.c.l.bf16 %v8150_v56  ;;  %v6702_v6 = vunpack.c.h.bf16 %v8150_v56  ;;  %v8340_v47 = vld [vmem:[#allocation2 + $0xf88] sm:$0xff]   ;;  %v7931_v57 = vld [vmem:[#allocation2 + $0x290] sm:$0xff]  }
 0x13b   :  { %8538 = vmatprep.mubr.bf16.mxu0 %v3136_v62  ;;  %v2514_v8 = vadd.f32 %v7090_v40, %v2129_v63  ;;  %v1035_v9 = vadd.f32 %v6189_v58, %v650_v0  ;;  %v1036_v10 = vadd.f32 %v6190_v59, %v651_v1  ;;  %v6957_v11 = vunpack.c.l.bf16 %v8213_v61  ;;  %v7994_v62 = vld [vmem:[#allocation2 + $0x490] sm:$0xff]  }
 0x13c   :  { %v2898_v13 = vadd.f32 %v7345_v44, %v2513_v3  ;;  %v6958_v14 = vunpack.c.h.bf16 %v8213_v61  ;;  %v7213_v15 = vunpack.c.l.bf16 %v8276_v2  ;;  %v7214_v16 = vunpack.c.h.bf16 %v8276_v2  ;;  %v8057_v3 = vld [vmem:[#allocation2 + $0x690] sm:$0xff]  }
 0x13d   :  { %v2899_v18 = vadd.f32 %v7346_v45, %v2514_v8  ;;  %v1420_v19 = vadd.f32 %v6445_v60, %v1035_v9  ;;  %v1421_v20 = vadd.f32 %v6446_v4, %v1036_v10  ;;  %v7469_v21 = vunpack.c.l.bf16 %v8339_v7  ;;  %v8120_v8 = vld [vmem:[#allocation2 + $0x890] sm:$0xff]  }
 0x13e   :  { %v3026_v24 = vmul.f32 0.125, %v2898_v13  ;;  %v7470_v25 = vunpack.c.h.bf16 %v8339_v7  ;;  %v5681_v26 = vunpack.c.l.bf16 %v7899_v12  ;;  %v5682_v27 = vunpack.c.h.bf16 %v7899_v12  ;;  %v8183_v13 = vld [vmem:[#allocation2 + $0xa90] sm:$0xff]  }
 0x13f   :  { %v3027_v28 = vmul.f32 0.125, %v2899_v18  ;;  %v1805_v29 = vadd.f32 %v6701_v5, %v1420_v19  ;;  %v1806_v30 = vadd.f32 %v6702_v6, %v1421_v20  ;;  %v5937_v31 = vunpack.c.l.bf16 %v7962_v17  ;;  %v8246_v18 = vld [vmem:[#allocation2 + $0xc90] sm:$0xff]  }
 0x140   :  { %v5938_v33 = vunpack.c.h.bf16 %v7962_v17  ;;  %v6193_v36 = vunpack.c.l.bf16 %v8025_v22  ;;  %v6194_v37 = vunpack.c.h.bf16 %v8025_v22  ;;  %v6449_v38 = vunpack.c.l.bf16 %v8088_v23 }
 0x141   :  { %v3137_v35 = vpack.c.bf16 %v3027_v28, %v3026_v24  ;;  %v2190_v39 = vadd.f32 %v6957_v11, %v1805_v29  ;;  %v2191_v40 = vadd.f32 %v6958_v14, %v1806_v30  ;;  %v652_v41 = vadd.f32 %v5937_v31, %v5681_v26  ;;  %v7869_v28 = vld [vmem:[#allocation2 + $0x98] sm:$0xff]  }
 0x142   :  { %v653_v43 = vadd.f32 %v5938_v33, %v5682_v27  ;;  %v6450_v44 = vunpack.c.h.bf16 %v8088_v23  ;;  %v6705_v45 = vunpack.c.l.bf16 %v8151_v32  ;;  %v6706_v46 = vunpack.c.h.bf16 %v8151_v32  ;;  %v8309_v23 = vld [vmem:[#allocation2 + $0xe90] sm:$0xff]   ;;  %v7932_v33 = vld [vmem:[#allocation2 + $0x298] sm:$0xff]  }
 0x143   :  { %8539 = vmatmul.mubr.bf16.gmra.mxu0 %v3137_v35  ;;  %v2575_v48 = vadd.f32 %v7213_v15, %v2190_v39  ;;  %v2576_v49 = vadd.f32 %v7214_v16, %v2191_v40  ;;  %v1037_v50 = vadd.f32 %v6193_v36, %v652_v41  ;;  %v6961_v51 = vunpack.c.l.bf16 %v8214_v34  ;;  %v7995_v35 = vld [vmem:[#allocation2 + $0x498] sm:$0xff]  }
 0x144   :  { %v1038_v53 = vadd.f32 %v6194_v37, %v653_v43  ;;  %v6962_v54 = vunpack.c.h.bf16 %v8214_v34  ;;  %v7217_v55 = vunpack.c.l.bf16 %v8277_v42  ;;  %v7218_v56 = vunpack.c.h.bf16 %v8277_v42  ;;  %v8058_v43 = vld [vmem:[#allocation2 + $0x698] sm:$0xff]  }
 0x145   :  { %v2960_v58 = vadd.f32 %v7469_v21, %v2575_v48  ;;  %v2961_v59 = vadd.f32 %v7470_v25, %v2576_v49  ;;  %v1422_v60 = vadd.f32 %v6449_v38, %v1037_v50  ;;  %v7473_v61 = vunpack.c.l.bf16 %v8340_v47 }
 0x146   :  { %v1423_v63 = vadd.f32 %v6450_v44, %v1038_v53  ;;  %v7474_v0 = vunpack.c.h.bf16 %v8340_v47  ;;  %v5557_v1 = vunpack.c.l.bf16 %v7868_v52  ;;  %v5558_v2 = vunpack.c.h.bf16 %v7868_v52  ;;  %v8121_v52 = vld [vmem:[#allocation2 + $0x898] sm:$0xff]  }
 0x147   :  { %v3088_v4 = vmul.f32 0.125, %v2960_v58  ;;  %v3089_v5 = vmul.f32 0.125, %v2961_v59  ;;  %v1807_v6 = vadd.f32 %v6705_v45, %v1422_v60  ;;  %v5813_v7 = vunpack.c.l.bf16 %v7931_v57 }
 0x148   :  { %v1808_v9 = vadd.f32 %v6706_v46, %v1423_v63  ;;  %v5814_v10 = vunpack.c.h.bf16 %v7931_v57  ;;  %v6069_v11 = vunpack.c.l.bf16 %v7994_v62  ;;  %v6070_v12 = vunpack.c.h.bf16 %v7994_v62  ;;  %v8184_v57 = vld [vmem:[#allocation2 + $0xa98] sm:$0xff]  }
 0x149   :  { %v3168_v14 = vpack.c.bf16 %v3089_v5, %v3088_v4  ;;  %v2192_v15 = vadd.f32 %v6961_v51, %v1807_v6  ;;  %v590_v16 = vadd.f32 %v5813_v7, %v5557_v1  ;;  %v6325_v17 = vunpack.c.l.bf16 %v8057_v3  ;;  %v8247_v62 = vld [vmem:[#allocation2 + $0xc98] sm:$0xff]  }
 0x14a   :  { %v2193_v19 = vadd.f32 %v6962_v54, %v1808_v9  ;;  %v591_v20 = vadd.f32 %v5814_v10, %v5558_v2  ;;  %v6326_v21 = vunpack.c.h.bf16 %v8057_v3  ;;  %v6581_v22 = vunpack.c.l.bf16 %v8120_v8  ;;  %v8310_v3 = vld [vmem:[#allocation2 + $0xe98] sm:$0xff]  }
 0x14b   :  { %8602 = vmatprep.mubr.bf16.mxu1 %v3168_v14  ;;  %v2577_v24 = vadd.f32 %v7217_v55, %v2192_v15  ;;  %v975_v25 = vadd.f32 %v6069_v11, %v590_v16  ;;  %v6582_v26 = vunpack.c.h.bf16 %v8120_v8  ;;  %v6837_v27 = vunpack.c.l.bf16 %v8183_v13  ;;  %v7900_v8 = vld [vmem:[#allocation2 + $0x190] sm:$0xff]  }
 0x14c   :  { %v2578_v29 = vadd.f32 %v7218_v56, %v2193_v19  ;;  %v976_v30 = vadd.f32 %v6070_v12, %v591_v20  ;;  %v6838_v31 = vunpack.c.h.bf16 %v8183_v13  ;;  %v7093_v32 = vunpack.c.l.bf16 %v8246_v18  ;;  %v7963_v13 = vld [vmem:[#allocation2 + $0x390] sm:$0xff]  }
 0x14d   :  { %v2962_v36 = vadd.f32 %v7473_v61, %v2577_v24  ;;  %v1360_v37 = vadd.f32 %v6325_v17, %v975_v25  ;;  %v7094_v38 = vunpack.c.h.bf16 %v8246_v18  ;;  %v7349_v34 = vunpack.c.l.bf16 %v8309_v23  ;;  %v8026_v18 = vld [vmem:[#allocation2 + $0x590] sm:$0xff]  }
 0x14e   :  { %v2963_v39 = vadd.f32 %v7474_v0, %v2578_v29  ;;  %v1361_v40 = vadd.f32 %v6326_v21, %v976_v30  ;;  %v7350_v41 = vunpack.c.h.bf16 %v8309_v23  ;;  %v5561_v42 = vunpack.c.l.bf16 %v7869_v28  ;;  %v8089_v19 = vld [vmem:[#allocation2 + $0x790] sm:$0xff]  }
 0x14f   :  { %v3090_v44 = vmul.f32 0.125, %v2962_v36  ;;  %v1745_v45 = vadd.f32 %v6581_v22, %v1360_v37  ;;  %v5562_v46 = vunpack.c.h.bf16 %v7869_v28  ;;  %v5817_v47 = vunpack.c.l.bf16 %v7932_v33  ;;  %v8152_v28 = vld [vmem:[#allocation2 + $0x990] sm:$0xff]  }
 0x150   :  { %v3091_v48 = vmul.f32 0.125, %v2963_v39  ;;  %v1746_v49 = vadd.f32 %v6582_v26, %v1361_v40  ;;  %v5818_v50 = vunpack.c.h.bf16 %v7932_v33  ;;  %v6073_v51 = vunpack.c.l.bf16 %v7995_v35  ;;  %v8215_v33 = vld [vmem:[#allocation2 + $0xb90] sm:$0xff]  }
 0x151   :  { %v2130_v53 = vadd.f32 %v6837_v27, %v1745_v45  ;;  %v592_v54 = vadd.f32 %v5817_v47, %v5561_v42  ;;  %v6074_v55 = vunpack.c.h.bf16 %v7995_v35  ;;  %v6329_v56 = vunpack.c.l.bf16 %v8058_v43  ;;  %v8278_v35 = vld [vmem:[#allocation2 + $0xd90] sm:$0xff]  }
 0x152   :  { %v3169_v58 = vpack.c.bf16 %v3091_v48, %v3090_v44  ;;  %v2131_v59 = vadd.f32 %v6838_v31, %v1746_v49  ;;  %v593_v60 = vadd.f32 %v5818_v50, %v5562_v46  ;;  %v6330_v61 = vunpack.c.h.bf16 %v8058_v43  ;;  %v8341_v43 = vld [vmem:[#allocation2 + $0xf90] sm:$0xff]   ;;  %v7901_v48 = vld [vmem:[#allocation2 + $0x198] sm:$0xff]  }
 0x153   :  { %v2515_v63 = vadd.f32 %v7093_v32, %v2130_v53  ;;  %v977_v0 = vadd.f32 %v6073_v51, %v592_v54  ;;  %v6585_v1 = vunpack.c.l.bf16 %v8121_v52  ;;  %v6586_v2 = vunpack.c.h.bf16 %v8121_v52  ;;  %v7964_v53 = vld [vmem:[#allocation2 + $0x398] sm:$0xff]  }
 0x154   :  { %8603 = vmatmul.mubr.bf16.gmra.mxu1 %v3169_v58  ;;  %v2516_v4 = vadd.f32 %v7094_v38, %v2131_v59  ;;  %v978_v5 = vadd.f32 %v6074_v55, %v593_v60  ;;  %v6841_v6 = vunpack.c.l.bf16 %v8184_v57  ;;  %v6842_v7 = vunpack.c.h.bf16 %v8184_v57  ;;  %v8027_v58 = vld [vmem:[#allocation2 + $0x598] sm:$0xff]  }
 0x155   :  { %v2900_v9 = vadd.f32 %v7349_v34, %v2515_v63  ;;  %v1362_v10 = vadd.f32 %v6329_v56, %v977_v0  ;;  %v7097_v11 = vunpack.c.l.bf16 %v8247_v62  ;;  %v7098_v12 = vunpack.c.h.bf16 %v8247_v62  ;;  %v8090_v59 = vld [vmem:[#allocation2 + $0x798] sm:$0xff]  }
 0x156   :  { %v2901_v14 = vadd.f32 %v7350_v41, %v2516_v4  ;;  %v1363_v15 = vadd.f32 %v6330_v61, %v978_v5  ;;  %v7353_v16 = vunpack.c.l.bf16 %v8310_v3  ;;  %v7354_v17 = vunpack.c.h.bf16 %v8310_v3  ;;  %v8153_v4 = vld [vmem:[#allocation2 + $0x998] sm:$0xff]  }
 0x157   :  { %v3028_v20 = vmul.f32 0.125, %v2900_v9  ;;  %v1747_v21 = vadd.f32 %v6585_v1, %v1362_v10  ;;  %v5685_v22 = vunpack.c.l.bf16 %v7900_v8  ;;  %v5686_v23 = vunpack.c.h.bf16 %v7900_v8  ;;  %v8216_v9 = vld [vmem:[#allocation2 + $0xb98] sm:$0xff]  }
 0x158   :  { %v3029_v24 = vmul.f32 0.125, %v2901_v14  ;;  %v1748_v25 = vadd.f32 %v6586_v2, %v1363_v15  ;;  %v5941_v26 = vunpack.c.l.bf16 %v7963_v13  ;;  %v5942_v27 = vunpack.c.h.bf16 %v7963_v13  ;;  %v8279_v14 = vld [vmem:[#allocation2 + $0xd98] sm:$0xff]  }
 0x159   :  { %v2132_v29 = vadd.f32 %v6841_v6, %v1747_v21  ;;  %v6197_v30 = vunpack.c.l.bf16 %v8026_v18  ;;  %v6198_v31 = vunpack.c.h.bf16 %v8026_v18  ;;  %v6453_v32 = vunpack.c.l.bf16 %v8089_v19 }
 0x15a   :  { %v3138_v36 = vpack.c.bf16 %v3029_v24, %v3028_v20  ;;  %v2133_v37 = vadd.f32 %v6842_v7, %v1748_v25  ;;  %v654_v38 = vadd.f32 %v5941_v26, %v5685_v22  ;;  %v655_v34 = vadd.f32 %v5942_v27, %v5686_v23  ;;  %v7870_v24 = vld [vmem:[#allocation2 + $0xa0] sm:$0xff]  }
 0x15b   :  { %v2517_v39 = vadd.f32 %v7097_v11, %v2132_v29  ;;  %v6454_v40 = vunpack.c.h.bf16 %v8089_v19  ;;  %v6709_v41 = vunpack.c.l.bf16 %v8152_v28  ;;  %v6710_v42 = vunpack.c.h.bf16 %v8152_v28  ;;  %v8342_v19 = vld [vmem:[#allocation2 + $0xf98] sm:$0xff]   ;;  %v7933_v29 = vld [vmem:[#allocation2 + $0x2a0] sm:$0xff]  }
 0x15c   :  { %8542 = vmatprep.mubr.bf16.mxu0 %v3138_v36  ;;  %v2518_v44 = vadd.f32 %v7098_v12, %v2133_v37  ;;  %v1039_v45 = vadd.f32 %v6197_v30, %v654_v38  ;;  %v1040_v46 = vadd.f32 %v6198_v31, %v655_v34  ;;  %v6965_v47 = vunpack.c.l.bf16 %v8215_v33  ;;  %v7996_v36 = vld [vmem:[#allocation2 + $0x4a0] sm:$0xff]  }
 0x15d   :  { %v2902_v49 = vadd.f32 %v7353_v16, %v2517_v39  ;;  %v6966_v50 = vunpack.c.h.bf16 %v8215_v33  ;;  %v7221_v51 = vunpack.c.l.bf16 %v8278_v35  ;;  %v7222_v52 = vunpack.c.h.bf16 %v8278_v35  ;;  %v8059_v39 = vld [vmem:[#allocation2 + $0x6a0] sm:$0xff]  }
 0x15e   :  { %v2903_v54 = vadd.f32 %v7354_v17, %v2518_v44  ;;  %v1424_v55 = vadd.f32 %v6453_v32, %v1039_v45  ;;  %v1425_v56 = vadd.f32 %v6454_v40, %v1040_v46  ;;  %v7477_v57 = vunpack.c.l.bf16 %v8341_v43  ;;  %v8122_v44 = vld [vmem:[#allocation2 + $0x8a0] sm:$0xff]  }
 0x15f   :  { %v3030_v60 = vmul.f32 0.125, %v2902_v49  ;;  %v7478_v61 = vunpack.c.h.bf16 %v8341_v43  ;;  %v5689_v62 = vunpack.c.l.bf16 %v7901_v48  ;;  %v5690_v63 = vunpack.c.h.bf16 %v7901_v48  ;;  %v8185_v49 = vld [vmem:[#allocation2 + $0xaa0] sm:$0xff]  }
 0x160   :  { %v3031_v0 = vmul.f32 0.125, %v2903_v54  ;;  %v1809_v1 = vadd.f32 %v6709_v41, %v1424_v55  ;;  %v1810_v2 = vadd.f32 %v6710_v42, %v1425_v56  ;;  %v5945_v3 = vunpack.c.l.bf16 %v7964_v53  ;;  %v8248_v54 = vld [vmem:[#allocation2 + $0xca0] sm:$0xff]  }
 0x161   :  { %v5946_v5 = vunpack.c.h.bf16 %v7964_v53  ;;  %v6201_v6 = vunpack.c.l.bf16 %v8027_v58  ;;  %v6202_v7 = vunpack.c.h.bf16 %v8027_v58  ;;  %v6457_v8 = vunpack.c.l.bf16 %v8090_v59 }
 0x162   :  { %v3139_v10 = vpack.c.bf16 %v3031_v0, %v3030_v60  ;;  %v2194_v11 = vadd.f32 %v6965_v47, %v1809_v1  ;;  %v2195_v12 = vadd.f32 %v6966_v50, %v1810_v2  ;;  %v656_v13 = vadd.f32 %v5945_v3, %v5689_v62  ;;  %v7871_v0 = vld [vmem:[#allocation2 + $0xa8] sm:$0xff]  }
 0x163   :  { %v657_v15 = vadd.f32 %v5946_v5, %v5690_v63  ;;  %v6458_v16 = vunpack.c.h.bf16 %v8090_v59  ;;  %v6713_v17 = vunpack.c.l.bf16 %v8153_v4  ;;  %v6714_v18 = vunpack.c.h.bf16 %v8153_v4  ;;  %v8311_v59 = vld [vmem:[#allocation2 + $0xea0] sm:$0xff]   ;;  %v7934_v5 = vld [vmem:[#allocation2 + $0x2a8] sm:$0xff]  }
 0x164   :  { %8543 = vmatmul.mubr.bf16.gmra.mxu0 %v3139_v10  ;;  %v2579_v20 = vadd.f32 %v7221_v51, %v2194_v11  ;;  %v2580_v21 = vadd.f32 %v7222_v52, %v2195_v12  ;;  %v1041_v22 = vadd.f32 %v6201_v6, %v656_v13  ;;  %v6969_v23 = vunpack.c.l.bf16 %v8216_v9  ;;  %v7997_v10 = vld [vmem:[#allocation2 + $0x4a8] sm:$0xff]  }
 0x165   :  { %v1042_v25 = vadd.f32 %v6202_v7, %v657_v15  ;;  %v6970_v26 = vunpack.c.h.bf16 %v8216_v9  ;;  %v7225_v27 = vunpack.c.l.bf16 %v8279_v14  ;;  %v7226_v28 = vunpack.c.h.bf16 %v8279_v14  ;;  %v8060_v15 = vld [vmem:[#allocation2 + $0x6a8] sm:$0xff]  }
 0x166   :  { %v2964_v30 = vadd.f32 %v7477_v57, %v2579_v20  ;;  %v2965_v31 = vadd.f32 %v7478_v61, %v2580_v21  ;;  %v1426_v32 = vadd.f32 %v6457_v8, %v1041_v22  ;;  %v7481_v33 = vunpack.c.l.bf16 %v8342_v19 }
 0x167   :  { %v1427_v37 = vadd.f32 %v6458_v16, %v1042_v25  ;;  %v7482_v38 = vunpack.c.h.bf16 %v8342_v19  ;;  %v5565_v34 = vunpack.c.l.bf16 %v7870_v24  ;;  %v5566_v35 = vunpack.c.h.bf16 %v7870_v24  ;;  %v8123_v24 = vld [vmem:[#allocation2 + $0x8a8] sm:$0xff]  }
 0x168   :  { %v3092_v40 = vmul.f32 0.125, %v2964_v30  ;;  %v3093_v41 = vmul.f32 0.125, %v2965_v31  ;;  %v1811_v42 = vadd.f32 %v6713_v17, %v1426_v32  ;;  %v5821_v43 = vunpack.c.l.bf16 %v7933_v29 }
 0x169   :  { %v1812_v45 = vadd.f32 %v6714_v18, %v1427_v37  ;;  %v5822_v46 = vunpack.c.h.bf16 %v7933_v29  ;;  %v6077_v47 = vunpack.c.l.bf16 %v7996_v36  ;;  %v6078_v48 = vunpack.c.h.bf16 %v7996_v36  ;;  %v8186_v29 = vld [vmem:[#allocation2 + $0xaa8] sm:$0xff]  }
 0x16a   :  { %v3170_v50 = vpack.c.bf16 %v3093_v41, %v3092_v40  ;;  %v2196_v51 = vadd.f32 %v6969_v23, %v1811_v42  ;;  %v594_v52 = vadd.f32 %v5821_v43, %v5565_v34  ;;  %v6333_v53 = vunpack.c.l.bf16 %v8059_v39  ;;  %v8249_v36 = vld [vmem:[#allocation2 + $0xca8] sm:$0xff]  }
 0x16b   :  { %v2197_v55 = vadd.f32 %v6970_v26, %v1812_v45  ;;  %v595_v56 = vadd.f32 %v5822_v46, %v5566_v35  ;;  %v6334_v57 = vunpack.c.h.bf16 %v8059_v39  ;;  %v6589_v58 = vunpack.c.l.bf16 %v8122_v44  ;;  %v8312_v39 = vld [vmem:[#allocation2 + $0xea8] sm:$0xff]  }
 0x16c   :  { %8606 = vmatprep.mubr.bf16.mxu1 %v3170_v50  ;;  %v2581_v60 = vadd.f32 %v7225_v27, %v2196_v51  ;;  %v979_v61 = vadd.f32 %v6077_v47, %v594_v52  ;;  %v6590_v62 = vunpack.c.h.bf16 %v8122_v44  ;;  %v6845_v63 = vunpack.c.l.bf16 %v8185_v49  ;;  %v7902_v44 = vld [vmem:[#allocation2 + $0x1a0] sm:$0xff]  }
 0x16d   :  { %v2582_v1 = vadd.f32 %v7226_v28, %v2197_v55  ;;  %v980_v2 = vadd.f32 %v6078_v48, %v595_v56  ;;  %v6846_v3 = vunpack.c.h.bf16 %v8185_v49  ;;  %v7101_v4 = vunpack.c.l.bf16 %v8248_v54  ;;  %v7965_v49 = vld [vmem:[#allocation2 + $0x3a0] sm:$0xff]  }
 0x16e   :  { %v2966_v6 = vadd.f32 %v7481_v33, %v2581_v60  ;;  %v1364_v7 = vadd.f32 %v6333_v53, %v979_v61  ;;  %v7102_v8 = vunpack.c.h.bf16 %v8248_v54  ;;  %v7357_v9 = vunpack.c.l.bf16 %v8311_v59  ;;  %v8028_v54 = vld [vmem:[#allocation2 + $0x5a0] sm:$0xff]  }
 0x16f   :  { %v2967_v11 = vadd.f32 %v7482_v38, %v2582_v1  ;;  %v1365_v12 = vadd.f32 %v6334_v57, %v980_v2  ;;  %v7358_v13 = vunpack.c.h.bf16 %v8311_v59  ;;  %v5569_v14 = vunpack.c.l.bf16 %v7871_v0  ;;  %v8091_v55 = vld [vmem:[#allocation2 + $0x7a0] sm:$0xff]  }
 0x170   :  { %v3094_v16 = vmul.f32 0.125, %v2966_v6  ;;  %v1749_v17 = vadd.f32 %v6589_v58, %v1364_v7  ;;  %v5570_v18 = vunpack.c.h.bf16 %v7871_v0  ;;  %v5825_v19 = vunpack.c.l.bf16 %v7934_v5  ;;  %v8154_v0 = vld [vmem:[#allocation2 + $0x9a0] sm:$0xff]  }
 0x171   :  { %v3095_v20 = vmul.f32 0.125, %v2967_v11  ;;  %v1750_v21 = vadd.f32 %v6590_v62, %v1365_v12  ;;  %v5826_v22 = vunpack.c.h.bf16 %v7934_v5  ;;  %v6081_v23 = vunpack.c.l.bf16 %v7997_v10  ;;  %v8217_v5 = vld [vmem:[#allocation2 + $0xba0] sm:$0xff]  }
 0x172   :  { %v2134_v25 = vadd.f32 %v6845_v63, %v1749_v17  ;;  %v596_v26 = vadd.f32 %v5825_v19, %v5569_v14  ;;  %v6082_v27 = vunpack.c.h.bf16 %v7997_v10  ;;  %v6337_v28 = vunpack.c.l.bf16 %v8060_v15  ;;  %v8280_v10 = vld [vmem:[#allocation2 + $0xda0] sm:$0xff]  }
 0x173   :  { %v3171_v30 = vpack.c.bf16 %v3095_v20, %v3094_v16  ;;  %v2135_v31 = vadd.f32 %v6846_v3, %v1750_v21  ;;  %v597_v32 = vadd.f32 %v5826_v22, %v5570_v18  ;;  %v6338_v33 = vunpack.c.h.bf16 %v8060_v15  ;;  %v8343_v15 = vld [vmem:[#allocation2 + $0xfa0] sm:$0xff]   ;;  %v7903_v20 = vld [vmem:[#allocation2 + $0x1a8] sm:$0xff]  }
 0x174   :  { %v2519_v37 = vadd.f32 %v7101_v4, %v2134_v25  ;;  %v981_v38 = vadd.f32 %v6081_v23, %v596_v26  ;;  %v6593_v34 = vunpack.c.l.bf16 %v8123_v24  ;;  %v6594_v35 = vunpack.c.h.bf16 %v8123_v24  ;;  %v7966_v25 = vld [vmem:[#allocation2 + $0x3a8] sm:$0xff]  }
 0x175   :  { %8607 = vmatmul.mubr.bf16.gmra.mxu1 %v3171_v30  ;;  %v2520_v40 = vadd.f32 %v7102_v8, %v2135_v31  ;;  %v982_v41 = vadd.f32 %v6082_v27, %v597_v32  ;;  %v6849_v42 = vunpack.c.l.bf16 %v8186_v29  ;;  %v6850_v43 = vunpack.c.h.bf16 %v8186_v29  ;;  %v8029_v30 = vld [vmem:[#allocation2 + $0x5a8] sm:$0xff]  }
 0x176   :  { %v2904_v45 = vadd.f32 %v7357_v9, %v2519_v37  ;;  %v1366_v46 = vadd.f32 %v6337_v28, %v981_v38  ;;  %v7105_v47 = vunpack.c.l.bf16 %v8249_v36  ;;  %v7106_v48 = vunpack.c.h.bf16 %v8249_v36  ;;  %v8092_v31 = vld [vmem:[#allocation2 + $0x7a8] sm:$0xff]  }
 0x177   :  { %v2905_v50 = vadd.f32 %v7358_v13, %v2520_v40  ;;  %v1367_v51 = vadd.f32 %v6338_v33, %v982_v41  ;;  %v7361_v52 = vunpack.c.l.bf16 %v8312_v39  ;;  %v7362_v53 = vunpack.c.h.bf16 %v8312_v39  ;;  %v8155_v40 = vld [vmem:[#allocation2 + $0x9a8] sm:$0xff]  }
 0x178   :  { %v3032_v56 = vmul.f32 0.125, %v2904_v45  ;;  %v1751_v57 = vadd.f32 %v6593_v34, %v1366_v46  ;;  %v5693_v58 = vunpack.c.l.bf16 %v7902_v44  ;;  %v5694_v59 = vunpack.c.h.bf16 %v7902_v44  ;;  %v8218_v45 = vld [vmem:[#allocation2 + $0xba8] sm:$0xff]  }
 0x179   :  { %v3033_v60 = vmul.f32 0.125, %v2905_v50  ;;  %v1752_v61 = vadd.f32 %v6594_v35, %v1367_v51  ;;  %v5949_v62 = vunpack.c.l.bf16 %v7965_v49  ;;  %v5950_v63 = vunpack.c.h.bf16 %v7965_v49  ;;  %v8281_v50 = vld [vmem:[#allocation2 + $0xda8] sm:$0xff]  }
 0x17a   :  { %v2136_v1 = vadd.f32 %v6849_v42, %v1751_v57  ;;  %v6205_v2 = vunpack.c.l.bf16 %v8028_v54  ;;  %v6206_v3 = vunpack.c.h.bf16 %v8028_v54  ;;  %v6461_v4 = vunpack.c.l.bf16 %v8091_v55 }
 0x17b   :  { %v3140_v6 = vpack.c.bf16 %v3033_v60, %v3032_v56  ;;  %v2137_v7 = vadd.f32 %v6850_v43, %v1752_v61  ;;  %v658_v8 = vadd.f32 %v5949_v62, %v5693_v58  ;;  %v659_v9 = vadd.f32 %v5950_v63, %v5694_v59  ;;  %v7872_v60 = vld [vmem:[#allocation2 + $0xb0] sm:$0xff]  }
 0x17c   :  { %v2521_v11 = vadd.f32 %v7105_v47, %v2136_v1  ;;  %v6462_v12 = vunpack.c.h.bf16 %v8091_v55  ;;  %v6717_v13 = vunpack.c.l.bf16 %v8154_v0  ;;  %v6718_v14 = vunpack.c.h.bf16 %v8154_v0  ;;  %v8344_v55 = vld [vmem:[#allocation2 + $0xfa8] sm:$0xff]   ;;  %v7935_v1 = vld [vmem:[#allocation2 + $0x2b0] sm:$0xff]  }
 0x17d   :  { %8546 = vmatprep.mubr.bf16.mxu0 %v3140_v6  ;;  %v2522_v16 = vadd.f32 %v7106_v48, %v2137_v7  ;;  %v1043_v17 = vadd.f32 %v6205_v2, %v658_v8  ;;  %v1044_v18 = vadd.f32 %v6206_v3, %v659_v9  ;;  %v6973_v19 = vunpack.c.l.bf16 %v8217_v5  ;;  %v7998_v6 = vld [vmem:[#allocation2 + $0x4b0] sm:$0xff]  }
 0x17e   :  { %v2906_v21 = vadd.f32 %v7361_v52, %v2521_v11  ;;  %v6974_v22 = vunpack.c.h.bf16 %v8217_v5  ;;  %v7229_v23 = vunpack.c.l.bf16 %v8280_v10  ;;  %v7230_v24 = vunpack.c.h.bf16 %v8280_v10  ;;  %v8061_v11 = vld [vmem:[#allocation2 + $0x6b0] sm:$0xff]  }
 0x17f   :  { %v2907_v26 = vadd.f32 %v7362_v53, %v2522_v16  ;;  %v1428_v27 = vadd.f32 %v6461_v4, %v1043_v17  ;;  %v1429_v28 = vadd.f32 %v6462_v12, %v1044_v18  ;;  %v7485_v29 = vunpack.c.l.bf16 %v8343_v15  ;;  %v8124_v16 = vld [vmem:[#allocation2 + $0x8b0] sm:$0xff]  }
 0x180   :  { %v3034_v32 = vmul.f32 0.125, %v2906_v21  ;;  %v7486_v33 = vunpack.c.h.bf16 %v8343_v15  ;;  %v5697_v36 = vunpack.c.l.bf16 %v7903_v20  ;;  %v5698_v37 = vunpack.c.h.bf16 %v7903_v20  ;;  %v8187_v21 = vld [vmem:[#allocation2 + $0xab0] sm:$0xff]  }
 0x181   :  { %v3035_v38 = vmul.f32 0.125, %v2907_v26  ;;  %v1813_v34 = vadd.f32 %v6717_v13, %v1428_v27  ;;  %v1814_v35 = vadd.f32 %v6718_v14, %v1429_v28  ;;  %v5953_v39 = vunpack.c.l.bf16 %v7966_v25  ;;  %v8250_v26 = vld [vmem:[#allocation2 + $0xcb0] sm:$0xff]  }
 0x182   :  { %v5954_v41 = vunpack.c.h.bf16 %v7966_v25  ;;  %v6209_v42 = vunpack.c.l.bf16 %v8029_v30  ;;  %v6210_v43 = vunpack.c.h.bf16 %v8029_v30  ;;  %v6465_v44 = vunpack.c.l.bf16 %v8092_v31 }
 0x183   :  { %v3141_v46 = vpack.c.bf16 %v3035_v38, %v3034_v32  ;;  %v2198_v47 = vadd.f32 %v6973_v19, %v1813_v34  ;;  %v2199_v48 = vadd.f32 %v6974_v22, %v1814_v35  ;;  %v660_v49 = vadd.f32 %v5953_v39, %v5697_v36  ;;  %v7873_v38 = vld [vmem:[#allocation2 + $0xb8] sm:$0xff]  }
 0x184   :  { %v661_v51 = vadd.f32 %v5954_v41, %v5698_v37  ;;  %v6466_v52 = vunpack.c.h.bf16 %v8092_v31  ;;  %v6721_v53 = vunpack.c.l.bf16 %v8155_v40  ;;  %v6722_v54 = vunpack.c.h.bf16 %v8155_v40  ;;  %v8313_v31 = vld [vmem:[#allocation2 + $0xeb0] sm:$0xff]   ;;  %v7936_v41 = vld [vmem:[#allocation2 + $0x2b8] sm:$0xff]  }
 0x185   :  { %8547 = vmatmul.mubr.bf16.gmra.mxu0 %v3141_v46  ;;  %v2583_v56 = vadd.f32 %v7229_v23, %v2198_v47  ;;  %v2584_v57 = vadd.f32 %v7230_v24, %v2199_v48  ;;  %v1045_v58 = vadd.f32 %v6209_v42, %v660_v49  ;;  %v6977_v59 = vunpack.c.l.bf16 %v8218_v45  ;;  %v7999_v46 = vld [vmem:[#allocation2 + $0x4b8] sm:$0xff]  }
 0x186   :  { %v1046_v61 = vadd.f32 %v6210_v43, %v661_v51  ;;  %v6978_v62 = vunpack.c.h.bf16 %v8218_v45  ;;  %v7233_v63 = vunpack.c.l.bf16 %v8281_v50  ;;  %v7234_v0 = vunpack.c.h.bf16 %v8281_v50  ;;  %v8062_v51 = vld [vmem:[#allocation2 + $0x6b8] sm:$0xff]  }
 0x187   :  { %v2968_v2 = vadd.f32 %v7485_v29, %v2583_v56  ;;  %v2969_v3 = vadd.f32 %v7486_v33, %v2584_v57  ;;  %v1430_v4 = vadd.f32 %v6465_v44, %v1045_v58  ;;  %v7489_v5 = vunpack.c.l.bf16 %v8344_v55 }
 0x188   :  { %v1431_v7 = vadd.f32 %v6466_v52, %v1046_v61  ;;  %v7490_v8 = vunpack.c.h.bf16 %v8344_v55  ;;  %v5573_v9 = vunpack.c.l.bf16 %v7872_v60  ;;  %v5574_v10 = vunpack.c.h.bf16 %v7872_v60  ;;  %v8125_v60 = vld [vmem:[#allocation2 + $0x8b8] sm:$0xff]  }
 0x189   :  { %v3096_v12 = vmul.f32 0.125, %v2968_v2  ;;  %v3097_v13 = vmul.f32 0.125, %v2969_v3  ;;  %v1815_v14 = vadd.f32 %v6721_v53, %v1430_v4  ;;  %v5829_v15 = vunpack.c.l.bf16 %v7935_v1 }
 0x18a   :  { %v1816_v17 = vadd.f32 %v6722_v54, %v1431_v7  ;;  %v5830_v18 = vunpack.c.h.bf16 %v7935_v1  ;;  %v6085_v19 = vunpack.c.l.bf16 %v7998_v6  ;;  %v6086_v20 = vunpack.c.h.bf16 %v7998_v6  ;;  %v8188_v1 = vld [vmem:[#allocation2 + $0xab8] sm:$0xff]  }
 0x18b   :  { %v3172_v22 = vpack.c.bf16 %v3097_v13, %v3096_v12  ;;  %v2200_v23 = vadd.f32 %v6977_v59, %v1815_v14  ;;  %v598_v24 = vadd.f32 %v5829_v15, %v5573_v9  ;;  %v6341_v25 = vunpack.c.l.bf16 %v8061_v11  ;;  %v8251_v6 = vld [vmem:[#allocation2 + $0xcb8] sm:$0xff]  }
 0x18c   :  { %v2201_v27 = vadd.f32 %v6978_v62, %v1816_v17  ;;  %v599_v28 = vadd.f32 %v5830_v18, %v5574_v10  ;;  %v6342_v29 = vunpack.c.h.bf16 %v8061_v11  ;;  %v6597_v30 = vunpack.c.l.bf16 %v8124_v16  ;;  %v8314_v11 = vld [vmem:[#allocation2 + $0xeb8] sm:$0xff]  }
 0x18d   :  { %8610 = vmatprep.mubr.bf16.mxu1 %v3172_v22  ;;  %v2585_v32 = vadd.f32 %v7233_v63, %v2200_v23  ;;  %v983_v33 = vadd.f32 %v6085_v19, %v598_v24  ;;  %v6598_v36 = vunpack.c.h.bf16 %v8124_v16  ;;  %v6853_v37 = vunpack.c.l.bf16 %v8187_v21  ;;  %v7904_v16 = vld [vmem:[#allocation2 + $0x1b0] sm:$0xff]  }
 0x18e   :  { %v2586_v34 = vadd.f32 %v7234_v0, %v2201_v27  ;;  %v984_v35 = vadd.f32 %v6086_v20, %v599_v28  ;;  %v6854_v39 = vunpack.c.h.bf16 %v8187_v21  ;;  %v7109_v40 = vunpack.c.l.bf16 %v8250_v26  ;;  %v7967_v21 = vld [vmem:[#allocation2 + $0x3b0] sm:$0xff]  }
 0x18f   :  { %v2970_v42 = vadd.f32 %v7489_v5, %v2585_v32  ;;  %v1368_v43 = vadd.f32 %v6341_v25, %v983_v33  ;;  %v7110_v44 = vunpack.c.h.bf16 %v8250_v26  ;;  %v7365_v45 = vunpack.c.l.bf16 %v8313_v31  ;;  %v8030_v26 = vld [vmem:[#allocation2 + $0x5b0] sm:$0xff]  }
 0x190   :  { %v2971_v47 = vadd.f32 %v7490_v8, %v2586_v34  ;;  %v1369_v48 = vadd.f32 %v6342_v29, %v984_v35  ;;  %v7366_v49 = vunpack.c.h.bf16 %v8313_v31  ;;  %v5577_v50 = vunpack.c.l.bf16 %v7873_v38  ;;  %v8093_v27 = vld [vmem:[#allocation2 + $0x7b0] sm:$0xff]  }
 0x191   :  { %v3098_v52 = vmul.f32 0.125, %v2970_v42  ;;  %v1753_v53 = vadd.f32 %v6597_v30, %v1368_v43  ;;  %v5578_v54 = vunpack.c.h.bf16 %v7873_v38  ;;  %v5833_v55 = vunpack.c.l.bf16 %v7936_v41  ;;  %v8156_v38 = vld [vmem:[#allocation2 + $0x9b0] sm:$0xff]  }
 0x192   :  { %v3099_v56 = vmul.f32 0.125, %v2971_v47  ;;  %v1754_v57 = vadd.f32 %v6598_v36, %v1369_v48  ;;  %v5834_v58 = vunpack.c.h.bf16 %v7936_v41  ;;  %v6089_v59 = vunpack.c.l.bf16 %v7999_v46  ;;  %v8219_v41 = vld [vmem:[#allocation2 + $0xbb0] sm:$0xff]  }
 0x193   :  { %v2138_v61 = vadd.f32 %v6853_v37, %v1753_v53  ;;  %v600_v62 = vadd.f32 %v5833_v55, %v5577_v50  ;;  %v6090_v63 = vunpack.c.h.bf16 %v7999_v46  ;;  %v6345_v0 = vunpack.c.l.bf16 %v8062_v51  ;;  %v8282_v46 = vld [vmem:[#allocation2 + $0xdb0] sm:$0xff]  }
 0x194   :  { %v3173_v2 = vpack.c.bf16 %v3099_v56, %v3098_v52  ;;  %v2139_v3 = vadd.f32 %v6854_v39, %v1754_v57  ;;  %v601_v4 = vadd.f32 %v5834_v58, %v5578_v54  ;;  %v6346_v5 = vunpack.c.h.bf16 %v8062_v51  ;;  %v8345_v51 = vld [vmem:[#allocation2 + $0xfb0] sm:$0xff]   ;;  %v7905_v56 = vld [vmem:[#allocation2 + $0x1b8] sm:$0xff]  }
 0x195   :  { %v2523_v7 = vadd.f32 %v7109_v40, %v2138_v61  ;;  %v985_v8 = vadd.f32 %v6089_v59, %v600_v62  ;;  %v6601_v9 = vunpack.c.l.bf16 %v8125_v60  ;;  %v6602_v10 = vunpack.c.h.bf16 %v8125_v60  ;;  %v7968_v61 = vld [vmem:[#allocation2 + $0x3b8] sm:$0xff]  }
 0x196   :  { %8611 = vmatmul.mubr.bf16.gmra.mxu1 %v3173_v2  ;;  %v2524_v12 = vadd.f32 %v7110_v44, %v2139_v3  ;;  %v986_v13 = vadd.f32 %v6090_v63, %v601_v4  ;;  %v6857_v14 = vunpack.c.l.bf16 %v8188_v1  ;;  %v6858_v15 = vunpack.c.h.bf16 %v8188_v1  ;;  %v8031_v2 = vld [vmem:[#allocation2 + $0x5b8] sm:$0xff]  }
 0x197   :  { %v2908_v17 = vadd.f32 %v7365_v45, %v2523_v7  ;;  %v1370_v18 = vadd.f32 %v6345_v0, %v985_v8  ;;  %v7113_v19 = vunpack.c.l.bf16 %v8251_v6  ;;  %v7114_v20 = vunpack.c.h.bf16 %v8251_v6  ;;  %v8094_v3 = vld [vmem:[#allocation2 + $0x7b8] sm:$0xff]  }
 0x198   :  { %v2909_v22 = vadd.f32 %v7366_v49, %v2524_v12  ;;  %v1371_v23 = vadd.f32 %v6346_v5, %v986_v13  ;;  %v7369_v24 = vunpack.c.l.bf16 %v8314_v11  ;;  %v7370_v25 = vunpack.c.h.bf16 %v8314_v11  ;;  %v8157_v12 = vld [vmem:[#allocation2 + $0x9b8] sm:$0xff]  }
 0x199   :  { %v3036_v28 = vmul.f32 0.125, %v2908_v17  ;;  %v1755_v29 = vadd.f32 %v6601_v9, %v1370_v18  ;;  %v5701_v30 = vunpack.c.l.bf16 %v7904_v16  ;;  %v5702_v31 = vunpack.c.h.bf16 %v7904_v16  ;;  %v8220_v17 = vld [vmem:[#allocation2 + $0xbb8] sm:$0xff]  }
 0x19a   :  { %v3037_v32 = vmul.f32 0.125, %v2909_v22  ;;  %v1756_v33 = vadd.f32 %v6602_v10, %v1371_v23  ;;  %v5957_v36 = vunpack.c.l.bf16 %v7967_v21  ;;  %v5958_v37 = vunpack.c.h.bf16 %v7967_v21  ;;  %v8283_v22 = vld [vmem:[#allocation2 + $0xdb8] sm:$0xff]  }
 0x19b   :  { %v2140_v34 = vadd.f32 %v6857_v14, %v1755_v29  ;;  %v6213_v35 = vunpack.c.l.bf16 %v8030_v26  ;;  %v6214_v39 = vunpack.c.h.bf16 %v8030_v26  ;;  %v6469_v40 = vunpack.c.l.bf16 %v8093_v27 }
 0x19c   :  { %v3142_v42 = vpack.c.bf16 %v3037_v32, %v3036_v28  ;;  %v2141_v43 = vadd.f32 %v6858_v15, %v1756_v33  ;;  %v662_v44 = vadd.f32 %v5957_v36, %v5701_v30  ;;  %v663_v45 = vadd.f32 %v5958_v37, %v5702_v31  ;;  %v7874_v32 = vld [vmem:[#allocation2 + $0xc0] sm:$0xff]  }
 0x19d   :  { %v2525_v47 = vadd.f32 %v7113_v19, %v2140_v34  ;;  %v6470_v48 = vunpack.c.h.bf16 %v8093_v27  ;;  %v6725_v49 = vunpack.c.l.bf16 %v8156_v38  ;;  %v6726_v50 = vunpack.c.h.bf16 %v8156_v38  ;;  %v8346_v27 = vld [vmem:[#allocation2 + $0xfb8] sm:$0xff]   ;;  %v7937_v34 = vld [vmem:[#allocation2 + $0x2c0] sm:$0xff]  }
 0x19e   :  { %8550 = vmatprep.mubr.bf16.mxu0 %v3142_v42  ;;  %v2526_v52 = vadd.f32 %v7114_v20, %v2141_v43  ;;  %v1047_v53 = vadd.f32 %v6213_v35, %v662_v44  ;;  %v1048_v54 = vadd.f32 %v6214_v39, %v663_v45  ;;  %v6981_v55 = vunpack.c.l.bf16 %v8219_v41  ;;  %v8000_v42 = vld [vmem:[#allocation2 + $0x4c0] sm:$0xff]  }
 0x19f   :  { %v2910_v57 = vadd.f32 %v7369_v24, %v2525_v47  ;;  %v6982_v58 = vunpack.c.h.bf16 %v8219_v41  ;;  %v7237_v59 = vunpack.c.l.bf16 %v8282_v46  ;;  %v7238_v60 = vunpack.c.h.bf16 %v8282_v46  ;;  %v8063_v47 = vld [vmem:[#allocation2 + $0x6c0] sm:$0xff]  }
 0x1a0   :  { %v2911_v62 = vadd.f32 %v7370_v25, %v2526_v52  ;;  %v1432_v63 = vadd.f32 %v6469_v40, %v1047_v53  ;;  %v1433_v0 = vadd.f32 %v6470_v48, %v1048_v54  ;;  %v7493_v1 = vunpack.c.l.bf16 %v8345_v51  ;;  %v8126_v52 = vld [vmem:[#allocation2 + $0x8c0] sm:$0xff]  }
 0x1a1   :  { %v3038_v4 = vmul.f32 0.125, %v2910_v57  ;;  %v7494_v5 = vunpack.c.h.bf16 %v8345_v51  ;;  %v5705_v6 = vunpack.c.l.bf16 %v7905_v56  ;;  %v5706_v7 = vunpack.c.h.bf16 %v7905_v56  ;;  %v8189_v57 = vld [vmem:[#allocation2 + $0xac0] sm:$0xff]  }
 0x1a2   :  { %v3039_v8 = vmul.f32 0.125, %v2911_v62  ;;  %v1817_v9 = vadd.f32 %v6725_v49, %v1432_v63  ;;  %v1818_v10 = vadd.f32 %v6726_v50, %v1433_v0  ;;  %v5961_v11 = vunpack.c.l.bf16 %v7968_v61  ;;  %v8252_v62 = vld [vmem:[#allocation2 + $0xcc0] sm:$0xff]  }
 0x1a3   :  { %v5962_v13 = vunpack.c.h.bf16 %v7968_v61  ;;  %v6217_v14 = vunpack.c.l.bf16 %v8031_v2  ;;  %v6218_v15 = vunpack.c.h.bf16 %v8031_v2  ;;  %v6473_v16 = vunpack.c.l.bf16 %v8094_v3 }
 0x1a4   :  { %v3143_v18 = vpack.c.bf16 %v3039_v8, %v3038_v4  ;;  %v2202_v19 = vadd.f32 %v6981_v55, %v1817_v9  ;;  %v2203_v20 = vadd.f32 %v6982_v58, %v1818_v10  ;;  %v664_v21 = vadd.f32 %v5961_v11, %v5705_v6  ;;  %v7875_v8 = vld [vmem:[#allocation2 + $0xc8] sm:$0xff]  }
 0x1a5   :  { %v665_v23 = vadd.f32 %v5962_v13, %v5706_v7  ;;  %v6474_v24 = vunpack.c.h.bf16 %v8094_v3  ;;  %v6729_v25 = vunpack.c.l.bf16 %v8157_v12  ;;  %v6730_v26 = vunpack.c.h.bf16 %v8157_v12  ;;  %v8315_v3 = vld [vmem:[#allocation2 + $0xec0] sm:$0xff]   ;;  %v7938_v13 = vld [vmem:[#allocation2 + $0x2c8] sm:$0xff]  }
 0x1a6   :  { %8551 = vmatmul.mubr.bf16.gmra.mxu0 %v3143_v18  ;;  %v2587_v28 = vadd.f32 %v7237_v59, %v2202_v19  ;;  %v2588_v29 = vadd.f32 %v7238_v60, %v2203_v20  ;;  %v1049_v30 = vadd.f32 %v6217_v14, %v664_v21  ;;  %v6985_v31 = vunpack.c.l.bf16 %v8220_v17  ;;  %v8001_v18 = vld [vmem:[#allocation2 + $0x4c8] sm:$0xff]  }
 0x1a7   :  { %v1050_v33 = vadd.f32 %v6218_v15, %v665_v23  ;;  %v6986_v36 = vunpack.c.h.bf16 %v8220_v17  ;;  %v7241_v37 = vunpack.c.l.bf16 %v8283_v22  ;;  %v7242_v38 = vunpack.c.h.bf16 %v8283_v22  ;;  %v8064_v23 = vld [vmem:[#allocation2 + $0x6c8] sm:$0xff]  }
 0x1a8   :  { %v2972_v35 = vadd.f32 %v7493_v1, %v2587_v28  ;;  %v2973_v39 = vadd.f32 %v7494_v5, %v2588_v29  ;;  %v1434_v40 = vadd.f32 %v6473_v16, %v1049_v30  ;;  %v7497_v41 = vunpack.c.l.bf16 %v8346_v27 }
 0x1a9   :  { %v1435_v43 = vadd.f32 %v6474_v24, %v1050_v33  ;;  %v7498_v44 = vunpack.c.h.bf16 %v8346_v27  ;;  %v5581_v45 = vunpack.c.l.bf16 %v7874_v32  ;;  %v5582_v46 = vunpack.c.h.bf16 %v7874_v32  ;;  %v8127_v32 = vld [vmem:[#allocation2 + $0x8c8] sm:$0xff]  }
 0x1aa   :  { %v3100_v48 = vmul.f32 0.125, %v2972_v35  ;;  %v3101_v49 = vmul.f32 0.125, %v2973_v39  ;;  %v1819_v50 = vadd.f32 %v6729_v25, %v1434_v40  ;;  %v5837_v51 = vunpack.c.l.bf16 %v7937_v34 }
 0x1ab   :  { %v1820_v53 = vadd.f32 %v6730_v26, %v1435_v43  ;;  %v5838_v54 = vunpack.c.h.bf16 %v7937_v34  ;;  %v6093_v55 = vunpack.c.l.bf16 %v8000_v42  ;;  %v6094_v56 = vunpack.c.h.bf16 %v8000_v42  ;;  %v8190_v34 = vld [vmem:[#allocation2 + $0xac8] sm:$0xff]  }
 0x1ac   :  { %v3174_v58 = vpack.c.bf16 %v3101_v49, %v3100_v48  ;;  %v2204_v59 = vadd.f32 %v6985_v31, %v1819_v50  ;;  %v602_v60 = vadd.f32 %v5837_v51, %v5581_v45  ;;  %v6349_v61 = vunpack.c.l.bf16 %v8063_v47  ;;  %v8253_v42 = vld [vmem:[#allocation2 + $0xcc8] sm:$0xff]  }
 0x1ad   :  { %v2205_v63 = vadd.f32 %v6986_v36, %v1820_v53  ;;  %v603_v0 = vadd.f32 %v5838_v54, %v5582_v46  ;;  %v6350_v1 = vunpack.c.h.bf16 %v8063_v47  ;;  %v6605_v2 = vunpack.c.l.bf16 %v8126_v52  ;;  %v8316_v47 = vld [vmem:[#allocation2 + $0xec8] sm:$0xff]  }
 0x1ae   :  { %8614 = vmatprep.mubr.bf16.mxu1 %v3174_v58  ;;  %v2589_v4 = vadd.f32 %v7241_v37, %v2204_v59  ;;  %v987_v5 = vadd.f32 %v6093_v55, %v602_v60  ;;  %v6606_v6 = vunpack.c.h.bf16 %v8126_v52  ;;  %v6861_v7 = vunpack.c.l.bf16 %v8189_v57  ;;  %v7906_v52 = vld [vmem:[#allocation2 + $0x1c0] sm:$0xff]  }
 0x1af   :  { %v2590_v9 = vadd.f32 %v7242_v38, %v2205_v63  ;;  %v988_v10 = vadd.f32 %v6094_v56, %v603_v0  ;;  %v6862_v11 = vunpack.c.h.bf16 %v8189_v57  ;;  %v7117_v12 = vunpack.c.l.bf16 %v8252_v62  ;;  %v7969_v57 = vld [vmem:[#allocation2 + $0x3c0] sm:$0xff]  }
 0x1b0   :  { %v2974_v14 = vadd.f32 %v7497_v41, %v2589_v4  ;;  %v1372_v15 = vadd.f32 %v6349_v61, %v987_v5  ;;  %v7118_v16 = vunpack.c.h.bf16 %v8252_v62  ;;  %v7373_v17 = vunpack.c.l.bf16 %v8315_v3  ;;  %v8032_v62 = vld [vmem:[#allocation2 + $0x5c0] sm:$0xff]  }
 0x1b1   :  { %v2975_v19 = vadd.f32 %v7498_v44, %v2590_v9  ;;  %v1373_v20 = vadd.f32 %v6350_v1, %v988_v10  ;;  %v7374_v21 = vunpack.c.h.bf16 %v8315_v3  ;;  %v5585_v22 = vunpack.c.l.bf16 %v7875_v8  ;;  %v8095_v63 = vld [vmem:[#allocation2 + $0x7c0] sm:$0xff]  }
 0x1b2   :  { %v3102_v24 = vmul.f32 0.125, %v2974_v14  ;;  %v1757_v25 = vadd.f32 %v6605_v2, %v1372_v15  ;;  %v5586_v26 = vunpack.c.h.bf16 %v7875_v8  ;;  %v5841_v27 = vunpack.c.l.bf16 %v7938_v13  ;;  %v8158_v8 = vld [vmem:[#allocation2 + $0x9c0] sm:$0xff]  }
 0x1b3   :  { %v3103_v28 = vmul.f32 0.125, %v2975_v19  ;;  %v1758_v29 = vadd.f32 %v6606_v6, %v1373_v20  ;;  %v5842_v30 = vunpack.c.h.bf16 %v7938_v13  ;;  %v6097_v31 = vunpack.c.l.bf16 %v8001_v18  ;;  %v8221_v13 = vld [vmem:[#allocation2 + $0xbc0] sm:$0xff]  }
 0x1b4   :  { %v2142_v33 = vadd.f32 %v6861_v7, %v1757_v25  ;;  %v604_v36 = vadd.f32 %v5841_v27, %v5585_v22  ;;  %v6098_v37 = vunpack.c.h.bf16 %v8001_v18  ;;  %v6353_v38 = vunpack.c.l.bf16 %v8064_v23  ;;  %v8284_v18 = vld [vmem:[#allocation2 + $0xdc0] sm:$0xff]  }
 0x1b5   :  { %v3175_v35 = vpack.c.bf16 %v3103_v28, %v3102_v24  ;;  %v2143_v39 = vadd.f32 %v6862_v11, %v1758_v29  ;;  %v605_v40 = vadd.f32 %v5842_v30, %v5586_v26  ;;  %v6354_v41 = vunpack.c.h.bf16 %v8064_v23  ;;  %v8347_v23 = vld [vmem:[#allocation2 + $0xfc0] sm:$0xff]   ;;  %v7907_v28 = vld [vmem:[#allocation2 + $0x1c8] sm:$0xff]  }
 0x1b6   :  { %v2527_v43 = vadd.f32 %v7117_v12, %v2142_v33  ;;  %v989_v44 = vadd.f32 %v6097_v31, %v604_v36  ;;  %v6609_v45 = vunpack.c.l.bf16 %v8127_v32  ;;  %v6610_v46 = vunpack.c.h.bf16 %v8127_v32  ;;  %v7970_v33 = vld [vmem:[#allocation2 + $0x3c8] sm:$0xff]  }
 0x1b7   :  { %8615 = vmatmul.mubr.bf16.gmra.mxu1 %v3175_v35  ;;  %v2528_v48 = vadd.f32 %v7118_v16, %v2143_v39  ;;  %v990_v49 = vadd.f32 %v6098_v37, %v605_v40  ;;  %v6865_v50 = vunpack.c.l.bf16 %v8190_v34  ;;  %v6866_v51 = vunpack.c.h.bf16 %v8190_v34  ;;  %v8033_v35 = vld [vmem:[#allocation2 + $0x5c8] sm:$0xff]  }
 0x1b8   :  { %v2912_v53 = vadd.f32 %v7373_v17, %v2527_v43  ;;  %v1374_v54 = vadd.f32 %v6353_v38, %v989_v44  ;;  %v7121_v55 = vunpack.c.l.bf16 %v8253_v42  ;;  %v7122_v56 = vunpack.c.h.bf16 %v8253_v42  ;;  %v8096_v39 = vld [vmem:[#allocation2 + $0x7c8] sm:$0xff]  }
 0x1b9   :  { %v2913_v58 = vadd.f32 %v7374_v21, %v2528_v48  ;;  %v1375_v59 = vadd.f32 %v6354_v41, %v990_v49  ;;  %v7377_v60 = vunpack.c.l.bf16 %v8316_v47  ;;  %v7378_v61 = vunpack.c.h.bf16 %v8316_v47  ;;  %v8159_v48 = vld [vmem:[#allocation2 + $0x9c8] sm:$0xff]  }
 0x1ba   :  { %v3040_v0 = vmul.f32 0.125, %v2912_v53  ;;  %v1759_v1 = vadd.f32 %v6609_v45, %v1374_v54  ;;  %v5709_v2 = vunpack.c.l.bf16 %v7906_v52  ;;  %v5710_v3 = vunpack.c.h.bf16 %v7906_v52  ;;  %v8222_v53 = vld [vmem:[#allocation2 + $0xbc8] sm:$0xff]  }
 0x1bb   :  { %v3041_v4 = vmul.f32 0.125, %v2913_v58  ;;  %v1760_v5 = vadd.f32 %v6610_v46, %v1375_v59  ;;  %v5965_v6 = vunpack.c.l.bf16 %v7969_v57  ;;  %v5966_v7 = vunpack.c.h.bf16 %v7969_v57  ;;  %v8285_v58 = vld [vmem:[#allocation2 + $0xdc8] sm:$0xff]  }
 0x1bc   :  { %v2144_v9 = vadd.f32 %v6865_v50, %v1759_v1  ;;  %v6221_v10 = vunpack.c.l.bf16 %v8032_v62  ;;  %v6222_v11 = vunpack.c.h.bf16 %v8032_v62  ;;  %v6477_v12 = vunpack.c.l.bf16 %v8095_v63 }
 0x1bd   :  { %v3144_v14 = vpack.c.bf16 %v3041_v4, %v3040_v0  ;;  %v2145_v15 = vadd.f32 %v6866_v51, %v1760_v5  ;;  %v666_v16 = vadd.f32 %v5965_v6, %v5709_v2  ;;  %v667_v17 = vadd.f32 %v5966_v7, %v5710_v3  ;;  %v9029_v4 = vpop.f32.mrf.mxu0  ;;  %v9031_v5 = vpop.f32.mrf.mxu1 }
 0x1be   :  { %v2529_v19 = vadd.f32 %v7121_v55, %v2144_v9  ;;  %v6478_v20 = vunpack.c.h.bf16 %v8095_v63  ;;  %v6733_v21 = vunpack.c.l.bf16 %v8158_v8  ;;  %v6734_v22 = vunpack.c.h.bf16 %v8158_v8  ;;  %v8348_v63 = vld [vmem:[#allocation2 + $0xfc8] sm:$0xff]  }
 0x1bf   :  { %8554 = vmatprep.mubr.bf16.mxu0 %v3144_v14  ;;  %v2530_v24 = vadd.f32 %v7122_v56, %v2145_v15  ;;  %v1051_v25 = vadd.f32 %v6221_v10, %v666_v16  ;;  %v1052_v26 = vadd.f32 %v6222_v11, %v667_v17  ;;  %v6989_v27 = vunpack.c.l.bf16 %v8221_v13  ;;  %v7876_v10 = vld [vmem:[#allocation2 + $0xd0] sm:$0xff]  }
 0x1c0   :  { %v2914_v29 = vadd.f32 %v7377_v60, %v2529_v19  ;;  %v6990_v30 = vunpack.c.h.bf16 %v8221_v13  ;;  %v7245_v31 = vunpack.c.l.bf16 %v8284_v18  ;;  %v7246_v32 = vunpack.c.h.bf16 %v8284_v18  ;;  %v7939_v15 = vld [vmem:[#allocation2 + $0x2d0] sm:$0xff]  }
 0x1c1   :  { %v2915_v36 = vadd.f32 %v7378_v61, %v2530_v24  ;;  %v1436_v37 = vadd.f32 %v6477_v12, %v1051_v25  ;;  %v1437_v38 = vadd.f32 %v6478_v20, %v1052_v26  ;;  %v7501_v34 = vunpack.c.l.bf16 %v8347_v23  ;;  %v8002_v20 = vld [vmem:[#allocation2 + $0x4d0] sm:$0xff]  }
 0x1c2   :  { %v3042_v40 = vmul.f32 0.125, %v2914_v29  ;;  %v7502_v41 = vunpack.c.h.bf16 %v8347_v23  ;;  %v5713_v42 = vunpack.c.l.bf16 %v7907_v28  ;;  %v5714_v43 = vunpack.c.h.bf16 %v7907_v28  ;;  %v8065_v25 = vld [vmem:[#allocation2 + $0x6d0] sm:$0xff]  }
 0x1c3   :  { %v3043_v44 = vmul.f32 0.125, %v2915_v36  ;;  %v1821_v45 = vadd.f32 %v6733_v21, %v1436_v37  ;;  %v1822_v46 = vadd.f32 %v6734_v22, %v1437_v38  ;;  %v5969_v47 = vunpack.c.l.bf16 %v7970_v33  ;;  %v8191_v37 = vld [vmem:[#allocation2 + $0xad0] sm:$0xff]  }
 0x1c4   :  { %v5970_v49 = vunpack.c.h.bf16 %v7970_v33  ;;  %v6225_v50 = vunpack.c.l.bf16 %v8033_v35  ;;  %v6226_v51 = vunpack.c.h.bf16 %v8033_v35  ;;  %v6481_v52 = vunpack.c.l.bf16 %v8096_v39 }
 0x1c5   :  { %v3145_v54 = vpack.c.bf16 %v3043_v44, %v3042_v40  ;;  %v2206_v55 = vadd.f32 %v6989_v27, %v1821_v45  ;;  %v2207_v56 = vadd.f32 %v6990_v30, %v1822_v46  ;;  %v668_v57 = vadd.f32 %v5969_v47, %v5713_v42  ;;  %v8128_v30 = vld [vmem:[#allocation2 + $0x8d0] sm:$0xff]  }
 0x1c6   :  { %v669_v59 = vadd.f32 %v5970_v49, %v5714_v43  ;;  %v6482_v60 = vunpack.c.h.bf16 %v8096_v39  ;;  %v6737_v61 = vunpack.c.l.bf16 %v8159_v48  ;;  %v6738_v62 = vunpack.c.h.bf16 %v8159_v48  ;;  %v8254_v40 = vld [vmem:[#allocation2 + $0xcd0] sm:$0xff]  }
 0x1c7   :  { %8555 = vmatmul.mubr.bf16.gmra.mxu0 %v3145_v54  ;;  %v2591_v0 = vadd.f32 %v7245_v31, %v2206_v55  ;;  %v2592_v1 = vadd.f32 %v7246_v32, %v2207_v56  ;;  %v1053_v2 = vadd.f32 %v6225_v50, %v668_v57  ;;  %v6993_v3 = vunpack.c.l.bf16 %v8222_v53  ;;  %v8317_v45 = vld [vmem:[#allocation2 + $0xed0] sm:$0xff]   ;;  %v7877_v50 = vld [vmem:[#allocation2 + $0xd8] sm:$0xff]  }
 0x1c8   :  { %v1054_v6 = vadd.f32 %v6226_v51, %v669_v59  ;;  %v6994_v7 = vunpack.c.h.bf16 %v8222_v53  ;;  %v7249_v8 = vunpack.c.l.bf16 %v8285_v58  ;;  %v7250_v9 = vunpack.c.h.bf16 %v8285_v58  ;;  %v7940_v55 = vld [vmem:[#allocation2 + $0x2d8] sm:$0xff]  }
 0x1c9   :  { %v2976_v11 = vadd.f32 %v7501_v34, %v2591_v0  ;;  %v2977_v12 = vadd.f32 %v7502_v41, %v2592_v1  ;;  %v1438_v13 = vadd.f32 %v6481_v52, %v1053_v2  ;;  %v7505_v14 = vunpack.c.l.bf16 %v8348_v63 }
 0x1ca   :  { %v1439_v16 = vadd.f32 %v6482_v60, %v1054_v6  ;;  %v7506_v17 = vunpack.c.h.bf16 %v8348_v63  ;;  %v3859_v18 = vmul.f32 %v9031_v5, %v9031_v5  ;;  %v3795_v19 = vmul.f32 %v9029_v4, %v9029_v4  ;;  %v8003_v60 = vld [vmem:[#allocation2 + $0x4d8] sm:$0xff]  }
 0x1cb   :  { %v3104_v21 = vmul.f32 0.125, %v2976_v11  ;;  %v3105_v22 = vmul.f32 0.125, %v2977_v12  ;;  %v1823_v23 = vadd.f32 %v6737_v61, %v1438_v13  ;;  %v5589_v24 = vunpack.c.l.bf16 %v7876_v10  ;;  %v8066_v61 = vld [vmem:[#allocation2 + $0x6d8] sm:$0xff]  }
 0x1cc   :  { %v1824_v26 = vadd.f32 %v6738_v62, %v1439_v16  ;;  %4053 = vadd.xlane.f32.xlu0 %v3859_v18  ;;  %3925 = vadd.xlane.f32.xlu1 %v3795_v19  ;;  %v5590_v27 = vunpack.c.h.bf16 %v7876_v10  ;;  %v5845_v28 = vunpack.c.l.bf16 %v7939_v15  ;;  %v5846_v29 = vunpack.c.h.bf16 %v7939_v15  ;;  %v8255_v19 = vld [vmem:[#allocation2 + $0xcd8] sm:$0xff]  }
 0x1cd   :  { %v3176_v31 = vpack.c.bf16 %v3105_v22, %v3104_v21  ;;  %v2208_v32 = vadd.f32 %v6993_v3, %v1823_v23  ;;  %v6101_v33 = vunpack.c.l.bf16 %v8002_v20  ;;  %v6102_v36 = vunpack.c.h.bf16 %v8002_v20  ;;  %v9037_v3 = vpop.f32.mrf.mxu0 }
 0x1ce   :  { %v2209_v38 = vadd.f32 %v6994_v7, %v1824_v26  ;;  %v606_v34 = vadd.f32 %v5845_v28, %v5589_v24  ;;  %v607_v35 = vadd.f32 %v5846_v29, %v5590_v27  ;;  %v6357_v39 = vunpack.c.l.bf16 %v8065_v25  ;;  %v9039_v24 = vld [vmem:[#allocation2 + $0xed8] sm:$0xff]  }
 0x1cf   :  { %8618 = vmatprep.mubr.bf16.mxu1 %v3176_v31  ;;  %v2593_v41 = vadd.f32 %v7249_v8, %v2208_v32  ;;  %v6358_v42 = vunpack.c.h.bf16 %v8065_v25  ;;  %v6613_v43 = vunpack.c.l.bf16 %v8128_v30  ;;  %v6614_v44 = vunpack.c.h.bf16 %v8128_v30  ;;  %v9041_v25 = vpop.f32.mrf.mxu0 }
 0x1d0   :  { %v2594_v46 = vadd.f32 %v7250_v9, %v2209_v38  ;;  %v991_v47 = vadd.f32 %v6101_v33, %v606_v34  ;;  %v992_v48 = vadd.f32 %v6102_v36, %v607_v35  ;;  %v6869_v49 = vunpack.c.l.bf16 %v8191_v37  ;;  %v8129_v9 = vld [vmem:[#allocation2 + $0x8d8] sm:$0xff]   ;;  %v7908_v36 = vld [vmem:[#allocation2 + $0x1d0] sm:$0xff]  }
 0x1d1   :  { %v2978_v51 = vadd.f32 %v7505_v14, %v2593_v41  ;;  %v6870_v52 = vunpack.c.h.bf16 %v8191_v37  ;;  %v7125_v53 = vunpack.c.l.bf16 %v8254_v40  ;;  %v7126_v54 = vunpack.c.h.bf16 %v8254_v40  ;;  %v8192_v14 = vld [vmem:[#allocation2 + $0xad8] sm:$0xff]  }
 0x1d2   :  { %v2979_v56 = vadd.f32 %v7506_v17, %v2594_v46  ;;  %v1376_v57 = vadd.f32 %v6357_v39, %v991_v47  ;;  %v1377_v58 = vadd.f32 %v6358_v42, %v992_v48  ;;  %v7381_v59 = vunpack.c.l.bf16 %v8317_v45  ;;  %v7971_v39 = vld [vmem:[#allocation2 + $0x3d0] sm:$0xff]  }
 0x1d3   :  { %v3106_v62 = vmul.f32 0.125, %v2978_v51  ;;  %v7382_v63 = vunpack.c.h.bf16 %v8317_v45  ;;  %v5593_v0 = vunpack.c.l.bf16 %v7877_v50  ;;  %v5594_v1 = vunpack.c.h.bf16 %v7877_v50 }
 0x1d4   :  { %v3107_v2 = vmul.f32 0.125, %v2979_v56  ;;  %v1761_v6 = vadd.f32 %v6613_v43, %v1376_v57  ;;  %v1762_v7 = vadd.f32 %v6614_v44, %v1377_v58  ;;  %v5849_v8 = vunpack.c.l.bf16 %v7940_v55  ;;  %v8034_v44 = vld [vmem:[#allocation2 + $0x5d0] sm:$0xff]  }
 0x1d5   :  { %v5850_v10 = vunpack.c.h.bf16 %v7940_v55  ;;  %v6105_v11 = vunpack.c.l.bf16 %v8003_v60  ;;  %v6106_v12 = vunpack.c.h.bf16 %v8003_v60  ;;  %v6361_v13 = vunpack.c.l.bf16 %v8066_v61 }
 0x1d6   :  { %v3177_v15 = vpack.c.bf16 %v3107_v2, %v3106_v62  ;;  %v2146_v16 = vadd.f32 %v6869_v49, %v1761_v6  ;;  %v2147_v17 = vadd.f32 %v6870_v52, %v1762_v7  ;;  %v608_v18 = vadd.f32 %v5849_v8, %v5593_v0  ;;  %v8097_v49 = vld [vmem:[#allocation2 + $0x7d0] sm:$0xff]  }
 0x1d7   :  { %v609_v20 = vadd.f32 %v5850_v10, %v5594_v1  ;;  %v6362_v21 = vunpack.c.h.bf16 %v8066_v61  ;;  %v6617_v22 = vunpack.c.l.bf16 %v8129_v9  ;;  %v6618_v23 = vunpack.c.h.bf16 %v8129_v9  ;;  %v8286_v0 = vld [vmem:[#allocation2 + $0xdd0] sm:$0xff]   ;;  %v9049_v1 = vpop.f32.mrf.mxu0 }
 0x1d8   :  { %8619 = vmatmul.mubr.bf16.gmra.mxu1 %v3177_v15  ;;  %v2531_v26 = vadd.f32 %v7125_v53, %v2146_v16  ;;  %v2532_v27 = vadd.f32 %v7126_v54, %v2147_v17  ;;  %v993_v28 = vadd.f32 %v6105_v11, %v608_v18  ;;  %v6873_v29 = vunpack.c.l.bf16 %v8192_v14  ;;  %v8160_v54 = vld [vmem:[#allocation2 + $0x9d0] sm:$0xff]   ;;  %v9051_v15 = vpop.f32.mrf.mxu1 }
 0x1d9   :  { %v994_v30 = vadd.f32 %v6106_v12, %v609_v20  ;;  %v6874_v31 = vunpack.c.h.bf16 %v8192_v14  ;;  %v7129_v32 = vunpack.c.l.bf16 %v8255_v19  ;;  %v7130_v33 = vunpack.c.h.bf16 %v8255_v19  ;;  %v8349_v9 = vld [vmem:[#allocation2 + $0xfd0] sm:$0xff]   ;;  %v7909_v14 = vld [vmem:[#allocation2 + $0x1d8] sm:$0xff]  }
 0x1da   :  { %v2916_v37 = vadd.f32 %v7381_v59, %v2531_v26  ;;  %v2917_v38 = vadd.f32 %v7382_v63, %v2532_v27  ;;  %v1378_v34 = vadd.f32 %v6361_v13, %v993_v28  ;;  %v7385_v35 = vunpack.c.l.bf16 %v9039_v24  ;;  %v8223_v59 = vld [vmem:[#allocation2 + $0xbd0] sm:$0xff]   ;;  %v7972_v20 = vld [vmem:[#allocation2 + $0x3d8] sm:$0xff]  }
 0x1db   :  { %v1379_v40 = vadd.f32 %v6362_v21, %v994_v30  ;;  %v7386_v41 = vunpack.c.h.bf16 %v9039_v24  ;;  %v3793_v42 = vmul.f32 %v9037_v3, %v9037_v3  ;;  %v3796_v43 = vmul.f32 %v9041_v25, %v9041_v25  ;;  %v8035_v26 = vld [vmem:[#allocation2 + $0x5d8] sm:$0xff]  }
 0x1dc   :  { %v3044_v45 = vmul.f32 0.125, %v2916_v37  ;;  %v3045_v46 = vmul.f32 0.125, %v2917_v38  ;;  %v1763_v47 = vadd.f32 %v6617_v22, %v1378_v34  ;;  %v5717_v48 = vunpack.c.l.bf16 %v7908_v36  ;;  %v8098_v27 = vld [vmem:[#allocation2 + $0x7d8] sm:$0xff]  }
 0x1dd   :  { %v1764_v50 = vadd.f32 %v6618_v23, %v1379_v40  ;;  %3921 = vadd.xlane.f32.xlu0 %v3793_v42  ;;  %3927 = vadd.xlane.f32.xlu1 %v3796_v43  ;;  %v5718_v51 = vunpack.c.h.bf16 %v7908_v36  ;;  %v5973_v52 = vunpack.c.l.bf16 %v7971_v39  ;;  %v5974_v53 = vunpack.c.h.bf16 %v7971_v39  ;;  %v8161_v34 = vld [vmem:[#allocation2 + $0x9d8] sm:$0xff]  }
 0x1de   :  { %v3146_v55 = vpack.c.bf16 %v3045_v46, %v3044_v45  ;;  %v2148_v56 = vadd.f32 %v6873_v29, %v1763_v47  ;;  %v6229_v57 = vunpack.c.l.bf16 %v8034_v44  ;;  %v6230_v58 = vunpack.c.h.bf16 %v8034_v44  ;;  %v9053_v29 = vpop.f32.mrf.mxu0  ;;  %v8224_v43 = vld [vmem:[#allocation2 + $0xbd8] sm:$0xff]  }
 0x1df   :  { %v2149_v60 = vadd.f32 %v6874_v31, %v1764_v50  ;;  %v670_v61 = vadd.f32 %v5973_v52, %v5717_v48  ;;  %v671_v62 = vadd.f32 %v5974_v53, %v5718_v51  ;;  %v6485_v63 = vunpack.c.l.bf16 %v8097_v49  ;;  %v8287_v48 = vld [vmem:[#allocation2 + $0xdd8] sm:$0xff]  }
 0x1e0   :  { %8558 = vmatprep.mubr.bf16.mxu0 %v3146_v55  ;;  %v2533_v2 = vadd.f32 %v7129_v32, %v2148_v56  ;;  %v6486_v6 = vunpack.c.h.bf16 %v8097_v49  ;;  %v6741_v7 = vunpack.c.l.bf16 %v8160_v54  ;;  %v6742_v8 = vunpack.c.h.bf16 %v8160_v54  ;;  %v9057_v49 = vpop.f32.mrf.mxu0  ;;  %v9059_v54 = vld [vmem:[#allocation2 + $0xfd8] sm:$0xff]  }
 0x1e1   :  { %v2534_v10 = vadd.f32 %v7130_v33, %v2149_v60  ;;  %v1055_v11 = vadd.f32 %v6229_v57, %v670_v61  ;;  %v1056_v12 = vadd.f32 %v6230_v58, %v671_v62  ;;  %v6997_v13 = vunpack.c.l.bf16 %v8223_v59 }
 0x1e2   :  { %v2918_v16 = vadd.f32 %v7385_v35, %v2533_v2  ;;  %v6998_v17 = vunpack.c.h.bf16 %v8223_v59  ;;  %v7253_v18 = vunpack.c.l.bf16 %v8286_v0  ;;  %v7254_v19 = vunpack.c.h.bf16 %v8286_v0  ;;  %v9055_v35 = vpop.f32.mrf.mxu1 }
 0x1e3   :  { %v2919_v21 = vadd.f32 %v7386_v41, %v2534_v10  ;;  %v1440_v22 = vadd.f32 %v6485_v63, %v1055_v11  ;;  %v1441_v23 = vadd.f32 %v6486_v6, %v1056_v12  ;;  %v7509_v24 = vunpack.c.l.bf16 %v8349_v9 }
 0x1e4   :  { %v3046_v28 = vmul.f32 0.125, %v2918_v16  ;;  %v7510_v30 = vunpack.c.h.bf16 %v8349_v9  ;;  %v5721_v31 = vunpack.c.l.bf16 %v7909_v14  ;;  %v5722_v32 = vunpack.c.h.bf16 %v7909_v14  ;;  %v9061_v59 = vpop.f32.mrf.mxu1 }
 0x1e5   :  { %v3047_v33 = vmul.f32 0.125, %v2919_v21  ;;  %v1825_v36 = vadd.f32 %v6741_v7, %v1440_v22  ;;  %v1826_v37 = vadd.f32 %v6742_v8, %v1441_v23  ;;  %v5977_v38 = vunpack.c.l.bf16 %v7972_v20  ;;  %v7878_v8 = vld [vmem:[#allocation2 + $0xe0] sm:$0xff]  }
 0x1e6   :  { %v5978_v39 = vunpack.c.h.bf16 %v7972_v20  ;;  %v6233_v40 = vunpack.c.l.bf16 %v8035_v26  ;;  %v6234_v41 = vunpack.c.h.bf16 %v8035_v26  ;;  %v6489_v42 = vunpack.c.l.bf16 %v8098_v27  ;;  %v8004_v20 = vld [vmem:[#allocation2 + $0x4e0] sm:$0xff]  }
 0x1e7   :  { %v3147_v44 = vpack.c.bf16 %v3047_v33, %v3046_v28  ;;  %v2210_v45 = vadd.f32 %v6997_v13, %v1825_v36  ;;  %v2211_v46 = vadd.f32 %v6998_v17, %v1826_v37  ;;  %v672_v47 = vadd.f32 %v5977_v38, %v5721_v31  ;;  %v9069_v13 = vpop.f32.mrf.mxu0  ;;  %v8067_v26 = vld [vmem:[#allocation2 + $0x6e0] sm:$0xff]  }
 0x1e8   :  { %v673_v50 = vadd.f32 %v5978_v39, %v5722_v32  ;;  %v6490_v51 = vunpack.c.h.bf16 %v8098_v27  ;;  %v6745_v52 = vunpack.c.l.bf16 %v8161_v34  ;;  %v6746_v53 = vunpack.c.h.bf16 %v8161_v34  ;;  %v8130_v32 = vld [vmem:[#allocation2 + $0x8e0] sm:$0xff]  }
 0x1e9   :  { %8559 = vmatmul.mubr.bf16.gmra.mxu0 %v3147_v44  ;;  %v2595_v55 = vadd.f32 %v7253_v18, %v2210_v45  ;;  %v2596_v56 = vadd.f32 %v7254_v19, %v2211_v46  ;;  %v1057_v57 = vadd.f32 %v6233_v40, %v672_v47  ;;  %v7001_v58 = vunpack.c.l.bf16 %v8224_v43  ;;  %v7941_v19 = vld [vmem:[#allocation2 + $0x2e0] sm:$0xff]  }
 0x1ea   :  { %v1058_v60 = vadd.f32 %v6234_v41, %v673_v50  ;;  %v7002_v61 = vunpack.c.h.bf16 %v8224_v43  ;;  %v7257_v62 = vunpack.c.l.bf16 %v8287_v48  ;;  %v7258_v63 = vunpack.c.h.bf16 %v8287_v48  ;;  %v8193_v34 = vld [vmem:[#allocation2 + $0xae0] sm:$0xff]  }
 0x1eb   :  { %v2980_v0 = vadd.f32 %v7509_v24, %v2595_v55  ;;  %v2981_v2 = vadd.f32 %v7510_v30, %v2596_v56  ;;  %v1442_v6 = vadd.f32 %v6489_v42, %v1057_v57  ;;  %v7513_v7 = vunpack.c.l.bf16 %v9059_v54  ;;  %v8256_v43 = vld [vmem:[#allocation2 + $0xce0] sm:$0xff]  }
 0x1ec   :  { %v1443_v9 = vadd.f32 %v6490_v51, %v1058_v60  ;;  %v7514_v10 = vunpack.c.h.bf16 %v9059_v54  ;;  %v3857_v11 = vmul.f32 %v9051_v15, %v9051_v15  ;;  %v3860_v12 = vmul.f32 %v9055_v35, %v9055_v35  ;;  %v9079_v48 = vld [vmem:[#allocation2 + $0xee0] sm:$0xff]   ;;  %v7879_v54 = vld [vmem:[#allocation2 + $0xe8] sm:$0xff]  }
 0x1ed   :  { %v3108_v14 = vmul.f32 0.125, %v2980_v0  ;;  %v3109_v16 = vmul.f32 0.125, %v2981_v2  ;;  %v1827_v17 = vadd.f32 %v6745_v52, %v1442_v6  ;;  %v3858_v18 = vmul.f32 %v9061_v59, %v9061_v59  ;;  %v7942_v60 = vld [vmem:[#allocation2 + $0x2e8] sm:$0xff]  }
 0x1ee   :  { %v1828_v21 = vadd.f32 %v6746_v53, %v1443_v9  ;;  %4049 = vadd.xlane.f32.xlu0 %v3857_v11  ;;  %4055 = vadd.xlane.f32.xlu1 %v3860_v12  ;;  %v3794_v22 = vmul.f32 %v9049_v1, %v9049_v1  ;;  %v3799_v23 = vmul.f32 %v9053_v29, %v9053_v29  ;;  %v5597_v24 = vunpack.c.l.bf16 %v7878_v8 }
 0x1ef   :  { %v3178_v27 = vpack.c.bf16 %v3109_v16, %v3108_v14  ;;  %v2212_v28 = vadd.f32 %v7001_v58, %v1827_v17  ;;  %v3800_v30 = vmul.f32 %v9069_v13, %v9069_v13  ;;  %v5598_v31 = vunpack.c.h.bf16 %v7878_v8 }
 0x1f0   :  { %v2213_v33 = vadd.f32 %v7002_v61, %v1828_v21  ;;  %v5853_v36 = vunpack.c.l.bf16 %v7941_v19  ;;  %v5854_v37 = vunpack.c.h.bf16 %v7941_v19  ;;  %v6109_v38 = vunpack.c.l.bf16 %v8004_v20  ;;  %v8005_v61 = vld [vmem:[#allocation2 + $0x4e8] sm:$0xff]  }
 0x1f1   :  { %8622 = vmatprep.mubr.bf16.mxu1 %v3178_v27  ;;  %v2597_v39 = vadd.f32 %v7257_v62, %v2212_v28  ;;  %v6110_v40 = vunpack.c.h.bf16 %v8004_v20  ;;  %v6365_v41 = vunpack.c.l.bf16 %v8067_v26  ;;  %v6366_v42 = vunpack.c.h.bf16 %v8067_v26  ;;  %v9081_v62 = vpop.f32.mrf.mxu1 }
 0x1f2   :  { %v2598_v44 = vadd.f32 %v7258_v63, %v2213_v33  ;;  %4051 = vadd.xlane.f32.xlu1 %v3858_v18  ;;  %3923 = vadd.xlane.f32.xlu0 %v3794_v22  ;;  %v610_v45 = vadd.f32 %v5853_v36, %v5597_v24  ;;  %v611_v46 = vadd.f32 %v5854_v37, %v5598_v31  ;;  %v6621_v47 = vunpack.c.l.bf16 %v8130_v32  ;;  %v8131_v18 = vld [vmem:[#allocation2 + $0x8e8] sm:$0xff]  }
 0x1f3   :  { %v2982_v50 = vadd.f32 %v7513_v7, %v2597_v39  ;;  %v6622_v51 = vunpack.c.h.bf16 %v8130_v32  ;;  %v6877_v52 = vunpack.c.l.bf16 %v8193_v34  ;;  %v6878_v53 = vunpack.c.h.bf16 %v8193_v34  ;;  %v8194_v24 = vld [vmem:[#allocation2 + $0xae8] sm:$0xff]   ;;  %v9085_v26 = vpop.f32.mrf.mxu1 }
 0x1f4   :  { %v2983_v55 = vadd.f32 %v7514_v10, %v2598_v44  ;;  %v995_v56 = vadd.f32 %v6109_v38, %v610_v45  ;;  %v996_v57 = vadd.f32 %v6110_v40, %v611_v46  ;;  %v7133_v58 = vunpack.c.l.bf16 %v8256_v43  ;;  %v8068_v10 = vld [vmem:[#allocation2 + $0x6e8] sm:$0xff]   ;;  %v7910_v46 = vld [vmem:[#allocation2 + $0x1e0] sm:$0xff]  }
 0x1f5   :  { %v3110_v63 = vmul.f32 0.125, %v2982_v50  ;;  %v7134_v0 = vunpack.c.h.bf16 %v8256_v43  ;;  %v7389_v2 = vunpack.c.l.bf16 %v9079_v48  ;;  %v7390_v6 = vunpack.c.h.bf16 %v9079_v48  ;;  %v8257_v31 = vld [vmem:[#allocation2 + $0xce8] sm:$0xff]  }
 0x1f6   :  { %v3111_v8 = vmul.f32 0.125, %v2983_v55  ;;  %3933 = vadd.xlane.f32.xlu0 %v3799_v23  ;;  %3935 = vadd.xlane.f32.xlu1 %v3800_v30  ;;  %v1380_v7 = vadd.f32 %v6365_v41, %v995_v56  ;;  %v1381_v9 = vadd.f32 %v6366_v42, %v996_v57  ;;  %v5601_v11 = vunpack.c.l.bf16 %v7879_v54  ;;  %v8320_v38 = vld [vmem:[#allocation2 + $0xee8] sm:$0xff]  }
 0x1f7   :  { %v5602_v12 = vunpack.c.h.bf16 %v7879_v54  ;;  %v5857_v14 = vunpack.c.l.bf16 %v7942_v60  ;;  %v5858_v16 = vunpack.c.h.bf16 %v7942_v60  ;;  %v6113_v17 = vunpack.c.l.bf16 %v8005_v61 }
 0x1f8   :  { %v3179_v19 = vpack.c.bf16 %v3111_v8, %v3110_v63  ;;  %v1765_v20 = vadd.f32 %v6621_v47, %v1380_v7  ;;  %v1766_v21 = vadd.f32 %v6622_v51, %v1381_v9  ;;  %v6114_v22 = vunpack.c.h.bf16 %v8005_v61  ;;  %v9087_v47 = vpop.f32.mrf.mxu1  ;;  %v8099_v8 = vld [vmem:[#allocation2 + $0x7e0] sm:$0xff]  }
 0x1f9   :  { %v612_v27 = vadd.f32 %v5857_v14, %v5601_v11  ;;  %v613_v28 = vadd.f32 %v5858_v16, %v5602_v12  ;;  %v6369_v23 = vunpack.c.l.bf16 %v8068_v10  ;;  %v6370_v30 = vunpack.c.h.bf16 %v8068_v10 }
 0x1fa   :  { %8623 = vmatmul.mubr.bf16.gmra.mxu1 %v3179_v19  ;;  %v2150_v32 = vadd.f32 %v6877_v52, %v1765_v20  ;;  %v2151_v33 = vadd.f32 %v6878_v53, %v1766_v21  ;;  %v6625_v36 = vunpack.c.l.bf16 %v8131_v18  ;;  %v6626_v37 = vunpack.c.h.bf16 %v8131_v18  ;;  %v7973_v52 = vld [vmem:[#allocation2 + $0x3e0] sm:$0xff]  }
 0x1fb   :  { %v997_v34 = vadd.f32 %v6113_v17, %v612_v27  ;;  %v998_v39 = vadd.f32 %v6114_v22, %v613_v28  ;;  %v6881_v40 = vunpack.c.l.bf16 %v8194_v24  ;;  %v6882_v41 = vunpack.c.h.bf16 %v8194_v24  ;;  %v8225_v17 = vld [vmem:[#allocation2 + $0xbe0] sm:$0xff]  }
 0x1fc   :  { %v2535_v42 = vadd.f32 %v7133_v58, %v2150_v32  ;;  %v2536_v43 = vadd.f32 %v7134_v0, %v2151_v33  ;;  %v7137_v44 = vunpack.c.l.bf16 %v8257_v31  ;;  %v7138_v45 = vunpack.c.h.bf16 %v8257_v31  ;;  %v8036_v58 = vld [vmem:[#allocation2 + $0x5e0] sm:$0xff]  }
 0x1fd   :  { %v1382_v48 = vadd.f32 %v6369_v23, %v997_v34  ;;  %v1383_v50 = vadd.f32 %v6370_v30, %v998_v39  ;;  %v7393_v51 = vunpack.c.l.bf16 %v8320_v38  ;;  %v7394_v54 = vunpack.c.h.bf16 %v8320_v38  ;;  %v8288_v22 = vld [vmem:[#allocation2 + $0xde0] sm:$0xff]  }
 0x1fe   :  { %v2920_v53 = vadd.f32 %v7389_v2, %v2535_v42  ;;  %v2921_v55 = vadd.f32 %v7390_v6, %v2536_v43  ;;  %v3863_v56 = vmul.f32 %v9081_v62, %v9081_v62  ;;  %v3864_v57 = vmul.f32 %v9087_v47, %v9087_v47  ;;  %v8162_v2 = vld [vmem:[#allocation2 + $0x9e0] sm:$0xff]  }
 0x1ff   :  { %v1767_v60 = vadd.f32 %v6625_v36, %v1382_v48  ;;  %v1768_v61 = vadd.f32 %v6626_v37, %v1383_v50  ;;  %v5725_v63 = vunpack.c.l.bf16 %v7910_v46  ;;  %v5726_v0 = vunpack.c.h.bf16 %v7910_v46  ;;  %v8351_v30 = vld [vmem:[#allocation2 + $0xfe0] sm:$0xff]   ;;  %v7911_v37 = vld [vmem:[#allocation2 + $0x1e8] sm:$0xff]  }
 0x200   :  { %v3048_v7 = vmul.f32 0.125, %v2920_v53  ;;  %v3049_v9 = vmul.f32 0.125, %v2921_v55  ;;  %4061 = vadd.xlane.f32.xlu0 %v3863_v56  ;;  %4063 = vadd.xlane.f32.xlu1 %v3864_v57  ;;  %v5981_v11 = vunpack.c.l.bf16 %v7973_v52  ;;  %v5982_v10 = vunpack.c.h.bf16 %v7973_v52  ;;  %v8100_v56 = vld [vmem:[#allocation2 + $0x7e8] sm:$0xff]  }
 0x201   :  { %v2152_v6 = vadd.f32 %v6881_v40, %v1767_v60  ;;  %v2153_v12 = vadd.f32 %v6882_v41, %v1768_v61  ;;  %v6237_v14 = vunpack.c.l.bf16 %v8036_v58  ;;  %v6238_v16 = vunpack.c.h.bf16 %v8036_v58  ;;  %v7974_v41 = vld [vmem:[#allocation2 + $0x3e8] sm:$0xff]  }
 0x202   :  { %v3148_v18 = vpack.c.bf16 %v3049_v9, %v3048_v7  ;;  %v674_v19 = vadd.f32 %v5981_v11, %v5725_v63  ;;  %v675_v20 = vadd.f32 %v5982_v10, %v5726_v0  ;;  %v6493_v21 = vunpack.c.l.bf16 %v8099_v8  ;;  %v8226_v9 = vld [vmem:[#allocation2 + $0xbe8] sm:$0xff]  }
 0x203   :  { %v2537_v24 = vadd.f32 %v7137_v44, %v2152_v6  ;;  %v2538_v27 = vadd.f32 %v7138_v45, %v2153_v12  ;;  %v6494_v28 = vunpack.c.h.bf16 %v8099_v8  ;;  %v6749_v23 = vunpack.c.l.bf16 %v8162_v2  ;;  %v8037_v44 = vld [vmem:[#allocation2 + $0x5e8] sm:$0xff]   ;;  %v9093_v45 = vpop.f32.mrf.mxu0 }
 0x204   :  { %8562 = vmatprep.mubr.bf16.mxu0 %v3148_v18  ;;  %v1059_v31 = vadd.f32 %v6237_v14, %v674_v19  ;;  %v1060_v32 = vadd.f32 %v6238_v16, %v675_v20  ;;  %v6750_v33 = vunpack.c.h.bf16 %v8162_v2  ;;  %v7005_v36 = vunpack.c.l.bf16 %v8225_v17  ;;  %v8289_v12 = vld [vmem:[#allocation2 + $0xde8] sm:$0xff]  }
 0x205   :  { %v2922_v38 = vadd.f32 %v7393_v51, %v2537_v24  ;;  %v2923_v34 = vadd.f32 %v7394_v54, %v2538_v27  ;;  %v7006_v39 = vunpack.c.h.bf16 %v8225_v17  ;;  %v7261_v40 = vunpack.c.l.bf16 %v8288_v22  ;;  %v8163_v54 = vld [vmem:[#allocation2 + $0x9e8] sm:$0xff]   ;;  %v9095_v61 = vpop.f32.mrf.mxu0 }
 0x206   :  { %v1444_v42 = vadd.f32 %v6493_v21, %v1059_v31  ;;  %v1445_v43 = vadd.f32 %v6494_v28, %v1060_v32  ;;  %v7262_v46 = vunpack.c.h.bf16 %v8288_v22  ;;  %v7517_v48 = vunpack.c.l.bf16 %v8351_v30  ;;  %v9097_v19 = vld [vmem:[#allocation2 + $0xfe8] sm:$0xff]   ;;  %v9101_v32 = vpop.f32.mrf.mxu1 }
 0x207   :  { %v3050_v50 = vmul.f32 0.125, %v2922_v38  ;;  %v3051_v52 = vmul.f32 0.125, %v2923_v34  ;;  %v7518_v53 = vunpack.c.h.bf16 %v8351_v30  ;;  %v5729_v55 = vunpack.c.l.bf16 %v7911_v37  ;;  %v9099_v27 = vpop.f32.mrf.mxu0  ;;  %v7880_v34 = vld [vmem:[#allocation2 + $0xf0] sm:$0xff]  }
 0x208   :  { %v1829_v57 = vadd.f32 %v6749_v23, %v1444_v42  ;;  %v1830_v58 = vadd.f32 %v6750_v33, %v1445_v43  ;;  %v5730_v60 = vunpack.c.h.bf16 %v7911_v37  ;;  %v5985_v51 = vunpack.c.l.bf16 %v7974_v41 }
 0x209   :  { %v3149_v63 = vpack.c.bf16 %v3051_v52, %v3050_v50  ;;  %v5986_v0 = vunpack.c.h.bf16 %v7974_v41  ;;  %v6241_v8 = vunpack.c.l.bf16 %v8037_v44  ;;  %v6242_v7 = vunpack.c.h.bf16 %v8037_v44  ;;  %v7943_v50 = vld [vmem:[#allocation2 + $0x2f0] sm:$0xff]  }
 0x20a   :  { %v2214_v11 = vadd.f32 %v7005_v36, %v1829_v57  ;;  %v2215_v10 = vadd.f32 %v7006_v39, %v1830_v58  ;;  %v676_v2 = vadd.f32 %v5985_v51, %v5729_v55  ;;  %v6497_v6 = vunpack.c.l.bf16 %v8100_v56  ;;  %v8006_v52 = vld [vmem:[#allocation2 + $0x4f0] sm:$0xff]  }
 0x20b   :  { %8563 = vmatmul.mubr.bf16.gmra.mxu0 %v3149_v63  ;;  %v677_v14 = vadd.f32 %v5986_v0, %v5730_v60  ;;  %v6498_v16 = vunpack.c.h.bf16 %v8100_v56  ;;  %v6753_v17 = vunpack.c.l.bf16 %v8163_v54  ;;  %v6754_v18 = vunpack.c.h.bf16 %v8163_v54  ;;  %v8069_v60 = vld [vmem:[#allocation2 + $0x6f0] sm:$0xff]  }
 0x20c   :  { %v2599_v20 = vadd.f32 %v7261_v40, %v2214_v11  ;;  %v2600_v21 = vadd.f32 %v7262_v46, %v2215_v10  ;;  %v1061_v22 = vadd.f32 %v6241_v8, %v676_v2  ;;  %v7009_v24 = vunpack.c.l.bf16 %v8226_v9  ;;  %v8132_v8 = vld [vmem:[#allocation2 + $0x8f0] sm:$0xff]  }
 0x20d   :  { %v1062_v28 = vadd.f32 %v6242_v7, %v677_v14  ;;  %v7010_v23 = vunpack.c.h.bf16 %v8226_v9  ;;  %v7265_v30 = vunpack.c.l.bf16 %v8289_v12  ;;  %v7266_v31 = vunpack.c.h.bf16 %v8289_v12  ;;  %v8195_v2 = vld [vmem:[#allocation2 + $0xaf0] sm:$0xff]  }
 0x20e   :  { %v2984_v33 = vadd.f32 %v7517_v48, %v2599_v20  ;;  %v2985_v36 = vadd.f32 %v7518_v53, %v2600_v21  ;;  %v1446_v37 = vadd.f32 %v6497_v6, %v1061_v22  ;;  %v7521_v38 = vunpack.c.l.bf16 %v9097_v19  ;;  %v9111_v53 = vpop.f32.mrf.mxu0  ;;  %v9119_v22 = vld [vmem:[#allocation2 + $0xef0] sm:$0xff]  }
 0x20f   :  { %v1447_v39 = vadd.f32 %v6498_v16, %v1062_v28  ;;  %v7522_v40 = vunpack.c.h.bf16 %v9097_v19  ;;  %v3797_v41 = vmul.f32 %v9057_v49, %v9057_v49  ;;  %v3798_v42 = vmul.f32 %v9093_v45, %v9093_v45 }
 0x210   :  { %v3112_v43 = vmul.f32 0.125, %v2984_v33  ;;  %v3113_v46 = vmul.f32 0.125, %v2985_v36  ;;  %v1831_v44 = vadd.f32 %v6753_v17, %v1446_v37  ;;  %v3861_v48 = vmul.f32 %v9085_v26, %v9085_v26  ;;  %v8258_v17 = vld [vmem:[#allocation2 + $0xcf0] sm:$0xff]   ;;  %v7881_v36 = vld [vmem:[#allocation2 + $0xf8] sm:$0xff]  }
 0x211   :  { %v1832_v55 = vadd.f32 %v6754_v18, %v1447_v39  ;;  %3929 = vadd.xlane.f32.xlu0 %v3797_v41  ;;  %3931 = vadd.xlane.f32.xlu1 %v3798_v42  ;;  %v3862_v56 = vmul.f32 %v9101_v32, %v9101_v32  ;;  %v3803_v57 = vmul.f32 %v9095_v61, %v9095_v61  ;;  %v5605_v58 = vunpack.c.l.bf16 %v7880_v34  ;;  %v7944_v41 = vld [vmem:[#allocation2 + $0x2f8] sm:$0xff]  }
 0x212   :  { %v3180_v51 = vpack.c.bf16 %v3113_v46, %v3112_v43  ;;  %v2216_v54 = vadd.f32 %v7009_v24, %v1831_v44  ;;  %v3804_v63 = vmul.f32 %v9111_v53, %v9111_v53  ;;  %v5606_v0 = vunpack.c.h.bf16 %v7880_v34  ;;  %v8007_v42 = vld [vmem:[#allocation2 + $0x4f8] sm:$0xff]   ;;  %v9121_v43 = vpop.f32.mrf.mxu1 }
 0x213   :  { %v2217_v7 = vadd.f32 %v7010_v23, %v1832_v55  ;;  %v5861_v9 = vunpack.c.l.bf16 %v7943_v50  ;;  %v5862_v11 = vunpack.c.h.bf16 %v7943_v50  ;;  %v6117_v10 = vunpack.c.l.bf16 %v8006_v52 }
 0x214   :  { %8626 = vmatprep.mubr.bf16.mxu1 %v3180_v51  ;;  %v2601_v6 = vadd.f32 %v7265_v30, %v2216_v54  ;;  %v6118_v12 = vunpack.c.h.bf16 %v8006_v52  ;;  %v6373_v14 = vunpack.c.l.bf16 %v8069_v60  ;;  %v6374_v16 = vunpack.c.h.bf16 %v8069_v60  ;;  %v8133_v54 = vld [vmem:[#allocation2 + $0x8f8] sm:$0xff]  }
 0x215   :  { %v2602_v18 = vadd.f32 %v7266_v31, %v2217_v7  ;;  %4057 = vadd.xlane.f32.xlu0 %v3861_v48  ;;  %4059 = vadd.xlane.f32.xlu1 %v3862_v56  ;;  %v614_v19 = vadd.f32 %v5861_v9, %v5605_v58  ;;  %v615_v20 = vadd.f32 %v5862_v11, %v5606_v0  ;;  %v6629_v21 = vunpack.c.l.bf16 %v8132_v8  ;;  %v8196_v11 = vld [vmem:[#allocation2 + $0xaf8] sm:$0xff]  }
 0x216   :  { %v2986_v24 = vadd.f32 %v7521_v38, %v2601_v6  ;;  %v6630_v28 = vunpack.c.h.bf16 %v8132_v8  ;;  %v6885_v23 = vunpack.c.l.bf16 %v8195_v2  ;;  %v6886_v33 = vunpack.c.h.bf16 %v8195_v2 }
 0x217   :  { %v2987_v37 = vadd.f32 %v7522_v40, %v2602_v18  ;;  %v999_v34 = vadd.f32 %v6117_v10, %v614_v19  ;;  %v1000_v30 = vadd.f32 %v6118_v12, %v615_v20  ;;  %v7141_v39 = vunpack.c.l.bf16 %v8258_v17  ;;  %v8070_v40 = vld [vmem:[#allocation2 + $0x6f8] sm:$0xff]   ;;  %v9125_v10 = vpop.f32.mrf.mxu1 }
 0x218   :  { %v3114_v31 = vmul.f32 0.125, %v2986_v24  ;;  %v7142_v46 = vunpack.c.h.bf16 %v8258_v17  ;;  %v7397_v44 = vunpack.c.l.bf16 %v9119_v22  ;;  %v7398_v48 = vunpack.c.h.bf16 %v9119_v22  ;;  %v8259_v12 = vld [vmem:[#allocation2 + $0xcf8] sm:$0xff]  }
 0x219   :  { %v3115_v50 = vmul.f32 0.125, %v2987_v37  ;;  %3941 = vadd.xlane.f32.xlu0 %v3803_v57  ;;  %3943 = vadd.xlane.f32.xlu1 %v3804_v63  ;;  %v1384_v38 = vadd.f32 %v6373_v14, %v999_v34  ;;  %v1385_v52 = vadd.f32 %v6374_v16, %v1000_v30  ;;  %v5609_v55 = vunpack.c.l.bf16 %v7881_v36  ;;  %v8322_v19 = vld [vmem:[#allocation2 + $0xef8] sm:$0xff]   ;;  %v7912_v30 = vld [vmem:[#allocation2 + $0x1f0] sm:$0xff]  }
 0x21a   :  { %v5610_v56 = vunpack.c.h.bf16 %v7881_v36  ;;  %v5865_v58 = vunpack.c.l.bf16 %v7944_v41  ;;  %v5866_v60 = vunpack.c.h.bf16 %v7944_v41  ;;  %v6121_v51 = vunpack.c.l.bf16 %v8007_v42  ;;  %v9127_v41 = vpop.f32.mrf.mxu1 }
 0x21b   :  { %v3181_v0 = vpack.c.bf16 %v3115_v50, %v3114_v31  ;;  %v1769_v8 = vadd.f32 %v6629_v21, %v1384_v38  ;;  %v1770_v7 = vadd.f32 %v6630_v28, %v1385_v52  ;;  %v6122_v9 = vunpack.c.h.bf16 %v8007_v42 }
 0x21c   :  { %v616_v2 = vadd.f32 %v5865_v58, %v5609_v55  ;;  %v617_v6 = vadd.f32 %v5866_v60, %v5610_v56  ;;  %v6377_v57 = vunpack.c.l.bf16 %v8070_v40  ;;  %v6378_v63 = vunpack.c.h.bf16 %v8070_v40 }
 0x21d   :  { %8627 = vmatmul.mubr.bf16.gmra.mxu1 %v3181_v0  ;;  %v2154_v14 = vadd.f32 %v6885_v23, %v1769_v8  ;;  %v2155_v16 = vadd.f32 %v6886_v33, %v1770_v7  ;;  %v6633_v17 = vunpack.c.l.bf16 %v8133_v54  ;;  %v6634_v18 = vunpack.c.h.bf16 %v8133_v54  ;;  %v7975_v23 = vld [vmem:[#allocation2 + $0x3f0] sm:$0xff]  }
 0x21e   :  { %v1001_v20 = vadd.f32 %v6121_v51, %v616_v2  ;;  %v1002_v22 = vadd.f32 %v6122_v9, %v617_v6  ;;  %v6889_v24 = vunpack.c.l.bf16 %v8196_v11  ;;  %v6890_v21 = vunpack.c.h.bf16 %v8196_v11  ;;  %v8101_v51 = vld [vmem:[#allocation2 + $0x7f0] sm:$0xff]  }
 0x21f   :  { %v2539_v28 = vadd.f32 %v7141_v39, %v2154_v14  ;;  %v2540_v36 = vadd.f32 %v7142_v46, %v2155_v16  ;;  %v7145_v37 = vunpack.c.l.bf16 %v8259_v12  ;;  %v7146_v34 = vunpack.c.h.bf16 %v8259_v12  ;;  %v8038_v39 = vld [vmem:[#allocation2 + $0x5f0] sm:$0xff]  }
 0x220   :  { %v1386_v42 = vadd.f32 %v6377_v57, %v1001_v20  ;;  %v1387_v31 = vadd.f32 %v6378_v63, %v1002_v22  ;;  %v7401_v50 = vunpack.c.l.bf16 %v8322_v19  ;;  %v7402_v38 = vunpack.c.h.bf16 %v8322_v19  ;;  %v8227_v6 = vld [vmem:[#allocation2 + $0xbf0] sm:$0xff]  }
 0x221   :  { %v2924_v33 = vadd.f32 %v7397_v44, %v2539_v28  ;;  %v2925_v52 = vadd.f32 %v7398_v48, %v2540_v36  ;;  %v3867_v55 = vmul.f32 %v9121_v43, %v9121_v43  ;;  %v3868_v40 = vmul.f32 %v9127_v41, %v9127_v41  ;;  %v8164_v44 = vld [vmem:[#allocation2 + $0x9f0] sm:$0xff]  }
 0x222   :  { %v1771_v46 = vadd.f32 %v6633_v17, %v1386_v42  ;;  %v1772_v56 = vadd.f32 %v6634_v18, %v1387_v31  ;;  %v5733_v58 = vunpack.c.l.bf16 %v7912_v30  ;;  %v5734_v60 = vunpack.c.h.bf16 %v7912_v30  ;;  %v8290_v16 = vld [vmem:[#allocation2 + $0xdf0] sm:$0xff]  }
 0x223   :  { %v3052_v54 = vmul.f32 0.125, %v2924_v33  ;;  %v3053_v0 = vmul.f32 0.125, %v2925_v52  ;;  %4069 = vadd.xlane.f32.xlu0 %v3867_v55  ;;  %4071 = vadd.xlane.f32.xlu1 %v3868_v40  ;;  %v5989_v8 = vunpack.c.l.bf16 %v7975_v23  ;;  %v5990_v7 = vunpack.c.h.bf16 %v7975_v23  ;;  %v8353_v22 = vld [vmem:[#allocation2 + $0xff0] sm:$0xff]   ;;  %v7913_v52 = vld [vmem:[#allocation2 + $0x1f8] sm:$0xff]  }
 0x224   :  { %v2156_v48 = vadd.f32 %v6889_v24, %v1771_v46  ;;  %v2157_v9 = vadd.f32 %v6890_v21, %v1772_v56  ;;  %v6245_v11 = vunpack.c.l.bf16 %v8038_v39  ;;  %v6246_v2 = vunpack.c.h.bf16 %v8038_v39  ;;  %v9133_v24 = vpop.f32.mrf.mxu0 }
 0x225   :  { %v3150_v57 = vpack.c.bf16 %v3053_v0, %v3052_v54  ;;  %v678_v63 = vadd.f32 %v5989_v8, %v5733_v58  ;;  %v679_v12 = vadd.f32 %v5990_v7, %v5734_v60  ;;  %v6501_v14 = vunpack.c.l.bf16 %v8101_v51  ;;  %v8102_v8 = vld [vmem:[#allocation2 + $0x7f8] sm:$0xff]  }
 0x226   :  { %v2541_v17 = vadd.f32 %v7145_v37, %v2156_v48  ;;  %v2542_v18 = vadd.f32 %v7146_v34, %v2157_v9  ;;  %v6502_v19 = vunpack.c.h.bf16 %v8101_v51  ;;  %v6757_v20 = vunpack.c.l.bf16 %v8164_v44  ;;  %v7976_v34 = vld [vmem:[#allocation2 + $0x3f8] sm:$0xff]  }
 0x227   :  { %8566 = vmatprep.mubr.bf16.mxu0 %v3150_v57  ;;  %v1063_v28 = vadd.f32 %v6245_v11, %v678_v63  ;;  %v1064_v36 = vadd.f32 %v6246_v2, %v679_v12  ;;  %v6758_v30 = vunpack.c.h.bf16 %v8164_v44  ;;  %v7013_v42 = vunpack.c.l.bf16 %v8227_v6  ;;  %v8039_v51 = vld [vmem:[#allocation2 + $0x5f8] sm:$0xff]   ;;  %v9139_v12 = vpop.f32.mrf.mxu0 }
 0x228   :  { %v2926_v21 = vadd.f32 %v7401_v50, %v2541_v17  ;;  %v2927_v31 = vadd.f32 %v7402_v38, %v2542_v18  ;;  %v7014_v23 = vunpack.c.h.bf16 %v8227_v6  ;;  %v7269_v33 = vunpack.c.l.bf16 %v8290_v16  ;;  %v8165_v63 = vld [vmem:[#allocation2 + $0x9f8] sm:$0xff]  }
 0x229   :  { %v1448_v55 = vadd.f32 %v6501_v14, %v1063_v28  ;;  %v1449_v40 = vadd.f32 %v6502_v19, %v1064_v36  ;;  %v7270_v39 = vunpack.c.h.bf16 %v8290_v16  ;;  %v7525_v37 = vunpack.c.l.bf16 %v8353_v22  ;;  %v9141_v28 = vpop.f32.mrf.mxu1 }
 0x22a   :  { %v3054_v46 = vmul.f32 0.125, %v2926_v21  ;;  %v3055_v56 = vmul.f32 0.125, %v2927_v31  ;;  %v7526_v58 = vunpack.c.h.bf16 %v8353_v22  ;;  %v3801_v60 = vmul.f32 %v9099_v27, %v9099_v27  ;;  %v8228_v22 = vld [vmem:[#allocation2 + $0xbf8] sm:$0xff]  }
 0x22b   :  { %v1833_v54 = vadd.f32 %v6757_v20, %v1448_v55  ;;  %v1834_v0 = vadd.f32 %v6758_v30, %v1449_v40  ;;  %v3802_v50 = vmul.f32 %v9133_v24, %v9133_v24  ;;  %v5737_v38 = vunpack.c.l.bf16 %v7913_v52  ;;  %v9143_v55 = vpop.f32.mrf.mxu0  ;;  %v9145_v40 = vpop.f32.mrf.mxu1 }
 0x22c   :  { %v3151_v7 = vpack.c.bf16 %v3055_v56, %v3054_v46  ;;  %3937 = vadd.xlane.f32.xlu0 %v3801_v60  ;;  %v5738_v44 = vunpack.c.h.bf16 %v7913_v52  ;;  %v5993_v48 = vunpack.c.l.bf16 %v7976_v34  ;;  %v5994_v9 = vunpack.c.h.bf16 %v7976_v34  ;;  %v8291_v52 = vld [vmem:[#allocation2 + $0xdf8] sm:$0xff]  }
 0x22d   :  { %v2218_v11 = vadd.f32 %v7013_v42, %v1833_v54  ;;  %v2219_v2 = vadd.f32 %v7014_v23, %v1834_v0  ;;  %3939 = vadd.xlane.f32.xlu1 %v3802_v50  ;;  %v6249_v6 = vunpack.c.l.bf16 %v8039_v51  ;;  %v6250_v57 = vunpack.c.h.bf16 %v8039_v51  ;;  %v8354_v51 = vld [vmem:[#allocation2 + $0xff8] sm:$0xff]  }
 0x22e   :  { %8567 = vmatmul.mubr.bf16.gmra.mxu0 %v3151_v7  ;;  %v680_v14 = vadd.f32 %v5993_v48, %v5737_v38  ;;  %v681_v16 = vadd.f32 %v5994_v9, %v5738_v44  ;;  %v6505_v17 = vunpack.c.l.bf16 %v8102_v8  ;;  %v6506_v18 = vunpack.c.h.bf16 %v8102_v8  ;;  %v9151_v7 = vpop.f32.mrf.mxu0  ;;  %v9153_v44 = vpop.f32.mrf.mxu1 }
 0x22f   :  { %v2603_v19 = vadd.f32 %v7269_v33, %v2218_v11  ;;  %v2604_v20 = vadd.f32 %v7270_v39, %v2219_v2  ;;  %v6761_v42 = vunpack.c.l.bf16 %v8165_v63  ;;  %v6762_v21 = vunpack.c.h.bf16 %v8165_v63 }
 0x230   :  { %v1065_v36 = vadd.f32 %v6249_v6, %v680_v14  ;;  %v1066_v30 = vadd.f32 %v6250_v57, %v681_v16  ;;  %v7017_v56 = vunpack.c.l.bf16 %v8228_v22  ;;  %v7018_v60 = vunpack.c.h.bf16 %v8228_v22  ;;  %v9165_v22 = vpop.f32.mrf.mxu0 }
 0x231   :  { %v2988_v31 = vadd.f32 %v7525_v37, %v2603_v19  ;;  %v2989_v23 = vadd.f32 %v7526_v58, %v2604_v20  ;;  %v3865_v54 = vmul.f32 %v9125_v10, %v9125_v10  ;;  %v3866_v0 = vmul.f32 %v9141_v28, %v9141_v28 }
 0x232   :  { %v1450_v34 = vadd.f32 %v6505_v17, %v1065_v36  ;;  %v1451_v46 = vadd.f32 %v6506_v18, %v1066_v30  ;;  %v7273_v50 = vunpack.c.l.bf16 %v8291_v52  ;;  %v7274_v38 = vunpack.c.h.bf16 %v8291_v52  ;;  %v9159_v18 = vpop.f32.mrf.mxu1 }
 0x233   :  { %v3116_v33 = vmul.f32 0.125, %v2988_v31  ;;  %v3117_v39 = vmul.f32 0.125, %v2989_v23  ;;  %4065 = vadd.xlane.f32.xlu0 %v3865_v54  ;;  %4067 = vadd.xlane.f32.xlu1 %v3866_v0  ;;  %v7529_v11 = vunpack.c.l.bf16 %v8354_v51  ;;  %v7530_v2 = vunpack.c.h.bf16 %v8354_v51 }
 0x234   :  { %v1835_v37 = vadd.f32 %v6761_v42, %v1450_v34  ;;  %v1836_v58 = vadd.f32 %v6762_v21, %v1451_v46  ;;  %v3807_v6 = vmul.f32 %v9139_v12, %v9139_v12  ;;  %v3808_v57 = vmul.f32 %v9151_v7, %v9151_v7  ;;  %v9167_v21 = vpop.f32.mrf.mxu0  ;;  %v9173_v52 = vpop.f32.mrf.mxu1 }
 0x235   :  { %v3182_v8 = vpack.c.bf16 %v3117_v39, %v3116_v33  ;;  %v3871_v19 = vmul.f32 %v9145_v40, %v9145_v40  ;;  %v3872_v20 = vmul.f32 %v9159_v18, %v9159_v18  ;;  %v3805_v31 = vmul.f32 %v9143_v55, %v9143_v55 }
 0x236   :  { %v2220_v48 = vadd.f32 %v7017_v56, %v1835_v37  ;;  %v2221_v9 = vadd.f32 %v7018_v60, %v1836_v58  ;;  %v3806_v23 = vmul.f32 %v9165_v22, %v9165_v22  ;;  %v9175_v34 = vpop.f32.mrf.mxu0  ;;  %v9177_v46 = vpop.f32.mrf.mxu1  ;;  %v3869_v56 = vmul.f32 %v9153_v44, %v9153_v44 }
 0x237   :  { %8630 = vmatprep.mubr.bf16.mxu1 %v3182_v8  ;;  %3949 = vadd.xlane.f32.xlu0 %v3807_v6  ;;  %v3870_v60 = vmul.f32 %v9173_v52, %v9173_v52  ;;  %v3811_v51 = vmul.f32 %v9167_v21, %v9167_v21  ;;  %v3875_v37 = vmul.f32 %v9177_v46, %v9177_v46 }
 0x238   :  { %v2605_v63 = vadd.f32 %v7273_v50, %v2220_v48  ;;  %v2606_v14 = vadd.f32 %v7274_v38, %v2221_v9  ;;  %3951 = vadd.xlane.f32.xlu1 %v3808_v57  ;;  %v9183_v33 = vpop.f32.mrf.mxu0  ;;  %v9185_v39 = vpop.f32.mrf.mxu1  ;;  %v3809_v8 = vmul.f32 %v9175_v34, %v9175_v34 }
 0x239   :  { %v3812_v54 = vmul.f32 %v9183_v33, %v9183_v33  ;;  %v3873_v6 = vmul.f32 %v9185_v39, %v9185_v39 }
 0x23a   :  { %v2990_v16 = vadd.f32 %v7529_v11, %v2605_v63  ;;  %v2991_v17 = vadd.f32 %v7530_v2, %v2606_v14  ;;  %v9191_v0 = vpop.f32.mrf.mxu1  ;;  %v9197_v50 = vpop.f32.mrf.mxu0 }
 0x23b   :  { %4077 = vadd.xlane.f32.xlu0 %v3871_v19  ;;  %v3876_v58 = vmul.f32 %v9191_v0, %v9191_v0  ;;  %v3810_v48 = vmul.f32 %v9197_v50, %v9197_v50 }
 0x23c   :  { %v3118_v36 = vmul.f32 0.125, %v2990_v16  ;;  %v3119_v30 = vmul.f32 0.125, %v2991_v17  ;;  %4079 = vadd.xlane.f32.xlu1 %v3872_v20  ;;  %v9199_v38 = vpop.f32.mrf.mxu0  ;;  %v9205_v9 = vpop.f32.mrf.mxu1 }
 0x23d   :  { %v3874_v57 = vmul.f32 %v9205_v9, %v9205_v9  ;;  %v3815_v16 = vmul.f32 %v9199_v38, %v9199_v38 }
 0x23e   :  { %v3183_v42 = vpack.c.bf16 %v3119_v30, %v3118_v36  ;;  %v9207_v11 = vpop.f32.mrf.mxu0  ;;  %v9209_v2 = vpop.f32.mrf.mxu1 }
 0x23f   :  { %3945 = vadd.xlane.f32.xlu0 %v3805_v31  ;;  %9740 = vst [vmem:[#allocation11_spill] sm:$0xff] %v9207_v11  ;;  %v3879_v36 = vmul.f32 %v9209_v2, %v9209_v2  ;;  %v3813_v31 = vmul.f32 %v9207_v11, %v9207_v11 }
 0x240   :  { %8631 = vmatmul.mubr.bf16.gmra.mxu1 %v3183_v42  ;;  %3947 = vadd.xlane.f32.xlu1 %v3806_v23  ;;  %v9215_v63 = vpop.f32.mrf.mxu0  ;;  %v9217_v14 = vpop.f32.mrf.mxu1 }
 0x241   :  { %9741 = vst [vmem:[#allocation12_spill] sm:$0xff] %v9217_v14  ;;  %v3816_v17 = vmul.f32 %v9215_v63, %v9215_v63 }
 0x242   :  { %v9223_v19 = vpop.f32.mrf.mxu1  ;;  %v9225_v20 = vpop.f32.mrf.mxu0 }
 0x243   :  { %4073 = vadd.xlane.f32.xlu0 %v3869_v56  ;;  %9742 = vst [vmem:[#allocation13_spill] sm:$0xff] %v9223_v19  ;;  %9743 = vst [vmem:[#allocation14_spill] sm:$0xff] %v9225_v20  ;;  %v3880_v30 = vmul.f32 %v9223_v19, %v9223_v19  ;;  %v3814_v23 = vmul.f32 %v9225_v20, %v9225_v20 }
 0x244   :  { %4075 = vadd.xlane.f32.xlu1 %v3870_v60  ;;  %v9231_v42 = vpop.f32.mrf.mxu0  ;;  %v9237_v56 = vpop.f32.mrf.mxu1 }
 0x245   :  { %9744 = vst [vmem:[#allocation15_spill] sm:$0xff] %v9231_v42  ;;  %9745 = vst [vmem:[#allocation16_spill] sm:$0xff] %v9237_v56 }
 0x247   :  { %3957 = vadd.xlane.f32.xlu0 %v3811_v51  ;;  %v9239_v51 = vpop.f32.mrf.mxu0 }
 0x248   :  { %3959 = vadd.xlane.f32.xlu1 %v3812_v54  ;;  %9746 = vst [vmem:[#allocation17_spill] sm:$0xff] %v9239_v51  ;;  %v9241_v54 = vpop.f32.mrf.mxu1 }
 0x249   :  { %9747 = vst [vmem:[#allocation18_spill] sm:$0xff] %v9241_v54 }
 0x24b   :  { %4085 = vadd.xlane.f32.xlu0 %v3875_v37  ;;  %v3877_v37 = vmul.f32 %v9217_v14, %v9217_v14 }
 0x24c   :  { %4087 = vadd.xlane.f32.xlu1 %v3876_v58  ;;  %v3878_v58 = vmul.f32 %v9237_v56, %v9237_v56 }
 0x24f   :  { %3953 = vadd.xlane.f32.xlu0 %v3809_v8 }
 0x250   :  { %3955 = vadd.xlane.f32.xlu1 %v3810_v48  ;;  %v9247_v48 = vpop.f32.mrf.mxu0 }
 0x251   :  { %9748 = vst [vmem:[#allocation19_spill] sm:$0xff] %v9247_v48 }
 0x253   :  { %4081 = vadd.xlane.f32.xlu0 %v3873_v6  ;;  %v9249_v6 = vpop.f32.mrf.mxu1 }
 0x254   :  { %4083 = vadd.xlane.f32.xlu1 %v3874_v57  ;;  %9749 = vst [vmem:[#allocation20_spill] sm:$0xff] %v9249_v6 }
 0x255   :  { %v3926_v60 = vpop.xlane.xlu1 %3925 }
 0x256   :  { %v4179_v8 = vmax.f32 %v3926_v60, 1e-24  ;;  %v4054_v60 = vpop.xlane.xlu0 %4053 }
 0x257   :  { %3965 = vadd.xlane.f32.xlu0 %v3815_v16  ;;  %v3819_v16 = vmul.f32 %v9231_v42, %v9231_v42 }
 0x258   :  { %3967 = vadd.xlane.f32.xlu1 %v3816_v17  ;;  %v3820_v17 = vmul.f32 %v9247_v48, %v9247_v48  ;;  %8663 = vrsqrt.f32 %v4179_v8  ;;  %v3817_v8 = vmul.f32 %v9239_v51, %v9239_v51  ;;  %v4243_v51 = vmax.f32 %v4054_v60, 1e-24 }
 0x25b   :  { %4093 = vadd.xlane.f32.xlu0 %v3879_v36 }
 0x25c   :  { %4095 = vadd.xlane.f32.xlu1 %v3880_v30  ;;  %v9255_v30 = vpop.f32.mrf.mxu1 }
 0x25d   :  { %9750 = vst [vmem:[#allocation21_spill] sm:$0xff] %v9255_v30 }
 0x25f   :  { %3961 = vadd.xlane.f32.xlu0 %v3813_v31  ;;  %v3883_v31 = vmul.f32 %v9241_v54, %v9241_v54 }
 0x260   :  { %3963 = vadd.xlane.f32.xlu1 %v3814_v23  ;;  %v3884_v23 = vmul.f32 %v9255_v30, %v9255_v30 }
 0x263   :  { %4089 = vadd.xlane.f32.xlu0 %v3877_v37  ;;  %v9261_v37 = vpop.f32.mrf.mxu0 }
 0x264   :  { %4091 = vadd.xlane.f32.xlu1 %v3878_v58  ;;  %9751 = vst [vmem:[#allocation22_spill] sm:$0xff] %v9261_v37 }
 0x265   :  { %v9263_v58 = vpop.f32.mrf.mxu0  ;;  %v8664_v54 = vpop.eup %8663 }
 0x266   :  { %v3928_v57 = vpop.xlane.xlu1 %3927  ;;  %9752 = vst [vmem:[#allocation23_spill] sm:$0xff] %v9263_v58  ;;  %v4435_v14 = vmul.f32 %v8664_v54, %v9029_v4 }
 0x267   :  { %v4180_v36 = vmax.f32 %v3928_v57, 1e-24  ;;  %3973 = vadd.xlane.f32.xlu0 %v3819_v16  ;;  %v3818_v57 = vmul.f32 %v9261_v37, %v9261_v37  ;;  %v9269_v16 = vpop.f32.mrf.mxu1 }
 0x268   :  { %3975 = vadd.xlane.f32.xlu1 %v3820_v17  ;;  %9753 = vst [vmem:[#allocation24_spill] sm:$0xff] %v9269_v16  ;;  %v3922_v17 = vpop.xlane.xlu0 %3921 }
 0x269   :  { %8665 = vrsqrt.f32 %v4180_v36  ;;  %v9271_v36 = vpop.f32.mrf.mxu0  ;;  %v9273_v30 = vpop.f32.mrf.mxu1  ;;  %v4177_v60 = vmax.f32 %v3922_v17, 1e-24 }
 0x26a   :  { %8667 = vrsqrt.f32 %v4243_v51 }
 0x26b   :  { %4101 = vadd.xlane.f32.xlu0 %v3883_v31  ;;  %v3881_v31 = vmul.f32 %v9249_v6, %v9249_v6  ;;  %v9279_v37 = vpop.f32.mrf.mxu0  ;;  %v9281_v48 = vpop.f32.mrf.mxu1 }
 0x26c   :  { %4103 = vadd.xlane.f32.xlu1 %v3884_v23  ;;  %v3882_v23 = vmul.f32 %v9269_v16, %v9269_v16  ;;  %9754 = vst [vmem:[#allocation25_spill] sm:$0xff] %v9279_v37  ;;  %9755 = vst [vmem:[#allocation26_spill] sm:$0xff] %v9281_v48  ;;  %v3824_v42 = vmul.f32 %v9279_v37, %v9279_v37 }
 0x26d   :  { %v9289_v20 = vpop.f32.mrf.mxu1  ;;  %v9295_v54 = vpop.f32.mrf.mxu0 }
 0x26e   :  { %v3888_v37 = vmul.f32 %v9289_v20, %v9289_v20  ;;  %9756 = vst [vmem:[#allocation27_spill] sm:$0xff] %v9295_v54  ;;  %v3822_v51 = vmul.f32 %v9295_v54, %v9295_v54 }
 0x26f   :  { %3969 = vadd.xlane.f32.xlu0 %v3817_v8  ;;  %v9303_v17 = vpop.f32.mrf.mxu1 }
 0x270   :  { %3971 = vadd.xlane.f32.xlu1 %v3818_v57  ;;  %v3823_v57 = vmul.f32 %v9263_v58, %v9263_v58  ;;  %v3887_v58 = vmul.f32 %v9273_v30, %v9273_v30  ;;  %9758 = vst [vmem:[#allocation29_spill] sm:$0xff] %v9303_v17 }
 0x273   :  { %4097 = vadd.xlane.f32.xlu0 %v3881_v31 }
 0x274   :  { %4099 = vadd.xlane.f32.xlu1 %v3882_v23 }
 0x276   :  { %v8666_v8 = vpop.eup %8665 }
 0x277   :  { %v4050_v56 = vpop.xlane.xlu0 %4049  ;;  %v4056_v6 = vpop.xlane.xlu1 %4055  ;;  %v4436_v16 = vmul.f32 %v8666_v8, %v9041_v25  ;;  %3981 = vadd.xlane.f32.xlu0 %v3823_v57  ;;  %v3885_v8 = vmul.f32 %v9281_v48, %v9281_v48  ;;  %v3886_v57 = vmul.f32 %v9303_v17, %v9303_v17 }
 0x278   :  { %v4241_v31 = vmax.f32 %v4050_v56, 1e-24  ;;  %v4244_v23 = vmax.f32 %v4056_v6, 1e-24  ;;  %3983 = vadd.xlane.f32.xlu1 %v3824_v42  ;;  %v9297_v56 = vpop.f32.mrf.mxu0 }
 0x279   :  { %v7539_v11 = vpack.c.bf16 %v4436_v16, %v4435_v14  ;;  %9757 = vst [vmem:[#allocation28_spill] sm:$0xff] %v9297_v56  ;;  %v3821_v14 = vmul.f32 %v9271_v36, %v9271_v36 }
 0x27a   :  { %8669 = vrsqrt.f32 %v4244_v23 }
 0x27b   :  { %v4052_v19 = vpop.xlane.xlu1 %4051  ;;  %v3924_v4 = vpop.xlane.xlu0 %3923  ;;  %8355 = vst [vmem:[#allocation7 + $0x8] sm:$0xff] %v7539_v11   ;;  %8671 = vrsqrt.f32 %v4241_v31  ;;  %4109 = vadd.xlane.f32.xlu0 %v3887_v58 }
 0x27c   :  { %v4242_v25 = vmax.f32 %v4052_v19, 1e-24  ;;  %v4178_v42 = vmax.f32 %v3924_v4, 1e-24  ;;  %4111 = vadd.xlane.f32.xlu1 %v3888_v37  ;;  %8673 = vrsqrt.f32 %v4177_v60  ;;  %v9305_v37 = vpop.f32.mrf.mxu0  ;;  %v9307_v58 = vpop.f32.mrf.mxu1  ;;  %v3827_v4 = vmul.f32 %v9297_v56, %v9297_v56 }
 0x27d   :  { %v8668_v31 = vpop.eup %8667  ;;  %v3891_v56 = vmul.f32 %v9307_v58, %v9307_v58 }
 0x27e   :  { %8675 = vrsqrt.f32 %v4242_v25  ;;  %v9313_v23 = vpop.f32.mrf.mxu0  ;;  %v9315_v60 = vpop.f32.mrf.mxu1 }
 0x27f   :  { %8677 = vrsqrt.f32 %v4178_v42  ;;  %v3934_v6 = vpop.xlane.xlu0 %3933  ;;  %v3936_v16 = vpop.xlane.xlu1 %3935  ;;  %3977 = vadd.xlane.f32.xlu0 %v3821_v14  ;;  %9759 = vst [vmem:[#allocation30_spill] sm:$0xff] %v9313_v23  ;;  %v3828_v25 = vmul.f32 %v9313_v23, %v9313_v23 }
 0x280   :  { %v4183_v11 = vmax.f32 %v3934_v6, 1e-24  ;;  %v4184_v19 = vmax.f32 %v3936_v16, 1e-24  ;;  %3979 = vadd.xlane.f32.xlu1 %v3822_v51  ;;  %v4499_v51 = vmul.f32 %v8668_v31, %v9031_v5  ;;  %v9329_v54 = vpop.f32.mrf.mxu0 }
 0x282   :  { %8679 = vrsqrt.f32 %v4183_v11 }
 0x283   :  { %8681 = vrsqrt.f32 %v4184_v19  ;;  %4105 = vadd.xlane.f32.xlu0 %v3885_v8  ;;  %v9323_v8 = vpop.f32.mrf.mxu1 }
 0x284   :  { %4107 = vadd.xlane.f32.xlu1 %v3886_v57  ;;  %v3892_v23 = vmul.f32 %v9323_v8, %v9323_v8 }
 0x287   :  { %v8670_v42 = vpop.eup %8669  ;;  %3989 = vadd.xlane.f32.xlu0 %v3827_v4 }
 0x288   :  { %v8672_v14 = vpop.eup %8671  ;;  %3991 = vadd.xlane.f32.xlu1 %v3828_v25  ;;  %v4500_v6 = vmul.f32 %v8670_v42, %v9055_v35 }
 0x289   :  { %v4062_v16 = vpop.xlane.xlu0 %4061  ;;  %v4064_v11 = vpop.xlane.xlu1 %4063  ;;  %v4497_v5 = vmul.f32 %v8672_v14, %v9051_v15  ;;  %v3825_v15 = vmul.f32 %v9305_v37, %v9305_v37  ;;  %v3889_v14 = vmul.f32 %v9315_v60, %v9315_v60 }
 0x28a   :  { %v8674_v19 = vpop.eup %8673  ;;  %v4247_v57 = vmax.f32 %v4062_v16, 1e-24  ;;  %v4248_v17 = vmax.f32 %v4064_v11, 1e-24  ;;  %v7699_v4 = vpack.c.bf16 %v4500_v6, %v4499_v51  ;;  %v9335_v16 = vpop.f32.mrf.mxu0 }
 0x28b   :  { %v8676_v48 = vpop.eup %8675  ;;  %4117 = vadd.xlane.f32.xlu0 %v3891_v56  ;;  %v4433_v31 = vmul.f32 %v8674_v19, %v9037_v3  ;;  %v9337_v6 = vpop.f32.mrf.mxu1 }
 0x28c   :  { %v8678_v25 = vpop.eup %8677  ;;  %v4498_v35 = vmul.f32 %v8676_v48, %v9061_v59  ;;  %8683 = vrsqrt.f32 %v4247_v57  ;;  %4119 = vadd.xlane.f32.xlu1 %v3892_v23  ;;  %8387 = vst [vmem:[#allocation7 + $0x108] sm:$0xff] %v7699_v4   ;;  %v3826_v59 = vmul.f32 %v9329_v54, %v9329_v54  ;;  %v3890_v19 = vmul.f32 %v9337_v6, %v9337_v6 }
 0x28d   :  { %v4434_v42 = vmul.f32 %v8678_v25, %v9049_v1  ;;  %8685 = vrsqrt.f32 %v4248_v17  ;;  %v9344_v23 = vpop.f32.mrf.mxu1  ;;  %v9347_v17 = vpop.f32.mrf.mxu0  ;;  %v3831_v25 = vmul.f32 %v9335_v16, %v9335_v16 }
 0x28e   :  { %v7694_v11 = vpack.c.bf16 %v4498_v35, %v4497_v5 }
 0x28f   :  { %v8680_v51 = vpop.eup %8679  ;;  %v7534_v48 = vpack.c.bf16 %v4434_v42, %v4433_v31  ;;  %3985 = vadd.xlane.f32.xlu0 %v3825_v15  ;;  %v9353_v4 = vpop.f32.mrf.mxu1  ;;  %v3895_v42 = vmul.f32 %v9344_v23, %v9344_v23 }
 0x290   :  { %v8682_v56 = vpop.eup %8681  ;;  %8386 = vst [vmem:[#allocation7 + $0x100] sm:$0xff] %v7694_v11   ;;  %v4439_v3 = vmul.f32 %v8680_v51, %v9053_v29  ;;  %3987 = vadd.xlane.f32.xlu1 %v3826_v59  ;;  %9760 = vst [vmem:[#allocation31_spill] sm:$0xff] %v9353_v4  ;;  %v9355_v29 = vpop.f32.mrf.mxu0 }
 0x291   :  { %7535 = vst [vmem:[#allocation7] sm:$0xff] %v7534_v48   ;;  %v4440_v1 = vmul.f32 %v8682_v56, %v9069_v13  ;;  %v3832_v13 = vmul.f32 %v9355_v29, %v9355_v29  ;;  %v9361_v35 = vpop.f32.mrf.mxu1 }
 0x292   :  { %v9366_v59 = vpop.f32.mrf.mxu0  ;;  %v3896_v48 = vmul.f32 %v9361_v35, %v9361_v35 }
 0x293   :  { %v7549_v57 = vpack.c.bf16 %v4440_v1, %v4439_v3  ;;  %4113 = vadd.xlane.f32.xlu0 %v3889_v14  ;;  %9761 = vst [vmem:[#allocation32_spill] sm:$0xff] %v9366_v59 }
 0x294   :  { %4115 = vadd.xlane.f32.xlu1 %v3890_v19  ;;  %v9371_v14 = vpop.f32.mrf.mxu0 }
 0x295   :  { %8357 = vst [vmem:[#allocation7 + $0x18] sm:$0xff] %v7549_v57   ;;  %9762 = vst [vmem:[#allocation33_spill] sm:$0xff] %v9371_v14 }
 0x297   :  { %3997 = vadd.xlane.f32.xlu0 %v3831_v25  ;;  %v9373_v25 = vpop.f32.mrf.mxu1 }
 0x298   :  { %3999 = vadd.xlane.f32.xlu1 %v3832_v13  ;;  %9763 = vst [vmem:[#allocation34_spill] sm:$0xff] %v9373_v25  ;;  %v3829_v13 = vmul.f32 %v9347_v17, %v9347_v17 }
 0x299   :  { %v8684_v5 = vpop.eup %8683 }
 0x29a   :  { %v8686_v31 = vpop.eup %8685  ;;  %v4503_v11 = vmul.f32 %v8684_v5, %v9081_v62  ;;  %v3930_v51 = vpop.xlane.xlu0 %3929  ;;  %v3830_v5 = vmul.f32 %v9366_v59, %v9366_v59 }
 0x29b   :  { %v3932_v15 = vpop.xlane.xlu1 %3931  ;;  %v4504_v56 = vmul.f32 %v8686_v31, %v9087_v47  ;;  %v4181_v3 = vmax.f32 %v3930_v51, 1e-24  ;;  %4125 = vadd.xlane.f32.xlu0 %v3895_v42  ;;  %v9379_v51 = vpop.f32.mrf.mxu0 }
 0x29c   :  { %v4182_v1 = vmax.f32 %v3932_v15, 1e-24  ;;  %4127 = vadd.xlane.f32.xlu1 %v3896_v48  ;;  %v9381_v42 = vpop.f32.mrf.mxu1  ;;  %v3893_v48 = vmul.f32 %v9353_v4, %v9353_v4 }
 0x29d   :  { %v7709_v19 = vpack.c.bf16 %v4504_v56, %v4503_v11  ;;  %8687 = vrsqrt.f32 %v4181_v3  ;;  %v3894_v56 = vmul.f32 %v9373_v25, %v9373_v25 }
 0x29e   :  { %8689 = vrsqrt.f32 %v4182_v1  ;;  %v4058_v57 = vpop.xlane.xlu0 %4057 }
 0x29f   :  { %v4060_v62 = vpop.xlane.xlu1 %4059  ;;  %8389 = vst [vmem:[#allocation7 + $0x118] sm:$0xff] %v7709_v19   ;;  %v4245_v47 = vmax.f32 %v4058_v57, 1e-24  ;;  %3993 = vadd.xlane.f32.xlu0 %v3829_v13  ;;  %v9387_v19 = vpop.f32.mrf.mxu0 }
 0x2a0   :  { %v4246_v31 = vmax.f32 %v4060_v62, 1e-24  ;;  %3995 = vadd.xlane.f32.xlu1 %v3830_v5  ;;  %9764 = vst [vmem:[#allocation35_spill] sm:$0xff] %v9387_v19  ;;  %v9389_v57 = vpop.f32.mrf.mxu1  ;;  %v3835_v62 = vmul.f32 %v9371_v14, %v9371_v14  ;;  %v3836_v13 = vmul.f32 %v9387_v19, %v9387_v19 }
 0x2a1   :  { %8691 = vrsqrt.f32 %v4245_v47 }
 0x2a2   :  { %8693 = vrsqrt.f32 %v4246_v31  ;;  %v3942_v11 = vpop.xlane.xlu0 %3941  ;;  %v9395_v47 = vpop.f32.mrf.mxu1 }
 0x2a3   :  { %v3944_v15 = vpop.xlane.xlu1 %3943  ;;  %v4187_v3 = vmax.f32 %v3942_v11, 1e-24  ;;  %4121 = vadd.xlane.f32.xlu0 %v3893_v48  ;;  %9765 = vst [vmem:[#allocation36_spill] sm:$0xff] %v9395_v47  ;;  %v9397_v11 = vpop.f32.mrf.mxu0  ;;  %v3899_v48 = vmul.f32 %v9381_v42, %v9381_v42 }
 0x2a4   :  { %v4188_v1 = vmax.f32 %v3944_v15, 1e-24  ;;  %4123 = vadd.xlane.f32.xlu1 %v3894_v56  ;;  %v3900_v56 = vmul.f32 %v9395_v47, %v9395_v47  ;;  %v3834_v47 = vmul.f32 %v9397_v11, %v9397_v11 }
 0x2a5   :  { %8695 = vrsqrt.f32 %v4187_v3 }
 0x2a6   :  { %8697 = vrsqrt.f32 %v4188_v1 }
 0x2a7   :  { %4005 = vadd.xlane.f32.xlu0 %v3835_v62  ;;  %v9405_v62 = vpop.f32.mrf.mxu0 }
 0x2a8   :  { %4007 = vadd.xlane.f32.xlu1 %v3836_v13 }
 0x2aa   :  { %v8688_v5 = vpop.eup %8687 }
 0x2ab   :  { %v8690_v31 = vpop.eup %8689  ;;  %v4437_v15 = vmul.f32 %v8688_v5, %v9057_v49  ;;  %4133 = vadd.xlane.f32.xlu0 %v3899_v48  ;;  %v3833_v5 = vmul.f32 %v9379_v51, %v9379_v51  ;;  %v9415_v48 = vpop.f32.mrf.mxu0 }
 0x2ac   :  { %v4438_v3 = vmul.f32 %v8690_v31, %v9093_v45  ;;  %v4070_v1 = vpop.xlane.xlu0 %4069  ;;  %v4072_v19 = vpop.xlane.xlu1 %4071  ;;  %4135 = vadd.xlane.f32.xlu1 %v3900_v56  ;;  %9766 = vst [vmem:[#allocation37_spill] sm:$0xff] %v9415_v48 }
 0x2ad   :  { %v4251_v13 = vmax.f32 %v4070_v1, 1e-24  ;;  %v4252_v14 = vmax.f32 %v4072_v19, 1e-24  ;;  %v9412_v45 = vpop.f32.mrf.mxu1 }
 0x2ae   :  { %v8692_v25 = vpop.eup %8691  ;;  %v7544_v4 = vpack.c.bf16 %v4438_v3, %v4437_v15  ;;  %v3897_v3 = vmul.f32 %v9389_v57, %v9389_v57 }
 0x2af   :  { %v8694_v59 = vpop.eup %8693  ;;  %v4501_v49 = vmul.f32 %v8692_v25, %v9085_v26  ;;  %8699 = vrsqrt.f32 %v4251_v13  ;;  %4001 = vadd.xlane.f32.xlu0 %v3833_v5  ;;  %v9417_v26 = vpop.f32.mrf.mxu1 }
 0x2b0   :  { %8356 = vst [vmem:[#allocation7 + $0x10] sm:$0xff] %v7544_v4   ;;  %v4502_v31 = vmul.f32 %v8694_v59, %v9101_v32  ;;  %8701 = vrsqrt.f32 %v4252_v14  ;;  %4003 = vadd.xlane.f32.xlu1 %v3834_v47  ;;  %9767 = vst [vmem:[#allocation38_spill] sm:$0xff] %v9417_v26  ;;  %v3898_v4 = vmul.f32 %v9412_v45, %v9412_v45  ;;  %v9425_v59 = vpop.f32.mrf.mxu0 }
 0x2b1   :  { %v9427_v47 = vpop.f32.mrf.mxu1  ;;  %v3840_v5 = vmul.f32 %v9425_v59, %v9425_v59 }
 0x2b2   :  { %v8696_v19 = vpop.eup %8695  ;;  %v7704_v15 = vpack.c.bf16 %v4502_v31, %v4501_v49  ;;  %9768 = vst [vmem:[#allocation39_spill] sm:$0xff] %v9427_v47 }
 0x2b3   :  { %v8698_v25 = vpop.eup %8697  ;;  %v4443_v56 = vmul.f32 %v8696_v19, %v9095_v61  ;;  %4129 = vadd.xlane.f32.xlu0 %v3897_v3  ;;  %v3839_v61 = vmul.f32 %v9405_v62, %v9405_v62  ;;  %v9435_v19 = vpop.f32.mrf.mxu0 }
 0x2b4   :  { %8388 = vst [vmem:[#allocation7 + $0x110] sm:$0xff] %v7704_v15   ;;  %v4444_v32 = vmul.f32 %v8698_v25, %v9111_v53  ;;  %4131 = vadd.xlane.f32.xlu1 %v3898_v4  ;;  %v9433_v53 = vpop.f32.mrf.mxu1  ;;  %9770 = vst [vmem:[#allocation41_spill] sm:$0xff] %v9435_v19  ;;  %v3903_v15 = vmul.f32 %v9417_v26, %v9417_v26 }
 0x2b5   :  { %v3938_v14 = vpop.xlane.xlu0 %3937  ;;  %9769 = vst [vmem:[#allocation40_spill] sm:$0xff] %v9433_v53  ;;  %v3904_v25 = vmul.f32 %v9433_v53, %v9433_v53  ;;  %v3838_v53 = vmul.f32 %v9435_v19, %v9435_v19 }
 0x2b6   :  { %v7559_v1 = vpack.c.bf16 %v4444_v32, %v4443_v56  ;;  %v4185_v13 = vmax.f32 %v3938_v14, 1e-24  ;;  %v3940_v49 = vpop.xlane.xlu1 %3939  ;;  %v9442_v32 = vpop.f32.mrf.mxu0 }
 0x2b7   :  { %v4186_v31 = vmax.f32 %v3940_v49, 1e-24  ;;  %4013 = vadd.xlane.f32.xlu0 %v3839_v61  ;;  %v9445_v49 = vpop.f32.mrf.mxu1 }
 0x2b8   :  { %8359 = vst [vmem:[#allocation7 + $0x28] sm:$0xff] %v7559_v1   ;;  %8703 = vrsqrt.f32 %v4185_v13  ;;  %4015 = vadd.xlane.f32.xlu1 %v3840_v5  ;;  %9771 = vst [vmem:[#allocation42_spill] sm:$0xff] %v9445_v49 }
 0x2b9   :  { %8705 = vrsqrt.f32 %v4186_v31  ;;  %v3837_v31 = vmul.f32 %v9415_v48, %v9415_v48 }
 0x2bb   :  { %4141 = vadd.xlane.f32.xlu0 %v3903_v15  ;;  %v9453_v15 = vpop.f32.mrf.mxu1 }
 0x2bc   :  { %v8700_v56 = vpop.eup %8699  ;;  %4143 = vadd.xlane.f32.xlu1 %v3904_v25  ;;  %v4066_v1 = vpop.xlane.xlu0 %4065 }
 0x2bd   :  { %v8702_v3 = vpop.eup %8701  ;;  %v4507_v4 = vmul.f32 %v8700_v56, %v9121_v43  ;;  %v4068_v13 = vpop.xlane.xlu1 %4067  ;;  %v4249_v61 = vmax.f32 %v4066_v1, 1e-24  ;;  %v3901_v1 = vmul.f32 %v9427_v47, %v9427_v47 }
 0x2be   :  { %v4508_v14 = vmul.f32 %v8702_v3, %v9127_v41  ;;  %v4250_v5 = vmax.f32 %v4068_v13, 1e-24  ;;  %v9451_v43 = vpop.f32.mrf.mxu0  ;;  %v3902_v13 = vmul.f32 %v9445_v49, %v9445_v49 }
 0x2bf   :  { %8707 = vrsqrt.f32 %v4249_v61  ;;  %9772 = vst [vmem:[#allocation43_spill] sm:$0xff] %v9451_v43  ;;  %4009 = vadd.xlane.f32.xlu0 %v3837_v31  ;;  %v9461_v61 = vpop.f32.mrf.mxu1 }
 0x2c0   :  { %v7719_v26 = vpack.c.bf16 %v4508_v14, %v4507_v4  ;;  %4011 = vadd.xlane.f32.xlu1 %v3838_v53  ;;  %8709 = vrsqrt.f32 %v4250_v5  ;;  %v3950_v41 = vpop.xlane.xlu0 %3949  ;;  %v9459_v14 = vpop.f32.mrf.mxu0 }
 0x2c1   :  { %v3952_v25 = vpop.xlane.xlu1 %3951  ;;  %v4191_v56 = vmax.f32 %v3950_v41, 1e-24  ;;  %v3843_v41 = vmul.f32 %v9442_v32, %v9442_v32  ;;  %v3844_v19 = vmul.f32 %v9459_v14, %v9459_v14 }
 0x2c2   :  { %8391 = vst [vmem:[#allocation7 + $0x128] sm:$0xff] %v7719_v26   ;;  %v4192_v3 = vmax.f32 %v3952_v25, 1e-24 }
 0x2c3   :  { %8711 = vrsqrt.f32 %v4191_v56  ;;  %4137 = vadd.xlane.f32.xlu0 %v3901_v1  ;;  %v9469_v56 = vpop.f32.mrf.mxu1  ;;  %v3907_v1 = vmul.f32 %v9453_v15, %v9453_v15 }
 0x2c4   :  { %4139 = vadd.xlane.f32.xlu1 %v3902_v13  ;;  %8713 = vrsqrt.f32 %v4192_v3  ;;  %v4078_v5 = vpop.xlane.xlu0 %4077  ;;  %9773 = vst [vmem:[#allocation44_spill] sm:$0xff] %v9469_v56  ;;  %v9473_v13 = vpop.f32.mrf.mxu0 }
 0x2c5   :  { %v8704_v4 = vpop.eup %8703  ;;  %v4080_v31 = vpop.xlane.xlu1 %4079  ;;  %v4255_v49 = vmax.f32 %v4078_v5, 1e-24  ;;  %9774 = vst [vmem:[#allocation45_spill] sm:$0xff] %v9473_v13 }
 0x2c6   :  { %v8706_v26 = vpop.eup %8705  ;;  %v4441_v53 = vmul.f32 %v8704_v4, %v9099_v27  ;;  %v4256_v47 = vmax.f32 %v4080_v31, 1e-24 }
 0x2c7   :  { %v4442_v25 = vmul.f32 %v8706_v26, %v9133_v24  ;;  %8715 = vrsqrt.f32 %v4255_v49  ;;  %4021 = vadd.xlane.f32.xlu0 %v3843_v41  ;;  %v3908_v24 = vmul.f32 %v9469_v56, %v9469_v56  ;;  %v3842_v41 = vmul.f32 %v9473_v13, %v9473_v13 }
 0x2c8   :  { %4023 = vadd.xlane.f32.xlu1 %v3844_v19  ;;  %8717 = vrsqrt.f32 %v4256_v47  ;;  %v3946_v27 = vpop.xlane.xlu0 %3945  ;;  %v3841_v47 = vmul.f32 %v9451_v43, %v9451_v43 }
 0x2c9   :  { %v7554_v48 = vpack.c.bf16 %v4442_v25, %v4441_v53  ;;  %v3948_v3 = vpop.xlane.xlu1 %3947  ;;  %v4189_v4 = vmax.f32 %v3946_v27, 1e-24  ;;  %v9477_v53 = vpop.f32.mrf.mxu0 }
 0x2ca   :  { %v4190_v26 = vmax.f32 %v3948_v3, 1e-24  ;;  %v9484_v25 = vpop.f32.mrf.mxu1 }
 0x2cb   :  { %8358 = vst [vmem:[#allocation7 + $0x20] sm:$0xff] %v7554_v48   ;;  %8719 = vrsqrt.f32 %v4189_v4  ;;  %4149 = vadd.xlane.f32.xlu0 %v3907_v1 }
 0x2cc   :  { %4151 = vadd.xlane.f32.xlu1 %v3908_v24  ;;  %v8708_v19 = vpop.eup %8707  ;;  %8721 = vrsqrt.f32 %v4190_v26  ;;  %v4074_v48 = vpop.xlane.xlu0 %4073 }
 0x2cd   :  { %v4076_v49 = vpop.xlane.xlu1 %4075  ;;  %v8710_v5 = vpop.eup %8709  ;;  %v4505_v31 = vmul.f32 %v8708_v19, %v9125_v10  ;;  %v4253_v27 = vmax.f32 %v4074_v48, 1e-24  ;;  %v3905_v10 = vmul.f32 %v9461_v61, %v9461_v61 }
 0x2ce   :  { %v4254_v3 = vmax.f32 %v4076_v49, 1e-24  ;;  %v4506_v1 = vmul.f32 %v8710_v5, %v9141_v28  ;;  %v9487_v24 = vpop.f32.mrf.mxu0  ;;  %v9489_v4 = vpop.f32.mrf.mxu1  ;;  %v3906_v28 = vmul.f32 %v9484_v25, %v9484_v25 }
 0x2cf   :  { %8723 = vrsqrt.f32 %v4253_v27  ;;  %4017 = vadd.xlane.f32.xlu0 %v3841_v47 }
 0x2d0   :  { %4019 = vadd.xlane.f32.xlu1 %v3842_v41  ;;  %v8712_v26 = vpop.eup %8711  ;;  %v7714_v43 = vpack.c.bf16 %v4506_v1, %v4505_v31  ;;  %8725 = vrsqrt.f32 %v4254_v3  ;;  %v3958_v19 = vpop.xlane.xlu0 %3957 }
 0x2d1   :  { %v3960_v13 = vpop.xlane.xlu1 %3959  ;;  %v8714_v56 = vpop.eup %8713  ;;  %v4447_v48 = vmul.f32 %v8712_v26, %v9139_v12  ;;  %v4195_v49 = vmax.f32 %v3958_v19, 1e-24  ;;  %v3847_v12 = vmul.f32 %v9477_v53, %v9477_v53 }
 0x2d2   :  { %v4196_v5 = vmax.f32 %v3960_v13, 1e-24  ;;  %8390 = vst [vmem:[#allocation7 + $0x120] sm:$0xff] %v7714_v43   ;;  %v4448_v47 = vmul.f32 %v8714_v56, %v9151_v7  ;;  %v9497_v41 = vpop.f32.mrf.mxu0  ;;  %v9499_v31 = vpop.f32.mrf.mxu1 }
 0x2d3   :  { %8727 = vrsqrt.f32 %v4195_v49  ;;  %4145 = vadd.xlane.f32.xlu0 %v3905_v10  ;;  %v3848_v7 = vmul.f32 %v9497_v41, %v9497_v41 }
 0x2d4   :  { %4147 = vadd.xlane.f32.xlu1 %v3906_v28  ;;  %v8716_v27 = vpop.eup %8715  ;;  %v7569_v3 = vpack.c.bf16 %v4448_v47, %v4447_v48  ;;  %8729 = vrsqrt.f32 %v4196_v5  ;;  %v4086_v1 = vpop.xlane.xlu0 %4085  ;;  %v3911_v5 = vmul.f32 %v9489_v4, %v9489_v4 }
 0x2d5   :  { %v4088_v26 = vpop.xlane.xlu1 %4087  ;;  %v8718_v19 = vpop.eup %8717  ;;  %v4511_v43 = vmul.f32 %v8716_v27, %v9145_v40  ;;  %v4259_v56 = vmax.f32 %v4086_v1, 1e-24 }
 0x2d6   :  { %v4260_v13 = vmax.f32 %v4088_v26, 1e-24  ;;  %8361 = vst [vmem:[#allocation7 + $0x38] sm:$0xff] %v7569_v3   ;;  %v4512_v10 = vmul.f32 %v8718_v19, %v9159_v18  ;;  %v9507_v28 = vpop.f32.mrf.mxu1  ;;  %v9512_v26 = vpop.f32.mrf.mxu0 }
 0x2d7   :  { %8731 = vrsqrt.f32 %v4259_v56  ;;  %4029 = vadd.xlane.f32.xlu0 %v3847_v12  ;;  %v3912_v18 = vmul.f32 %v9507_v28, %v9507_v28 }
 0x2d8   :  { %4031 = vadd.xlane.f32.xlu1 %v3848_v7  ;;  %v8720_v48 = vpop.eup %8719  ;;  %v7729_v49 = vpack.c.bf16 %v4512_v10, %v4511_v43  ;;  %8733 = vrsqrt.f32 %v4260_v13  ;;  %v3954_v40 = vpop.xlane.xlu0 %3953 }
 0x2d9   :  { %v3956_v47 = vpop.xlane.xlu1 %3955  ;;  %v8722_v27 = vpop.eup %8721  ;;  %v4445_v1 = vmul.f32 %v8720_v48, %v9143_v55  ;;  %v4193_v3 = vmax.f32 %v3954_v40, 1e-24  ;;  %v3845_v55 = vmul.f32 %v9487_v24, %v9487_v24 }
 0x2da   :  { %v4194_v19 = vmax.f32 %v3956_v47, 1e-24  ;;  %8393 = vst [vmem:[#allocation7 + $0x138] sm:$0xff] %v7729_v49   ;;  %v4446_v12 = vmul.f32 %v8722_v27, %v9165_v22  ;;  %v9517_v43 = vpop.f32.mrf.mxu0  ;;  %v3846_v49 = vmul.f32 %v9512_v26, %v9512_v26  ;;  %v9524_v22 = vpop.f32.mrf.mxu1 }
 0x2db   :  { %8735 = vrsqrt.f32 %v4193_v3  ;;  %4157 = vadd.xlane.f32.xlu0 %v3911_v5 }
 0x2dc   :  { %4159 = vadd.xlane.f32.xlu1 %v3912_v18  ;;  %v8724_v7 = vpop.eup %8723  ;;  %v7564_v56 = vpack.c.bf16 %v4446_v12, %v4445_v1  ;;  %8737 = vrsqrt.f32 %v4194_v19  ;;  %v4082_v13 = vpop.xlane.xlu0 %4081 }
 0x2dd   :  { %v4084_v10 = vpop.xlane.xlu1 %4083  ;;  %v8726_v48 = vpop.eup %8725  ;;  %v4509_v40 = vmul.f32 %v8724_v7, %v9153_v44  ;;  %v4257_v47 = vmax.f32 %v4082_v13, 1e-24  ;;  %v3909_v44 = vmul.f32 %v9499_v31, %v9499_v31 }
 0x2de   :  { %v4258_v27 = vmax.f32 %v4084_v10, 1e-24  ;;  %8360 = vst [vmem:[#allocation7 + $0x30] sm:$0xff] %v7564_v56   ;;  %v4510_v5 = vmul.f32 %v8726_v48, %v9173_v52  ;;  %v9527_v1 = vpop.f32.mrf.mxu0  ;;  %v9529_v18 = vpop.f32.mrf.mxu1  ;;  %v3910_v52 = vmul.f32 %v9524_v22, %v9524_v22 }
 0x2df   :  { %8739 = vrsqrt.f32 %v4257_v47  ;;  %4025 = vadd.xlane.f32.xlu0 %v3845_v55 }
 0x2e0   :  { %4027 = vadd.xlane.f32.xlu1 %v3846_v49  ;;  %v8728_v3 = vpop.eup %8727  ;;  %v7724_v19 = vpack.c.bf16 %v4510_v5, %v4509_v40  ;;  %8741 = vrsqrt.f32 %v4258_v27  ;;  %v3966_v12 = vpop.xlane.xlu0 %3965 }
 0x2e1   :  { %v3968_v7 = vpop.xlane.xlu1 %3967  ;;  %v8730_v13 = vpop.eup %8729  ;;  %v4451_v56 = vmul.f32 %v8728_v3, %v9167_v21  ;;  %v4199_v10 = vmax.f32 %v3966_v12, 1e-24  ;;  %v3851_v21 = vmul.f32 %v9517_v43, %v9517_v43 }
 0x2e2   :  { %v4200_v48 = vmax.f32 %v3968_v7, 1e-24  ;;  %8392 = vst [vmem:[#allocation7 + $0x130] sm:$0xff] %v7724_v19   ;;  %v4452_v55 = vmul.f32 %v8730_v13, %v9183_v33  ;;  %v9537_v49 = vpop.f32.mrf.mxu0  ;;  %v9539_v40 = vpop.f32.mrf.mxu1 }
 0x2e3   :  { %8743 = vrsqrt.f32 %v4199_v10  ;;  %4153 = vadd.xlane.f32.xlu0 %v3909_v44  ;;  %v3852_v33 = vmul.f32 %v9537_v49, %v9537_v49 }
 0x2e4   :  { %4155 = vadd.xlane.f32.xlu1 %v3910_v52  ;;  %v8732_v47 = vpop.eup %8731  ;;  %v7579_v27 = vpack.c.bf16 %v4452_v55, %v4451_v56  ;;  %8745 = vrsqrt.f32 %v4200_v48  ;;  %v4094_v5 = vpop.xlane.xlu0 %4093  ;;  %v3915_v48 = vmul.f32 %v9529_v18, %v9529_v18 }
 0x2e5   :  { %v4096_v3 = vpop.xlane.xlu1 %4095  ;;  %v8734_v12 = vpop.eup %8733  ;;  %v4515_v19 = vmul.f32 %v8732_v47, %v9177_v46  ;;  %v4263_v7 = vmax.f32 %v4094_v5, 1e-24 }
 0x2e6   :  { %v4264_v13 = vmax.f32 %v4096_v3, 1e-24  ;;  %8363 = vst [vmem:[#allocation7 + $0x48] sm:$0xff] %v7579_v27   ;;  %v4516_v44 = vmul.f32 %v8734_v12, %v9191_v0  ;;  %v9547_v52 = vpop.f32.mrf.mxu1  ;;  %v9555_v12 = vpop.f32.mrf.mxu0 }
 0x2e7   :  { %8747 = vrsqrt.f32 %v4263_v7  ;;  %4037 = vadd.xlane.f32.xlu0 %v3851_v21  ;;  %v3916_v27 = vmul.f32 %v9547_v52, %v9547_v52 }
 0x2e8   :  { %4039 = vadd.xlane.f32.xlu1 %v3852_v33  ;;  %v8736_v56 = vpop.eup %8735  ;;  %v7739_v10 = vpack.c.bf16 %v4516_v44, %v4515_v19  ;;  %8749 = vrsqrt.f32 %v4264_v13  ;;  %v3962_v46 = vpop.xlane.xlu0 %3961 }
 0x2e9   :  { %v3964_v55 = vpop.xlane.xlu1 %3963  ;;  %v8738_v47 = vpop.eup %8737  ;;  %v4449_v5 = vmul.f32 %v8736_v56, %v9175_v34  ;;  %v4197_v0 = vmax.f32 %v3962_v46, 1e-24  ;;  %v3849_v56 = vmul.f32 %v9527_v1, %v9527_v1 }
 0x2ea   :  { %v4198_v3 = vmax.f32 %v3964_v55, 1e-24  ;;  %8395 = vst [vmem:[#allocation7 + $0x148] sm:$0xff] %v7739_v10   ;;  %v4450_v21 = vmul.f32 %v8738_v47, %v9197_v50  ;;  %v3850_v50 = vmul.f32 %v9555_v12, %v9555_v12  ;;  %v9565_v55 = vpop.f32.mrf.mxu1 }
 0x2eb   :  { %8751 = vrsqrt.f32 %v4197_v0  ;;  %4165 = vadd.xlane.f32.xlu0 %v3915_v48 }
 0x2ec   :  { %4167 = vadd.xlane.f32.xlu1 %v3916_v27  ;;  %v8740_v19 = vpop.eup %8739  ;;  %v7574_v33 = vpack.c.bf16 %v4450_v21, %v4449_v5  ;;  %8753 = vrsqrt.f32 %v4198_v3  ;;  %v4090_v13 = vpop.xlane.xlu0 %4089  ;;  %v3913_v21 = vmul.f32 %v9539_v40, %v9539_v40 }
 0x2ed   :  { %v8742_v34 = vpop.eup %8741  ;;  %v4513_v44 = vmul.f32 %v8740_v19, %v9185_v39  ;;  %v4261_v10 = vmax.f32 %v4090_v13, 1e-24  ;;  %v4092_v46 = vpop.xlane.xlu1 %4091 }
 0x2ee   :  { %v9557_v7 = vpop.f32.mrf.mxu0  ;;  %8362 = vst [vmem:[#allocation7 + $0x40] sm:$0xff] %v7574_v33   ;;  %v4514_v48 = vmul.f32 %v8742_v34, %v9205_v9  ;;  %v4262_v47 = vmax.f32 %v4092_v46, 1e-24  ;;  %v3914_v9 = vmul.f32 %v9565_v55, %v9565_v55 }
 0x2ef   :  { %8755 = vrsqrt.f32 %v4261_v10  ;;  %4033 = vadd.xlane.f32.xlu0 %v3849_v56 }
 0x2f0   :  { %v9567_v5 = vpop.f32.mrf.mxu0  ;;  %4035 = vadd.xlane.f32.xlu1 %v3850_v50  ;;  %v8744_v39 = vpop.eup %8743  ;;  %v7734_v27 = vpack.c.bf16 %v4514_v48, %v4513_v44  ;;  %8757 = vrsqrt.f32 %v4262_v47  ;;  %v3855_v47 = vmul.f32 %v9557_v7, %v9557_v7 }
 0x2f1   :  { %9775 = vst [vmem:[#allocation46_spill] sm:$0xff] %v9567_v5  ;;  %v3974_v0 = vpop.xlane.xlu0 %3973  ;;  %v8746_v3 = vpop.eup %8745  ;;  %v4455_v19 = vmul.f32 %v8744_v39, %v9199_v38 }
 0x2f2   :  { %v4203_v33 = vmax.f32 %v3974_v0, 1e-24  ;;  %v3976_v13 = vpop.xlane.xlu1 %3975  ;;  %8394 = vst [vmem:[#allocation7 + $0x140] sm:$0xff] %v7734_v27   ;;  %v4456_v34 = vmul.f32 %v8746_v3, %v9215_v63  ;;  %v9575_v56 = vpop.f32.mrf.mxu0  ;;  %v9777_v0 = vld [vmem:[#allocation13_spill] sm:$0xff] }
 0x2f3   :  { %9776 = vst [vmem:[#allocation47_spill] sm:$0xff] %v9575_v56  ;;  %v4204_v50 = vmax.f32 %v3976_v13, 1e-24  ;;  %4161 = vadd.xlane.f32.xlu0 %v3913_v21  ;;  %v3856_v39 = vmul.f32 %v9575_v56, %v9575_v56 }
 0x2f4   :  { %8759 = vrsqrt.f32 %v4203_v33  ;;  %4163 = vadd.xlane.f32.xlu1 %v3914_v9  ;;  %v8748_v44 = vpop.eup %8747  ;;  %v7589_v10 = vpack.c.bf16 %v4456_v34, %v4455_v19  ;;  %v9583_v21 = vpop.f32.mrf.mxu0  ;;  %v9779_v34 = vld [vmem:[#allocation11_spill] sm:$0xff] }
 0x2f5   :  { %8761 = vrsqrt.f32 %v4204_v50  ;;  %v4102_v46 = vpop.xlane.xlu0 %4101  ;;  %v8750_v48 = vpop.eup %8749  ;;  %v4519_v38 = vmul.f32 %v8748_v44, %v9209_v2  ;;  %9778 = vst [vmem:[#allocation13_spill] sm:$0xff] %v9583_v21  ;;  %v3853_v44 = vmul.f32 %v9567_v5, %v9567_v5 }
 0x2f6   :  { %v4267_v63 = vmax.f32 %v4102_v46, 1e-24  ;;  %v4104_v27 = vpop.xlane.xlu1 %4103  ;;  %8365 = vst [vmem:[#allocation7 + $0x58] sm:$0xff] %v7589_v10   ;;  %v4520_v3 = vmul.f32 %v8750_v48, %v9777_v0  ;;  %v3854_v10 = vmul.f32 %v9583_v21, %v9583_v21  ;;  %v9782_v21 = vld [vmem:[#allocation16_spill] sm:$0xff] }
 0x2f7   :  { %v4268_v9 = vmax.f32 %v4104_v27, 1e-24  ;;  %4045 = vadd.xlane.f32.xlu0 %v3855_v47  ;;  %v9780_v27 = vld [vmem:[#allocation14_spill] sm:$0xff] }
 0x2f8   :  { %8763 = vrsqrt.f32 %v4267_v63  ;;  %4047 = vadd.xlane.f32.xlu1 %v3856_v39  ;;  %v8752_v19 = vpop.eup %8751  ;;  %v7749_v33 = vpack.c.bf16 %v4520_v3, %v4519_v38 }
 0x2f9   :  { %8765 = vrsqrt.f32 %v4268_v9  ;;  %v3970_v2 = vpop.xlane.xlu0 %3969  ;;  %v8754_v13 = vpop.eup %8753  ;;  %v4453_v50 = vmul.f32 %v8752_v19, %v9779_v34  ;;  %v9781_v9 = vld [vmem:[#allocation12_spill] sm:$0xff] }
 0x2fa   :  { %v4201_v46 = vmax.f32 %v3970_v2, 1e-24  ;;  %v3972_v48 = vpop.xlane.xlu1 %3971  ;;  %8397 = vst [vmem:[#allocation7 + $0x158] sm:$0xff] %v7749_v33   ;;  %v4454_v63 = vmul.f32 %v8754_v13, %v9780_v27 }
 0x2fb   :  { %v4202_v47 = vmax.f32 %v3972_v48, 1e-24  ;;  %4041 = vadd.xlane.f32.xlu0 %v3853_v44  ;;  %v9785_v48 = vld [vmem:[#allocation15_spill] sm:$0xff] }
 0x2fc   :  { %8767 = vrsqrt.f32 %v4201_v46  ;;  %4043 = vadd.xlane.f32.xlu1 %v3854_v10  ;;  %v8756_v38 = vpop.eup %8755  ;;  %v7584_v39 = vpack.c.bf16 %v4454_v63, %v4453_v50 }
 0x2fd   :  { %8769 = vrsqrt.f32 %v4202_v47  ;;  %v4098_v0 = vpop.xlane.xlu0 %4097  ;;  %v8758_v3 = vpop.eup %8757  ;;  %v4517_v19 = vmul.f32 %v8756_v38, %v9781_v9 }
 0x2fe   :  { %v4265_v34 = vmax.f32 %v4098_v0, 1e-24  ;;  %v4100_v5 = vpop.xlane.xlu1 %4099  ;;  %8364 = vst [vmem:[#allocation7 + $0x50] sm:$0xff] %v7584_v39   ;;  %v4518_v2 = vmul.f32 %v8758_v3, %v9782_v21  ;;  %v9786_v21 = vld [vmem:[#allocation19_spill] sm:$0xff] }
 0x2ff   :  { %v4266_v33 = vmax.f32 %v4100_v5, 1e-24 }
 0x300   :  { %v9593_v56 = vpop.f32.mrf.mxu1  ;;  %8771 = vrsqrt.f32 %v4265_v34  ;;  %v7744_v46 = vpack.c.bf16 %v4518_v2, %v4517_v19 }
 0x301   :  { %9783 = vst [vmem:[#allocation11_spill] sm:$0xff] %v9593_v56  ;;  %v8760_v13 = vpop.eup %8759  ;;  %8773 = vrsqrt.f32 %v4266_v33  ;;  %v3982_v50 = vpop.xlane.xlu0 %3981  ;;  %v3919_v33 = vmul.f32 %v9593_v56, %v9593_v56 }
 0x302   :  { %v9595_v44 = vpop.f32.mrf.mxu1  ;;  %v8762_v10 = vpop.eup %8761  ;;  %v4459_v27 = vmul.f32 %v8760_v13, %v9785_v48  ;;  %v4207_v47 = vmax.f32 %v3982_v50, 1e-24  ;;  %8396 = vst [vmem:[#allocation7 + $0x150] sm:$0xff] %v7744_v46   ;;  %v9789_v13 = vld [vmem:[#allocation18_spill] sm:$0xff] }
 0x303   :  { %9784 = vst [vmem:[#allocation14_spill] sm:$0xff] %v9595_v44  ;;  %v3917_v63 = vmul.f32 %v9595_v44, %v9595_v44  ;;  %v3984_v38 = vpop.xlane.xlu1 %3983  ;;  %v4460_v39 = vmul.f32 %v8762_v10, %v9786_v21 }
 0x304   :  { %v9601_v0 = vpop.f32.mrf.mxu1  ;;  %v4208_v5 = vmax.f32 %v3984_v38, 1e-24  ;;  %8775 = vrsqrt.f32 %v4207_v47 }
 0x305   :  { %9787 = vst [vmem:[#allocation12_spill] sm:$0xff] %v9601_v0  ;;  %4169 = vadd.xlane.f32.xlu0 %v3917_v63  ;;  %v8764_v3 = vpop.eup %8763  ;;  %v7599_v9 = vpack.c.bf16 %v4460_v39, %v4459_v27  ;;  %v4110_v34 = vpop.xlane.xlu0 %4109  ;;  %v9790_v63 = vld [vmem:[#allocation21_spill] sm:$0xff] }
 0x306   :  { %v9603_v19 = vpop.f32.mrf.mxu1  ;;  %8777 = vrsqrt.f32 %v4208_v5  ;;  %v8766_v2 = vpop.eup %8765  ;;  %v4523_v50 = vmul.f32 %v8764_v3, %v9789_v13  ;;  %v4271_v10 = vmax.f32 %v4110_v34, 1e-24  ;;  %v3920_v3 = vmul.f32 %v9601_v0, %v9601_v0  ;;  %v9791_v13 = vld [vmem:[#allocation17_spill] sm:$0xff]  ;;  %v9794_v0 = vld [vmem:[#allocation24_spill] sm:$0xff] }
 0x307   :  { %9788 = vst [vmem:[#allocation16_spill] sm:$0xff] %v9603_v19  ;;  %v3918_v46 = vmul.f32 %v9603_v19, %v9603_v19  ;;  %v4112_v48 = vpop.xlane.xlu1 %4111  ;;  %8367 = vst [vmem:[#allocation7 + $0x68] sm:$0xff] %v7599_v9   ;;  %v4524_v47 = vmul.f32 %v8766_v2, %v9790_v63  ;;  %v9792_v9 = vld [vmem:[#allocation22_spill] sm:$0xff] }
 0x308   :  { %v4272_v38 = vmax.f32 %v4112_v48, 1e-24  ;;  %8779 = vrsqrt.f32 %v4271_v10  ;;  %v9793_v48 = vld [vmem:[#allocation20_spill] sm:$0xff] }
 0x309   :  { %4171 = vadd.xlane.f32.xlu1 %v3918_v46  ;;  %4173 = vadd.xlane.f32.xlu0 %v3919_v33  ;;  %v8768_v27 = vpop.eup %8767  ;;  %v7759_v21 = vpack.c.bf16 %v4524_v47, %v4523_v50  ;;  %v3978_v39 = vpop.xlane.xlu0 %3977 }
 0x30a   :  { %8781 = vrsqrt.f32 %v4272_v38  ;;  %v8770_v5 = vpop.eup %8769  ;;  %v4457_v56 = vmul.f32 %v8768_v27, %v9791_v13  ;;  %v4205_v19 = vmax.f32 %v3978_v39, 1e-24 }
 0x30b   :  { %v3980_v34 = vpop.xlane.xlu1 %3979  ;;  %8399 = vst [vmem:[#allocation7 + $0x168] sm:$0xff] %v7759_v21   ;;  %v4458_v44 = vmul.f32 %v8770_v5, %v9792_v9  ;;  %v9796_v9 = vld [vmem:[#allocation25_spill] sm:$0xff] }
 0x30c   :  { %v4206_v2 = vmax.f32 %v3980_v34, 1e-24  ;;  %8783 = vrsqrt.f32 %v4205_v19  ;;  %v9795_v19 = vld [vmem:[#allocation23_spill] sm:$0xff] }
 0x30d   :  { %4175 = vadd.xlane.f32.xlu1 %v3920_v3  ;;  %v8772_v33 = vpop.eup %8771  ;;  %v7594_v46 = vpack.c.bf16 %v4458_v44, %v4457_v56  ;;  %v4106_v50 = vpop.xlane.xlu0 %4105 }
 0x30e   :  { %8785 = vrsqrt.f32 %v4206_v2  ;;  %v8774_v10 = vpop.eup %8773  ;;  %v4521_v63 = vmul.f32 %v8772_v33, %v9793_v48  ;;  %v4269_v47 = vmax.f32 %v4106_v50, 1e-24 }
 0x30f   :  { %v4108_v38 = vpop.xlane.xlu1 %4107  ;;  %8366 = vst [vmem:[#allocation7 + $0x60] sm:$0xff] %v7594_v46   ;;  %v4522_v27 = vmul.f32 %v8774_v10, %v9794_v0 }
 0x310   :  { %v4270_v39 = vmax.f32 %v4108_v38, 1e-24  ;;  %8787 = vrsqrt.f32 %v4269_v47 }
 0x311   :  { %v8776_v21 = vpop.eup %8775  ;;  %v7754_v13 = vpack.c.bf16 %v4522_v27, %v4521_v63  ;;  %v3990_v5 = vpop.xlane.xlu0 %3989 }
 0x312   :  { %8789 = vrsqrt.f32 %v4270_v39  ;;  %v4463_v34 = vmul.f32 %v8776_v21, %v9795_v19  ;;  %v4211_v56 = vmax.f32 %v3990_v5, 1e-24 }
 0x313   :  { %v8778_v3 = vpop.eup %8777  ;;  %v3992_v44 = vpop.xlane.xlu1 %3991  ;;  %8398 = vst [vmem:[#allocation7 + $0x160] sm:$0xff] %v7754_v13  }
 0x314   :  { %v4464_v2 = vmul.f32 %v8778_v3, %v9796_v9  ;;  %v4212_v33 = vmax.f32 %v3992_v44, 1e-24  ;;  %8791 = vrsqrt.f32 %v4211_v56  ;;  %v9797_v56 = vld [vmem:[#allocation27_spill] sm:$0xff] }
 0x315   :  { %v8780_v50 = vpop.eup %8779  ;;  %v4118_v0 = vpop.xlane.xlu0 %4117 }
 0x316   :  { %v7609_v46 = vpack.c.bf16 %v4464_v2, %v4463_v34  ;;  %8793 = vrsqrt.f32 %v4212_v33  ;;  %v4527_v48 = vmul.f32 %v8780_v50, %v9273_v30  ;;  %v4275_v63 = vmax.f32 %v4118_v0, 1e-24  ;;  %v9798_v50 = vld [vmem:[#allocation26_spill] sm:$0xff] }
 0x317   :  { %v8782_v10 = vpop.eup %8781  ;;  %v4120_v47 = vpop.xlane.xlu1 %4119 }
 0x318   :  { %8369 = vst [vmem:[#allocation7 + $0x78] sm:$0xff] %v7609_v46   ;;  %v4528_v38 = vmul.f32 %v8782_v10, %v9289_v20  ;;  %v4276_v27 = vmax.f32 %v4120_v47, 1e-24  ;;  %8795 = vrsqrt.f32 %v4275_v63 }
 0x319   :  { %v8784_v39 = vpop.eup %8783  ;;  %v3986_v13 = vpop.xlane.xlu0 %3985 }
 0x31a   :  { %v7769_v21 = vpack.c.bf16 %v4528_v38, %v4527_v48  ;;  %8797 = vrsqrt.f32 %v4276_v27  ;;  %v4461_v3 = vmul.f32 %v8784_v39, %v9271_v36  ;;  %v4209_v19 = vmax.f32 %v3986_v13, 1e-24  ;;  %v9799_v48 = vld [vmem:[#allocation29_spill] sm:$0xff] }
 0x31b   :  { %v8786_v5 = vpop.eup %8785  ;;  %v3988_v34 = vpop.xlane.xlu1 %3987 }
 0x31c   :  { %8401 = vst [vmem:[#allocation7 + $0x178] sm:$0xff] %v7769_v21   ;;  %v4462_v44 = vmul.f32 %v8786_v5, %v9797_v56  ;;  %v4210_v30 = vmax.f32 %v3988_v34, 1e-24  ;;  %8799 = vrsqrt.f32 %v4209_v19  ;;  %v9800_v21 = vld [vmem:[#allocation28_spill] sm:$0xff]  ;;  %v9801_v19 = vld [vmem:[#allocation30_spill] sm:$0xff] }
 0x31d   :  { %v8788_v9 = vpop.eup %8787  ;;  %v4114_v20 = vpop.xlane.xlu0 %4113 }
 0x31e   :  { %v7604_v2 = vpack.c.bf16 %v4462_v44, %v4461_v3  ;;  %8801 = vrsqrt.f32 %v4210_v30  ;;  %v4525_v46 = vmul.f32 %v8788_v9, %v9798_v50  ;;  %v4273_v0 = vmax.f32 %v4114_v20, 1e-24 }
 0x31f   :  { %v8790_v33 = vpop.eup %8789  ;;  %v4116_v10 = vpop.xlane.xlu1 %4115 }
 0x320   :  { %8368 = vst [vmem:[#allocation7 + $0x70] sm:$0xff] %v7604_v2   ;;  %v4526_v63 = vmul.f32 %v8790_v33, %v9799_v48  ;;  %v4274_v36 = vmax.f32 %v4116_v10, 1e-24  ;;  %8803 = vrsqrt.f32 %v4273_v0 }
 0x321   :  { %v8792_v47 = vpop.eup %8791  ;;  %v3998_v27 = vpop.xlane.xlu0 %3997 }
 0x322   :  { %v7764_v38 = vpack.c.bf16 %v4526_v63, %v4525_v46  ;;  %8805 = vrsqrt.f32 %v4274_v36  ;;  %v4467_v13 = vmul.f32 %v8792_v47, %v9800_v21  ;;  %v4215_v5 = vmax.f32 %v3998_v27, 1e-24 }
 0x323   :  { %v8794_v39 = vpop.eup %8793  ;;  %v4000_v3 = vpop.xlane.xlu1 %3999 }
 0x324   :  { %8400 = vst [vmem:[#allocation7 + $0x170] sm:$0xff] %v7764_v38   ;;  %v4468_v34 = vmul.f32 %v8794_v39, %v9801_v19  ;;  %v4216_v56 = vmax.f32 %v4000_v3, 1e-24  ;;  %8807 = vrsqrt.f32 %v4215_v5 }
 0x325   :  { %v8796_v44 = vpop.eup %8795  ;;  %v4126_v9 = vpop.xlane.xlu0 %4125 }
 0x326   :  { %v7619_v30 = vpack.c.bf16 %v4468_v34, %v4467_v13  ;;  %8809 = vrsqrt.f32 %v4216_v56  ;;  %v4531_v20 = vmul.f32 %v8796_v44, %v9307_v58  ;;  %v4279_v33 = vmax.f32 %v4126_v9, 1e-24 }
 0x327   :  { %v8798_v2 = vpop.eup %8797  ;;  %v4128_v50 = vpop.xlane.xlu1 %4127 }
 0x328   :  { %8371 = vst [vmem:[#allocation7 + $0x88] sm:$0xff] %v7619_v30   ;;  %v4532_v46 = vmul.f32 %v8798_v2, %v9323_v8  ;;  %v4280_v0 = vmax.f32 %v4128_v50, 1e-24  ;;  %8811 = vrsqrt.f32 %v4279_v33 }
 0x329   :  { %v8800_v10 = vpop.eup %8799  ;;  %v3994_v63 = vpop.xlane.xlu0 %3993 }
 0x32a   :  { %v7779_v48 = vpack.c.bf16 %v4532_v46, %v4531_v20  ;;  %8813 = vrsqrt.f32 %v4280_v0  ;;  %v4465_v47 = vmul.f32 %v8800_v10, %v9305_v37  ;;  %v4213_v38 = vmax.f32 %v3994_v63, 1e-24 }
 0x32b   :  { %v8802_v36 = vpop.eup %8801  ;;  %v3996_v27 = vpop.xlane.xlu1 %3995 }
 0x32c   :  { %8403 = vst [vmem:[#allocation7 + $0x188] sm:$0xff] %v7779_v48   ;;  %v4466_v39 = vmul.f32 %v8802_v36, %v9329_v54  ;;  %v4214_v58 = vmax.f32 %v3996_v27, 1e-24  ;;  %8815 = vrsqrt.f32 %v4213_v38 }
 0x32d   :  { %v8804_v21 = vpop.eup %8803  ;;  %v4122_v8 = vpop.xlane.xlu0 %4121 }
 0x32e   :  { %v7614_v13 = vpack.c.bf16 %v4466_v39, %v4465_v47  ;;  %8817 = vrsqrt.f32 %v4214_v58  ;;  %v4529_v3 = vmul.f32 %v8804_v21, %v9315_v60  ;;  %v4277_v19 = vmax.f32 %v4122_v8, 1e-24  ;;  %v9802_v8 = vld [vmem:[#allocation32_spill] sm:$0xff] }
 0x32f   :  { %v8806_v5 = vpop.eup %8805  ;;  %v4124_v34 = vpop.xlane.xlu1 %4123 }
 0x330   :  { %8370 = vst [vmem:[#allocation7 + $0x80] sm:$0xff] %v7614_v13   ;;  %v4530_v56 = vmul.f32 %v8806_v5, %v9337_v6  ;;  %v4278_v37 = vmax.f32 %v4124_v34, 1e-24  ;;  %8819 = vrsqrt.f32 %v4277_v19 }
 0x331   :  { %v8808_v44 = vpop.eup %8807  ;;  %v4006_v54 = vpop.xlane.xlu0 %4005 }
 0x332   :  { %v7774_v30 = vpack.c.bf16 %v4530_v56, %v4529_v3  ;;  %8821 = vrsqrt.f32 %v4278_v37  ;;  %v4471_v2 = vmul.f32 %v8808_v44, %v9335_v16  ;;  %v4219_v20 = vmax.f32 %v4006_v54, 1e-24  ;;  %v9803_v56 = vld [vmem:[#allocation31_spill] sm:$0xff]  ;;  %v9804_v54 = vld [vmem:[#allocation34_spill] sm:$0xff] }
 0x333   :  { %v8810_v9 = vpop.eup %8809  ;;  %v4008_v33 = vpop.xlane.xlu1 %4007 }
 0x334   :  { %8402 = vst [vmem:[#allocation7 + $0x180] sm:$0xff] %v7774_v30   ;;  %v4472_v50 = vmul.f32 %v8810_v9, %v9355_v29  ;;  %v4220_v60 = vmax.f32 %v4008_v33, 1e-24  ;;  %8823 = vrsqrt.f32 %v4219_v20 }
 0x335   :  { %v8812_v46 = vpop.eup %8811  ;;  %v4134_v6 = vpop.xlane.xlu0 %4133 }
 0x336   :  { %v7629_v0 = vpack.c.bf16 %v4472_v50, %v4471_v2  ;;  %8825 = vrsqrt.f32 %v4220_v60  ;;  %v4535_v48 = vmul.f32 %v8812_v46, %v9344_v23  ;;  %v4283_v63 = vmax.f32 %v4134_v6, 1e-24  ;;  %v9805_v60 = vld [vmem:[#allocation33_spill] sm:$0xff] }
 0x337   :  { %v8814_v10 = vpop.eup %8813  ;;  %v4136_v36 = vpop.xlane.xlu1 %4135 }
 0x338   :  { %8373 = vst [vmem:[#allocation7 + $0x98] sm:$0xff] %v7629_v0   ;;  %v4536_v47 = vmul.f32 %v8814_v10, %v9361_v35  ;;  %v4284_v16 = vmax.f32 %v4136_v36, 1e-24  ;;  %8827 = vrsqrt.f32 %v4283_v63  ;;  %v9806_v10 = vld [vmem:[#allocation35_spill] sm:$0xff] }
 0x339   :  { %v8816_v38 = vpop.eup %8815  ;;  %v4002_v29 = vpop.xlane.xlu0 %4001 }
 0x33a   :  { %v7789_v27 = vpack.c.bf16 %v4536_v47, %v4535_v48  ;;  %8829 = vrsqrt.f32 %v4284_v16  ;;  %v4469_v58 = vmul.f32 %v8816_v38, %v9347_v17  ;;  %v4217_v21 = vmax.f32 %v4002_v29, 1e-24 }
 0x33b   :  { %v8818_v39 = vpop.eup %8817  ;;  %v4004_v13 = vpop.xlane.xlu1 %4003 }
 0x33c   :  { %8405 = vst [vmem:[#allocation7 + $0x198] sm:$0xff] %v7789_v27   ;;  %v4470_v5 = vmul.f32 %v8818_v39, %v9802_v8  ;;  %v4218_v23 = vmax.f32 %v4004_v13, 1e-24  ;;  %8831 = vrsqrt.f32 %v4217_v21 }
 0x33d   :  { %v8820_v3 = vpop.eup %8819  ;;  %v4130_v35 = vpop.xlane.xlu0 %4129 }
 0x33e   :  { %v7624_v19 = vpack.c.bf16 %v4470_v5, %v4469_v58  ;;  %8833 = vrsqrt.f32 %v4218_v23  ;;  %v4533_v37 = vmul.f32 %v8820_v3, %v9803_v56  ;;  %v4281_v44 = vmax.f32 %v4130_v35, 1e-24  ;;  %v9807_v58 = vld [vmem:[#allocation36_spill] sm:$0xff] }
 0x33f   :  { %v8822_v34 = vpop.eup %8821  ;;  %v4132_v30 = vpop.xlane.xlu1 %4131 }
 0x340   :  { %8372 = vst [vmem:[#allocation7 + $0x90] sm:$0xff] %v7624_v19   ;;  %v4534_v9 = vmul.f32 %v8822_v34, %v9804_v54  ;;  %v4282_v17 = vmax.f32 %v4132_v30, 1e-24  ;;  %8835 = vrsqrt.f32 %v4281_v44 }
 0x341   :  { %v8824_v2 = vpop.eup %8823  ;;  %v4014_v33 = vpop.xlane.xlu0 %4013 }
 0x342   :  { %v7784_v20 = vpack.c.bf16 %v4534_v9, %v4533_v37  ;;  %8837 = vrsqrt.f32 %v4282_v17  ;;  %v4475_v46 = vmul.f32 %v8824_v2, %v9805_v60  ;;  %v4223_v0 = vmax.f32 %v4014_v33, 1e-24 }
 0x343   :  { %v8826_v50 = vpop.eup %8825  ;;  %v4016_v6 = vpop.xlane.xlu1 %4015 }
 0x344   :  { %8404 = vst [vmem:[#allocation7 + $0x190] sm:$0xff] %v7784_v20   ;;  %v4476_v48 = vmul.f32 %v8826_v50, %v9806_v10  ;;  %v4224_v63 = vmax.f32 %v4016_v6, 1e-24  ;;  %8839 = vrsqrt.f32 %v4223_v0 }
 0x345   :  { %v8828_v36 = vpop.eup %8827  ;;  %v4142_v16 = vpop.xlane.xlu0 %4141 }
 0x346   :  { %v7639_v47 = vpack.c.bf16 %v4476_v48, %v4475_v46  ;;  %8841 = vrsqrt.f32 %v4224_v63  ;;  %v4539_v27 = vmul.f32 %v8828_v36, %v9381_v42  ;;  %v4287_v29 = vmax.f32 %v4142_v16, 1e-24 }
 0x347   :  { %v8830_v38 = vpop.eup %8829  ;;  %v4144_v39 = vpop.xlane.xlu1 %4143 }
 0x348   :  { %8375 = vst [vmem:[#allocation7 + $0xa8] sm:$0xff] %v7639_v47   ;;  %v4540_v21 = vmul.f32 %v8830_v38, %v9807_v58  ;;  %v4288_v13 = vmax.f32 %v4144_v39, 1e-24  ;;  %8843 = vrsqrt.f32 %v4287_v29  ;;  %v9808_v47 = vld [vmem:[#allocation38_spill] sm:$0xff]  ;;  %v9809_v29 = vld [vmem:[#allocation40_spill] sm:$0xff] }
 0x349   :  { %v8832_v8 = vpop.eup %8831  ;;  %v4010_v23 = vpop.xlane.xlu0 %4009 }
 0x34a   :  { %v7799_v5 = vpack.c.bf16 %v4540_v21, %v4539_v27  ;;  %8845 = vrsqrt.f32 %v4288_v13  ;;  %v4473_v19 = vmul.f32 %v8832_v8, %v9379_v51  ;;  %v4221_v35 = vmax.f32 %v4010_v23, 1e-24  ;;  %v9810_v8 = vld [vmem:[#allocation37_spill] sm:$0xff] }
 0x34b   :  { %v8834_v3 = vpop.eup %8833  ;;  %v4012_v34 = vpop.xlane.xlu1 %4011 }
 0x34c   :  { %8407 = vst [vmem:[#allocation7 + $0x1a8] sm:$0xff] %v7799_v5   ;;  %v4474_v56 = vmul.f32 %v8834_v3, %v9397_v11  ;;  %v4222_v42 = vmax.f32 %v4012_v34, 1e-24  ;;  %8847 = vrsqrt.f32 %v4221_v35 }
 0x34d   :  { %v8836_v37 = vpop.eup %8835  ;;  %v4138_v30 = vpop.xlane.xlu0 %4137 }
 0x34e   :  { %v7634_v44 = vpack.c.bf16 %v4474_v56, %v4473_v19  ;;  %8849 = vrsqrt.f32 %v4222_v42  ;;  %v4537_v9 = vmul.f32 %v8836_v37, %v9389_v57  ;;  %v4285_v17 = vmax.f32 %v4138_v30, 1e-24  ;;  %v9811_v19 = vld [vmem:[#allocation41_spill] sm:$0xff]  ;;  %v9812_v30 = vld [vmem:[#allocation39_spill] sm:$0xff] }
 0x34f   :  { %v8838_v54 = vpop.eup %8837  ;;  %v4140_v2 = vpop.xlane.xlu1 %4139 }
 0x350   :  { %8374 = vst [vmem:[#allocation7 + $0xa0] sm:$0xff] %v7634_v44   ;;  %v4538_v20 = vmul.f32 %v8838_v54, %v9412_v45  ;;  %v4286_v51 = vmax.f32 %v4140_v2, 1e-24  ;;  %8851 = vrsqrt.f32 %v4285_v17  ;;  %v9813_v2 = vld [vmem:[#allocation42_spill] sm:$0xff] }
 0x351   :  { %v8840_v33 = vpop.eup %8839  ;;  %v4022_v11 = vpop.xlane.xlu0 %4021 }
 0x352   :  { %v7794_v50 = vpack.c.bf16 %v4538_v20, %v4537_v9  ;;  %8853 = vrsqrt.f32 %v4286_v51  ;;  %v4479_v46 = vmul.f32 %v8840_v33, %v9405_v62  ;;  %v4227_v0 = vmax.f32 %v4022_v11, 1e-24 }
 0x353   :  { %v8842_v60 = vpop.eup %8841  ;;  %v4024_v6 = vpop.xlane.xlu1 %4023 }
 0x354   :  { %8406 = vst [vmem:[#allocation7 + $0x1a0] sm:$0xff] %v7794_v50   ;;  %v4480_v10 = vmul.f32 %v8842_v60, %v9425_v59  ;;  %v4228_v57 = vmax.f32 %v4024_v6, 1e-24  ;;  %8855 = vrsqrt.f32 %v4227_v0 }
 0x355   :  { %v8844_v48 = vpop.eup %8843  ;;  %v4150_v45 = vpop.xlane.xlu0 %4149 }
 0x356   :  { %v7649_v63 = vpack.c.bf16 %v4480_v10, %v4479_v46  ;;  %8857 = vrsqrt.f32 %v4228_v57  ;;  %v4543_v16 = vmul.f32 %v8844_v48, %v9808_v47  ;;  %v4291_v38 = vmax.f32 %v4150_v45, 1e-24 }
 0x357   :  { %v8846_v36 = vpop.eup %8845  ;;  %v4152_v27 = vpop.xlane.xlu1 %4151 }
 0x358   :  { %8377 = vst [vmem:[#allocation7 + $0xb8] sm:$0xff] %v7649_v63   ;;  %v4544_v39 = vmul.f32 %v8846_v36, %v9809_v29  ;;  %v4292_v62 = vmax.f32 %v4152_v27, 1e-24  ;;  %8859 = vrsqrt.f32 %v4291_v38  ;;  %v9814_v27 = vld [vmem:[#allocation44_spill] sm:$0xff] }
 0x359   :  { %v8848_v58 = vpop.eup %8847  ;;  %v4018_v59 = vpop.xlane.xlu0 %4017 }
 0x35a   :  { %v7809_v21 = vpack.c.bf16 %v4544_v39, %v4543_v16  ;;  %8861 = vrsqrt.f32 %v4292_v62  ;;  %v4477_v5 = vmul.f32 %v8848_v58, %v9810_v8  ;;  %v4225_v23 = vmax.f32 %v4018_v59, 1e-24 }
 0x35b   :  { %v8850_v13 = vpop.eup %8849  ;;  %v4020_v3 = vpop.xlane.xlu1 %4019 }
 0x35c   :  { %8409 = vst [vmem:[#allocation7 + $0x1b8] sm:$0xff] %v7809_v21   ;;  %v4478_v35 = vmul.f32 %v8850_v13, %v9811_v19  ;;  %v4226_v34 = vmax.f32 %v4020_v3, 1e-24  ;;  %8863 = vrsqrt.f32 %v4225_v23  ;;  %v9815_v21 = vld [vmem:[#allocation43_spill] sm:$0xff] }
 0x35d   :  { %v8852_v56 = vpop.eup %8851  ;;  %v4146_v37 = vpop.xlane.xlu0 %4145 }
 0x35e   :  { %v7644_v42 = vpack.c.bf16 %v4478_v35, %v4477_v5  ;;  %8865 = vrsqrt.f32 %v4226_v34  ;;  %v4541_v54 = vmul.f32 %v8852_v56, %v9812_v30  ;;  %v4289_v9 = vmax.f32 %v4146_v37, 1e-24  ;;  %v9816_v5 = vld [vmem:[#allocation45_spill] sm:$0xff] }
 0x35f   :  { %v8854_v44 = vpop.eup %8853  ;;  %v4148_v17 = vpop.xlane.xlu1 %4147 }
 0x360   :  { %8376 = vst [vmem:[#allocation7 + $0xb0] sm:$0xff] %v7644_v42   ;;  %v4542_v20 = vmul.f32 %v8854_v44, %v9813_v2  ;;  %v4290_v51 = vmax.f32 %v4148_v17, 1e-24  ;;  %8867 = vrsqrt.f32 %v4289_v9 }
 0x361   :  { %v8856_v33 = vpop.eup %8855  ;;  %v4030_v11 = vpop.xlane.xlu0 %4029 }
 0x362   :  { %v7804_v50 = vpack.c.bf16 %v4542_v20, %v4541_v54  ;;  %8869 = vrsqrt.f32 %v4290_v51  ;;  %v4483_v46 = vmul.f32 %v8856_v33, %v9442_v32  ;;  %v4231_v0 = vmax.f32 %v4030_v11, 1e-24 }
 0x363   :  { %v8858_v60 = vpop.eup %8857  ;;  %v4032_v6 = vpop.xlane.xlu1 %4031 }
 0x364   :  { %8408 = vst [vmem:[#allocation7 + $0x1b0] sm:$0xff] %v7804_v50   ;;  %v4484_v10 = vmul.f32 %v8858_v60, %v9459_v14  ;;  %v4232_v57 = vmax.f32 %v4032_v6, 1e-24  ;;  %8871 = vrsqrt.f32 %v4231_v0 }
 0x365   :  { %v8860_v48 = vpop.eup %8859  ;;  %v4158_v45 = vpop.xlane.xlu0 %4157 }
 0x366   :  { %v7659_v63 = vpack.c.bf16 %v4484_v10, %v4483_v46  ;;  %8873 = vrsqrt.f32 %v4232_v57  ;;  %v4547_v47 = vmul.f32 %v8860_v48, %v9453_v15  ;;  %v4295_v16 = vmax.f32 %v4158_v45, 1e-24 }
 0x367   :  { %v8862_v36 = vpop.eup %8861  ;;  %v4160_v38 = vpop.xlane.xlu1 %4159 }
 0x368   :  { %8379 = vst [vmem:[#allocation7 + $0xc8] sm:$0xff] %v7659_v63   ;;  %v4548_v29 = vmul.f32 %v8862_v36, %v9814_v27  ;;  %v4296_v32 = vmax.f32 %v4160_v38, 1e-24  ;;  %8875 = vrsqrt.f32 %v4295_v16 }
 0x369   :  { %v8864_v39 = vpop.eup %8863  ;;  %v4026_v14 = vpop.xlane.xlu0 %4025 }
 0x36a   :  { %v7819_v62 = vpack.c.bf16 %v4548_v29, %v4547_v47  ;;  %8877 = vrsqrt.f32 %v4296_v32  ;;  %v4481_v59 = vmul.f32 %v8864_v39, %v9815_v21  ;;  %v4229_v13 = vmax.f32 %v4026_v14, 1e-24 }
 0x36b   :  { %v8866_v58 = vpop.eup %8865  ;;  %v4028_v8 = vpop.xlane.xlu1 %4027 }
 0x36c   :  { %8411 = vst [vmem:[#allocation7 + $0x1c8] sm:$0xff] %v7819_v62   ;;  %v4482_v23 = vmul.f32 %v8866_v58, %v9816_v5  ;;  %v4230_v15 = vmax.f32 %v4028_v8, 1e-24  ;;  %8879 = vrsqrt.f32 %v4229_v13 }
 0x36d   :  { %v8868_v3 = vpop.eup %8867  ;;  %v4154_v35 = vpop.xlane.xlu0 %4153 }
 0x36e   :  { %v7654_v19 = vpack.c.bf16 %v4482_v23, %v4481_v59  ;;  %8881 = vrsqrt.f32 %v4230_v15  ;;  %v4545_v56 = vmul.f32 %v8868_v3, %v9461_v61  ;;  %v4293_v42 = vmax.f32 %v4154_v35, 1e-24 }
 0x36f   :  { %v8870_v34 = vpop.eup %8869  ;;  %v4156_v37 = vpop.xlane.xlu1 %4155 }
 0x370   :  { %8378 = vst [vmem:[#allocation7 + $0xc0] sm:$0xff] %v7654_v19   ;;  %v4546_v44 = vmul.f32 %v8870_v34, %v9484_v25  ;;  %v4294_v30 = vmax.f32 %v4156_v37, 1e-24  ;;  %8883 = vrsqrt.f32 %v4293_v42 }
 0x371   :  { %v8872_v54 = vpop.eup %8871  ;;  %v4038_v17 = vpop.xlane.xlu0 %4037 }
 0x372   :  { %v7814_v9 = vpack.c.bf16 %v4546_v44, %v4545_v56  ;;  %8885 = vrsqrt.f32 %v4294_v30  ;;  %v4487_v20 = vmul.f32 %v8872_v54, %v9477_v53  ;;  %v4235_v51 = vmax.f32 %v4038_v17, 1e-24 }
 0x373   :  { %v8874_v2 = vpop.eup %8873  ;;  %v4040_v33 = vpop.xlane.xlu1 %4039 }
 0x374   :  { %8410 = vst [vmem:[#allocation7 + $0x1c0] sm:$0xff] %v7814_v9   ;;  %v4488_v50 = vmul.f32 %v8874_v2, %v9497_v41  ;;  %v4236_v61 = vmax.f32 %v4040_v33, 1e-24  ;;  %8887 = vrsqrt.f32 %v4235_v51 }
 0x375   :  { %v8876_v11 = vpop.eup %8875  ;;  %v4166_v25 = vpop.xlane.xlu0 %4165 }
 0x376   :  { %v7669_v60 = vpack.c.bf16 %v4488_v50, %v4487_v20  ;;  %8889 = vrsqrt.f32 %v4236_v61  ;;  %v4551_v0 = vmul.f32 %v8876_v11, %v9489_v4  ;;  %v4299_v6 = vmax.f32 %v4166_v25, 1e-24 }
 0x377   :  { %v8878_v46 = vpop.eup %8877  ;;  %v4168_v10 = vpop.xlane.xlu1 %4167 }
 0x378   :  { %8381 = vst [vmem:[#allocation7 + $0xd8] sm:$0xff] %v7669_v60   ;;  %v4552_v57 = vmul.f32 %v8878_v46, %v9507_v28  ;;  %v4300_v53 = vmax.f32 %v4168_v10, 1e-24  ;;  %8891 = vrsqrt.f32 %v4299_v6 }
 0x379   :  { %v8880_v48 = vpop.eup %8879  ;;  %v4034_v41 = vpop.xlane.xlu0 %4033 }
 0x37a   :  { %v7829_v63 = vpack.c.bf16 %v4552_v57, %v4551_v0  ;;  %8893 = vrsqrt.f32 %v4300_v53  ;;  %v4485_v36 = vmul.f32 %v8880_v48, %v9487_v24  ;;  %v4233_v47 = vmax.f32 %v4034_v41, 1e-24  ;;  %v9817_v0 = vld [vmem:[#allocation47_spill] sm:$0xff]  ;;  %v9819_v41 = vld [vmem:[#allocation13_spill] sm:$0xff] }
 0x37b   :  { %v8882_v45 = vpop.eup %8881  ;;  %v4036_v16 = vpop.xlane.xlu1 %4035 }
 0x37c   :  { %8413 = vst [vmem:[#allocation7 + $0x1d8] sm:$0xff] %v7829_v63   ;;  %v4486_v38 = vmul.f32 %v8882_v45, %v9512_v26  ;;  %v4234_v4 = vmax.f32 %v4036_v16, 1e-24  ;;  %8895 = vrsqrt.f32 %v4233_v47  ;;  %v9820_v47 = vld [vmem:[#allocation14_spill] sm:$0xff] }
 0x37d   :  { %v8884_v27 = vpop.eup %8883  ;;  %v4162_v28 = vpop.xlane.xlu0 %4161 }
 0x37e   :  { %v7664_v29 = vpack.c.bf16 %v4486_v38, %v4485_v36  ;;  %8897 = vrsqrt.f32 %v4234_v4  ;;  %v4549_v39 = vmul.f32 %v8884_v27, %v9499_v31  ;;  %v4297_v62 = vmax.f32 %v4162_v28, 1e-24  ;;  %v9821_v27 = vld [vmem:[#allocation16_spill] sm:$0xff] }
 0x37f   :  { %v8886_v32 = vpop.eup %8885  ;;  %v4164_v14 = vpop.xlane.xlu1 %4163 }
 0x380   :  { %8380 = vst [vmem:[#allocation7 + $0xd0] sm:$0xff] %v7664_v29   ;;  %v4550_v58 = vmul.f32 %v8886_v32, %v9524_v22  ;;  %v4298_v24 = vmax.f32 %v4164_v14, 1e-24  ;;  %8899 = vrsqrt.f32 %v4297_v62  ;;  %v9822_v32 = vld [vmem:[#allocation11_spill] sm:$0xff]  ;;  %v9823_v14 = vld [vmem:[#allocation12_spill] sm:$0xff] }
 0x381   :  { %v8888_v21 = vpop.eup %8887  ;;  %v4046_v26 = vpop.xlane.xlu0 %4045 }
 0x382   :  { %v7824_v59 = vpack.c.bf16 %v4550_v58, %v4549_v39  ;;  %8901 = vrsqrt.f32 %v4298_v24  ;;  %v4491_v8 = vmul.f32 %v8888_v21, %v9517_v43  ;;  %v4239_v5 = vmax.f32 %v4046_v26, 1e-24 }
 0x383   :  { %v8890_v13 = vpop.eup %8889  ;;  %v4048_v23 = vpop.xlane.xlu1 %4047 }
 0x384   :  { %8412 = vst [vmem:[#allocation7 + $0x1d0] sm:$0xff] %v7824_v59   ;;  %v4492_v15 = vmul.f32 %v8890_v13, %v9537_v49  ;;  %v4240_v31 = vmax.f32 %v4048_v23, 1e-24  ;;  %8903 = vrsqrt.f32 %v4239_v5 }
 0x385   :  { %v8892_v3 = vpop.eup %8891  ;;  %v4042_v22 = vpop.xlane.xlu0 %4041 }
 0x386   :  { %v7679_v19 = vpack.c.bf16 %v4492_v15, %v4491_v8  ;;  %8905 = vrsqrt.f32 %v4240_v31  ;;  %v4555_v34 = vmul.f32 %v8892_v3, %v9529_v18  ;;  %v4237_v56 = vmax.f32 %v4042_v22, 1e-24 }
 0x387   :  { %v8894_v35 = vpop.eup %8893  ;;  %v4044_v42 = vpop.xlane.xlu1 %4043 }
 0x388   :  { %8383 = vst [vmem:[#allocation7 + $0xe8] sm:$0xff] %v7679_v19   ;;  %v4556_v37 = vmul.f32 %v8894_v35, %v9547_v52  ;;  %v4238_v43 = vmax.f32 %v4044_v42, 1e-24  ;;  %8907 = vrsqrt.f32 %v4237_v56 }
 0x389   :  { %v8896_v44 = vpop.eup %8895 }
 0x38a   :  { %v7839_v30 = vpack.c.bf16 %v4556_v37, %v4555_v34  ;;  %8909 = vrsqrt.f32 %v4238_v43  ;;  %v4489_v54 = vmul.f32 %v8896_v44, %v9527_v1 }
 0x38b   :  { %v8898_v49 = vpop.eup %8897 }
 0x38c   :  { %8415 = vst [vmem:[#allocation7 + $0x1e8] sm:$0xff] %v7839_v30   ;;  %v4490_v9 = vmul.f32 %v8898_v49, %v9555_v12 }
 0x38d   :  { %v8900_v17 = vpop.eup %8899 }
 0x38e   :  { %v7674_v2 = vpack.c.bf16 %v4490_v9, %v4489_v54  ;;  %v4170_v20 = vpop.xlane.xlu0 %4169  ;;  %v4553_v51 = vmul.f32 %v8900_v17, %v9539_v40 }
 0x38f   :  { %v8902_v18 = vpop.eup %8901  ;;  %v4301_v33 = vmax.f32 %v4170_v20, 1e-24 }
 0x390   :  { %8382 = vst [vmem:[#allocation7 + $0xe0] sm:$0xff] %v7674_v2   ;;  %v4554_v52 = vmul.f32 %v8902_v18, %v9565_v55  ;;  %v9818_v55 = vld [vmem:[#allocation46_spill] sm:$0xff] }
 0x391   :  { %8911 = vrsqrt.f32 %v4301_v33  ;;  %v8904_v50 = vpop.eup %8903 }
 0x392   :  { %v7834_v61 = vpack.c.bf16 %v4554_v52, %v4553_v51  ;;  %v4172_v11 = vpop.xlane.xlu1 %4171  ;;  %v4174_v60 = vpop.xlane.xlu0 %4173  ;;  %v4495_v1 = vmul.f32 %v8904_v50, %v9557_v7 }
 0x393   :  { %v8906_v25 = vpop.eup %8905  ;;  %v4302_v46 = vmax.f32 %v4172_v11, 1e-24  ;;  %v4303_v12 = vmax.f32 %v4174_v60, 1e-24 }
 0x394   :  { %8414 = vst [vmem:[#allocation7 + $0x1e0] sm:$0xff] %v7834_v61   ;;  %v4496_v6 = vmul.f32 %v8906_v25, %v9817_v0 }
 0x395   :  { %8913 = vrsqrt.f32 %v4302_v46  ;;  %v8908_v10 = vpop.eup %8907 }
 0x396   :  { %v7689_v40 = vpack.c.bf16 %v4496_v6, %v4495_v1  ;;  %8915 = vrsqrt.f32 %v4303_v12  ;;  %v4176_v57 = vpop.xlane.xlu1 %4175  ;;  %v4493_v48 = vmul.f32 %v8908_v10, %v9818_v55 }
 0x397   :  { %v8910_v53 = vpop.eup %8909  ;;  %v4304_v63 = vmax.f32 %v4176_v57, 1e-24 }
 0x398   :  { %8385 = vst [vmem:[#allocation7 + $0xf8] sm:$0xff] %v7689_v40   ;;  %v4494_v45 = vmul.f32 %v8910_v53, %v9819_v41 }
 0x399   :  { %8917 = vrsqrt.f32 %v4304_v63 }
 0x39a   :  { %v7684_v36 = vpack.c.bf16 %v4494_v45, %v4493_v48 }
 0x39c   :  { %8384 = vst [vmem:[#allocation7 + $0xf0] sm:$0xff] %v7684_v36  }
 0x39e   :  { %v8912_v7 = vpop.eup %8911 }
 0x39f   :  { %v4557_v16 = vmul.f32 %v8912_v7, %v9820_v47 }
 0x3a2   :  { %v8914_v38 = vpop.eup %8913 }
 0x3a3   :  { %v8916_v4 = vpop.eup %8915  ;;  %v4558_v29 = vmul.f32 %v8914_v38, %v9821_v27 }
 0x3a4   :  { %v4559_v39 = vmul.f32 %v8916_v4, %v9822_v32 }
 0x3a5   :  { %v7844_v28 = vpack.c.bf16 %v4558_v29, %v4557_v16 }
 0x3a6   :  { %v8918_v62 = vpop.eup %8917 }
 0x3a7   :  { %8416 = vst [vmem:[#allocation7 + $0x1f0] sm:$0xff] %v7844_v28   ;;  %v4560_v58 = vmul.f32 %v8918_v62, %v9823_v14 }
 0x3a9   :  { %v7849_v24 = vpack.c.bf16 %v4560_v58, %v4559_v39 }
 0x3ab   :  { %8417 = vst [vmem:[#allocation7 + $0x1f8] sm:$0xff] %v7849_v24  }
 0x3ac   :  { %8970 = shalt.err (!%p8967_p0)
}
 0x3ad   :  { %5212 = dma.vmem_to_hbm [thread:$0]  %s5207_s1, 8192, %s9697_s2, [#allocation4], %s8986_s12, %s8986_s12, %s8987_s13  }
 0x3ae   :  { %8983 = dma.done.wait [#allocation4], 8192  }
 0x3af   :  { %8984 = vsyncadd [#allocation4], 4294959104 }
 0x3b0   :  { %5216 = vsyncpa [#allocation3], 1 }
 0x3b1   :  { %5217 = vsyncpa [#allocation6], 1 }
 0x3b2   :  { %5218 = vsyncpa [#allocation4], 1 }

</bundles_post_ra>
